<compile_context>
chip_gen: v5e
topology: v5e:2x2
jax: 0.10.0
libtpu: 0.0.40
codegen_flags: <defaults>
</compile_context>

<pallas_src>
import functools

import jax
import jax.numpy as jnp
import numpy as np
from jax.experimental import pallas as pl
from jax.experimental.pallas import tpu as pltpu


# -----------------------------------------------------------------------------
# Pass A: conv (im2col + one MXU matmul per batch element) + BN statistics.
# Conv activations stream to HBM in bf16 (pipelined per-step writeback);
# per-channel sum / sum-of-squares accumulate in resident f32 output blocks.
# -----------------------------------------------------------------------------
def _conv_stats_kernel(x_ref, w_ref, conv_ref, sum_ref, ssq_ref, xpad_ref,
                       *, KH, KW, stride, pad, C1):
    n = pl.program_id(0)

    _, H, WC1 = x_ref.shape
    W = WC1 // C1
    Hp, WpC1 = xpad_ref.shape
    Wp = WpC1 // C1
    Ho = (Hp - KH) // stride + 1
    Wo = (Wp - KW) // stride + 1

    @pl.when(n == 0)
    def _init():
        # Zero halo persists across the batch: only the interior is rewritten.
        xpad_ref[...] = jnp.zeros_like(xpad_ref)
        sum_ref[...] = jnp.zeros_like(sum_ref)
        ssq_ref[...] = jnp.zeros_like(ssq_ref)

    # Spatial zero-padding folded into the kernel (lane-dense (H, W*C1) view).
    xpad_ref[pad:pad + H, pad * C1:pad * C1 + W * C1] = x_ref[0]

    # im2col shuffle in bf16 (copy/VPU bound work; MXU consumes bf16 anyway).
    xp = xpad_ref[...].astype(jnp.bfloat16)                       # (Hp, Wp*C1)
    cols = []
    for kh in range(KH):
        # One row-band per kh, reused across all KW offsets.
        band = xp[kh:kh + (Ho - 1) * stride + 1:stride, :]        # (Ho, Wp*C1)
        band3 = band.reshape(Ho, Wp, C1)
        for kw in range(KW):
            cols.append(band3[:, kw:kw + (Wo - 1) * stride + 1:stride, :])
    lhs = jnp.concatenate(cols, axis=-1).reshape(Ho * Wo, KH * KW * C1)

    acc = jnp.dot(lhs, w_ref[...],
                  preferred_element_type=jnp.float32)             # (HoWo, C2p)

    # Stream conv activations to HBM in bf16 (pipelined writeback).
    conv_ref[0] = acc.astype(jnp.bfloat16)

    # BN statistics from the f32 accumulator.
    # TODO(synk): E[x^2]-E[x]^2 can cancel for large-mean activations; a
    # centered/Welford accumulation would be more robust than this one-pass form.
    sum_ref[...] += jnp.sum(acc, axis=0, keepdims=True)
    ssq_ref[...] += jnp.sum(acc * acc, axis=0, keepdims=True)


# -----------------------------------------------------------------------------
# Pass B: finalize training-mode BatchNorm (biased batch variance) + SiLU,
# tiled over (batch, row tiles) with lane-dense pipelined loads/stores.
# -----------------------------------------------------------------------------
def _bn_silu_kernel(conv_ref, sum_ref, ssq_ref, g_ref, b_ref, o_ref,
                    *, count, eps):
    inv_cnt = 1.0 / count
    mean = sum_ref[...] * inv_cnt                                 # (1, C2p)
    var = ssq_ref[...] * inv_cnt - mean * mean                    # biased (BN fwd)
    scale = g_ref[...] * jax.lax.rsqrt(var + eps)                 # gamma/sqrt(var+eps)
    shift = b_ref[...] - mean * scale

    z = conv_ref[0].astype(jnp.float32) * scale + shift           # (RT, C2p)
    # SiLU with the divide on the EUP (its own VLIW slot): z * sigmoid(z).
    sig = pl.reciprocal(1.0 + jnp.exp(-z), approx=True)
    o_ref[0] = (z * sig).astype(o_ref.dtype)


def _row_tile(howo, target=128):
    """Largest multiple-of-8 divisor of howo that is <= target (else howo)."""
    if howo <= target:
        return howo
    for rt in range(target, 7, -8):
        if howo % rt == 0:
            return rt
    return howo


def _vmem_limit(nbytes):
    # Generous multiplier for double-buffering / temporaries; clamp to a range
    # that is valid on v5e/v6e (128 MiB) and v7x (64 MiB physical).
    return int(min(max(3 * nbytes + (4 << 20), 32 << 20), 48 << 20))


@functools.partial(jax.jit, static_argnames=("stride", "padding", "eps"))
def conv_bn_silu(x_nchw, w_oihw, gamma, beta, *, stride=1, padding=None, eps=1e-5):
    """act(bn(conv(x))) matching the PyTorch Conv module.  Input/output NCHW."""
    N, C1, H, W = x_nchw.shape
    C2, C1w, KH, KW = w_oihw.shape
    assert C1 == C1w, "grouped conv (groups > 1) not supported"
    pad = (KH // 2) if padding is None else padding
    Hp, Wp = H + 2 * pad, W + 2 * pad
    Ho = (Hp - KH) // stride + 1
    Wo = (Wp - KW) // stride + 1
    HoWo = Ho * Wo
    K = KH * KW * C1
    C2p = 128 * pl.cdiv(C2, 128)          # lane-dense channel padding

    # Layout glue on tiny tensors: PyTorch NCHW interface -> lane-dense views.
    x_flat = jnp.transpose(x_nchw, (0, 2, 3, 1)).reshape(N, H, W * C1)
    w_k = jnp.transpose(w_oihw, (2, 3, 1, 0)).reshape(K, C2)          # im2col RHS
    w_k = jnp.pad(w_k, ((0, 0), (0, C2p - C2))).astype(jnp.bfloat16)  # MXU-native
    g_p = jnp.pad(gamma.reshape(1, C2).astype(jnp.float32), ((0, 0), (0, C2p - C2)))
    b_p = jnp.pad(beta.reshape(1, C2).astype(jnp.float32), ((0, 0), (0, C2p - C2)))

    # ---- Pass A: conv + BN statistics ---------------------------------------
    bytes_a = (2 * H * W * C1 * 4 + 2 * K * C2p * 2 + 2 * HoWo * C2p * 2 +
               HoWo * C2p * 4 + 2 * HoWo * K * 2 + Hp * Wp * C1 * 4 +
               4 * C2p * 4)
    conv_bf16, csum, cssq = pl.pallas_call(
        functools.partial(_conv_stats_kernel, KH=KH, KW=KW, stride=stride,
                          pad=pad, C1=C1),
        out_shape=(
            jax.ShapeDtypeStruct((N, HoWo, C2p), jnp.bfloat16),  # streamed conv
            jax.ShapeDtypeStruct((1, C2p), jnp.float32),         # sum
            jax.ShapeDtypeStruct((1, C2p), jnp.float32),         # sum of squares
        ),
        grid=(N,),
        in_specs=[
            pl.BlockSpec((1, H, W * C1), lambda n: (n, 0, 0)),
            pl.BlockSpec((K, C2p), lambda n: (0, 0)),
        ],
        out_specs=(
            pl.BlockSpec((1, HoWo, C2p), lambda n: (n, 0, 0)),   # pipelined writeback
            pl.BlockSpec((1, C2p), lambda n: (0, 0)),            # resident accumulator
            pl.BlockSpec((1, C2p), lambda n: (0, 0)),            # resident accumulator
        ),
        scratch_shapes=[pltpu.VMEM((Hp, Wp * C1), jnp.float32)],  # zero-halo tile
        compiler_params=pltpu.CompilerParams(
            # BN stats accumulate across the batch axis -> "arbitrary".
            dimension_semantics=("arbitrary",),
            vmem_limit_bytes=_vmem_limit(bytes_a)),
    )(x_flat, w_k)

    # ---- Pass B: BN finalize + SiLU, tiled and pipelined ---------------------
    RT = _row_tile(HoWo)
    bytes_b = 2 * RT * C2p * (2 + 4) + 5 * C2p * 4
    out_flat = pl.pallas_call(
        functools.partial(_bn_silu_kernel, count=float(N * HoWo), eps=eps),
        out_shape=jax.ShapeDtypeStruct((N, HoWo, C2p), jnp.float32),
        grid=(N, HoWo // RT),
        in_specs=[
            pl.BlockSpec((1, RT, C2p), lambda n, t: (n, t, 0)),
            pl.BlockSpec((1, C2p), lambda n, t: (0, 0)),
            pl.BlockSpec((1, C2p), lambda n, t: (0, 0)),
            pl.BlockSpec((1, C2p), lambda n, t: (0, 0)),
            pl.BlockSpec((1, C2p), lambda n, t: (0, 0)),
        ],
        out_specs=pl.BlockSpec((1, RT, C2p), lambda n, t: (n, t, 0)),
        compiler_params=pltpu.CompilerParams(
            # Both axes independent -> megacore can split them on v7x.
            dimension_semantics=("parallel", "parallel"),
            vmem_limit_bytes=_vmem_limit(bytes_b)),
    )(conv_bf16, csum, cssq, g_p, b_p)

    out = out_flat.reshape(N, Ho, Wo, C2p)[..., :C2]      # drop channel padding
    return jnp.transpose(out, (0, 3, 1, 2))               # back to NCHW


def _reference(x_nchw, w_oihw, gamma, beta, *, stride=1, padding=None, eps=1e-5):
    """Pure-JAX reference (lax conv + batch-stat BN + SiLU) for validation."""
    KH = w_oihw.shape[2]
    pad = (KH // 2) if padding is None else padding
    y = jax.lax.conv_general_dilated(
        x_nchw, w_oihw, window_strides=(stride, stride),
        padding=[(pad, pad), (pad, pad)],
        dimension_numbers=("NCHW", "OIHW", "NCHW"))
    mean = jnp.mean(y, axis=(0, 2, 3), keepdims=True)
    var = jnp.mean((y - mean) ** 2, axis=(0, 2, 3), keepdims=True)
    z = (y - mean) * jax.lax.rsqrt(var + eps)
    z = z * gamma.reshape(1, -1, 1, 1) + beta.reshape(1, -1, 1, 1)
    return z * jax.nn.sigmoid(z)


if __name__ == "__main__":
    # Conv(c1=4, c2=8, kernel_size=3, stride=1, padding=None -> 1, groups=1)
    N, C1, H, W = 2, 4, 16, 16
    C2, KSZ, STRIDE = 8, 3, 1

    key = jax.random.PRNGKey(0)
    kx, kw, kg, kb = jax.random.split(key, 4)
    x = jax.random.normal(kx, (N, C1, H, W), dtype=jnp.float32)
    # Deterministic synthetic parameters (shapes from nn.Conv2d / nn.BatchNorm2d).
    w = jax.random.normal(kw, (C2, C1, KSZ, KSZ), dtype=jnp.float32) * 0.1
    gamma = 1.0 + 0.1 * jax.random.normal(kg, (C2,), dtype=jnp.float32)
    beta = 0.1 * jax.random.normal(kb, (C2,), dtype=jnp.float32)

    out = conv_bn_silu(x, w, gamma, beta, stride=STRIDE)
    out = jax.block_until_ready(out)

    ref = jax.block_until_ready(_reference(x, w, gamma, beta, stride=STRIDE))
    # Loose tolerance: bf16 MXU operands + bf16 streamed activations + approx
    # EUP reciprocal in the SiLU epilogue (f32 accumulation / statistics).
    np.testing.assert_allclose(np.asarray(out), np.asarray(ref), atol=4e-2, rtol=4e-2)

    print("KERNEL_OK")
</pallas_src>

<mosaic_0001>
module attributes {stable_mosaic.version = 11 : i64} {
  func.func @_bn_silu_kernel(%arg0: i32, %arg1: i32, %arg2: memref<1x128x128xbf16, #tpu.memory_space<vmem>>, %arg3: memref<1x128xf32, #tpu.memory_space<vmem>>, %arg4: memref<1x128xf32, #tpu.memory_space<vmem>>, %arg5: memref<1x128xf32, #tpu.memory_space<vmem>>, %arg6: memref<1x128xf32, #tpu.memory_space<vmem>>, %arg7: memref<1x128x128xf32, #tpu.memory_space<vmem>>) attributes {dimension_semantics = [#tpu.dimension_semantics<parallel>, #tpu.dimension_semantics<parallel>], iteration_bounds = array<i64: 2, 2>, scalar_prefetch = 0 : i64, scratch_operands = 0 : i64, tpu.core_type = #tpu.core_type<tc>, window_params = [{transform_indices = @transform_0, window_bounds = array<i64: 1, 128, 128>}, {pipeline_mode = #tpu.pipeline_mode<synchronous>, transform_indices = @transform_1, window_bounds = array<i64: 1, 128>}, {pipeline_mode = #tpu.pipeline_mode<synchronous>, transform_indices = @transform_2, window_bounds = array<i64: 1, 128>}, {pipeline_mode = #tpu.pipeline_mode<synchronous>, transform_indices = @transform_3, window_bounds = array<i64: 1, 128>}, {pipeline_mode = #tpu.pipeline_mode<synchronous>, transform_indices = @transform_4, window_bounds = array<i64: 1, 128>}, {transform_indices = @transform_5, window_bounds = array<i64: 1, 128, 128>}]} {
    %c0 = arith.constant 0 : index
    %c0_0 = arith.constant 0 : index
    %0 = vector.load %arg3[%c0, %c0_0] : memref<1x128xf32, #tpu.memory_space<vmem>>, vector<1x128xf32>
    %cst = arith.constant 0.001953125 : f32
    %1 = vector.broadcast %cst : f32 to vector<1x128xf32>
    %2 = arith.mulf %0, %1 : vector<1x128xf32>
    %c0_1 = arith.constant 0 : index
    %c0_2 = arith.constant 0 : index
    %3 = vector.load %arg4[%c0_1, %c0_2] : memref<1x128xf32, #tpu.memory_space<vmem>>, vector<1x128xf32>
    %cst_3 = arith.constant 0.001953125 : f32
    %4 = vector.broadcast %cst_3 : f32 to vector<1x128xf32>
    %5 = arith.mulf %3, %4 : vector<1x128xf32>
    %6 = arith.mulf %2, %2 : vector<1x128xf32>
    %7 = arith.subf %5, %6 : vector<1x128xf32>
    %c0_4 = arith.constant 0 : index
    %c0_5 = arith.constant 0 : index
    %8 = vector.load %arg5[%c0_4, %c0_5] : memref<1x128xf32, #tpu.memory_space<vmem>>, vector<1x128xf32>
    %cst_6 = arith.constant 9.99999974E-6 : f32
    %9 = vector.broadcast %cst_6 : f32 to vector<1x128xf32>
    %10 = arith.addf %7, %9 : vector<1x128xf32>
    %11 = math.rsqrt %10 : vector<1x128xf32>
    %12 = arith.mulf %8, %11 : vector<1x128xf32>
    %c0_7 = arith.constant 0 : index
    %c0_8 = arith.constant 0 : index
    %13 = vector.load %arg6[%c0_7, %c0_8] : memref<1x128xf32, #tpu.memory_space<vmem>>, vector<1x128xf32>
    %14 = arith.mulf %2, %12 : vector<1x128xf32>
    %15 = arith.subf %13, %14 : vector<1x128xf32>
    %c0_9 = arith.constant 0 : index
    %c0_10 = arith.constant 0 : index
    %c0_11 = arith.constant 0 : index
    %16 = vector.load %arg2[%c0_9, %c0_10, %c0_11] : memref<1x128x128xbf16, #tpu.memory_space<vmem>>, vector<1x128x128xbf16>
    %17 = vector.shape_cast %16 : vector<1x128x128xbf16> to vector<128x128xbf16>
    %18 = arith.extf %17 : vector<128x128xbf16> to vector<128x128xf32>
    %19 = vector.broadcast %12 : vector<1x128xf32> to vector<128x128xf32>
    %20 = arith.mulf %18, %19 : vector<128x128xf32>
    %21 = vector.broadcast %15 : vector<1x128xf32> to vector<128x128xf32>
    %22 = arith.addf %20, %21 : vector<128x128xf32>
    %cst_12 = arith.constant 0.000000e+00 : f32
    %23 = vector.broadcast %cst_12 : f32 to vector<128x128xf32>
    %24 = arith.subf %23, %22 : vector<128x128xf32>
    %25 = math.exp %24 : vector<128x128xf32>
    %cst_13 = arith.constant 1.000000e+00 : f32
    %26 = vector.broadcast %cst_13 : f32 to vector<128x128xf32>
    %27 = arith.addf %26, %25 : vector<128x128xf32>
    %28 = tpu.reciprocal %27 {approx = true} : vector<128x128xf32> -> vector<128x128xf32>
    %29 = arith.mulf %22, %28 : vector<128x128xf32>
    %c0_14 = arith.constant 0 : index
    %c0_15 = arith.constant 0 : index
    %c0_16 = arith.constant 0 : index
    %30 = vector.load %arg7[%c0_14, %c0_15, %c0_16] : memref<1x128x128xf32, #tpu.memory_space<vmem>>, vector<1x128x128xf32>
    %31 = vector.shape_cast %30 : vector<1x128x128xf32> to vector<128x128xf32>
    %32 = vector.shape_cast %29 : vector<128x128xf32> to vector<1x128x128xf32>
    tpu.vector_store %arg7[%c0_14, %c0_15, %c0_16], %32 {strides = array<i32>} : memref<1x128x128xf32, #tpu.memory_space<vmem>>, vector<1x128x128xf32>,
    return
  }
  func.func @transform_0(%arg0: i32, %arg1: i32) -> (i32, i32, i32) {
    %c0_i32 = arith.constant 0 : i32
    %c0_i32_0 = arith.constant 0 : i32
    return %arg0, %arg1, %c0_i32 : i32, i32, i32
  }
  func.func @transform_1(%arg0: i32, %arg1: i32) -> (i32, i32) {
    %c0_i32 = arith.constant 0 : i32
    %c0_i32_0 = arith.constant 0 : i32
    %c0_i32_1 = arith.constant 0 : i32
    return %c0_i32, %c0_i32_0 : i32, i32
  }
  func.func @transform_2(%arg0: i32, %arg1: i32) -> (i32, i32) {
    %c0_i32 = arith.constant 0 : i32
    %c0_i32_0 = arith.constant 0 : i32
    %c0_i32_1 = arith.constant 0 : i32
    return %c0_i32, %c0_i32_0 : i32, i32
  }
  func.func @transform_3(%arg0: i32, %arg1: i32) -> (i32, i32) {
    %c0_i32 = arith.constant 0 : i32
    %c0_i32_0 = arith.constant 0 : i32
    %c0_i32_1 = arith.constant 0 : i32
    return %c0_i32, %c0_i32_0 : i32, i32
  }
  func.func @transform_4(%arg0: i32, %arg1: i32) -> (i32, i32) {
    %c0_i32 = arith.constant 0 : i32
    %c0_i32_0 = arith.constant 0 : i32
    %c0_i32_1 = arith.constant 0 : i32
    return %c0_i32, %c0_i32_0 : i32, i32
  }
  func.func @transform_5(%arg0: i32, %arg1: i32) -> (i32, i32, i32) {
    %c0_i32 = arith.constant 0 : i32
    %c0_i32_0 = arith.constant 0 : i32
    return %arg0, %arg1, %c0_i32 : i32, i32, i32
  }
}

module attributes {stable_mosaic.version = 11 : i64} {
  func.func @_conv_stats_kernel(%arg0: i32, %arg1: memref<1x16x64xf32, #tpu.memory_space<vmem>>, %arg2: memref<36x128xbf16, #tpu.memory_space<vmem>>, %arg3: memref<1x256x128xbf16, #tpu.memory_space<vmem>>, %arg4: memref<1x128xf32, #tpu.memory_space<vmem>>, %arg5: memref<1x128xf32, #tpu.memory_space<vmem>>, %arg6: memref<18x72xf32, #tpu.memory_space<vmem>>) attributes {dimension_semantics = [#tpu.dimension_semantics<arbitrary>], iteration_bounds = array<i64: 2>, scalar_prefetch = 0 : i64, scratch_operands = 1 : i64, tpu.core_type = #tpu.core_type<tc>, window_params = [{transform_indices = @transform_0, window_bounds = array<i64: 1, 16, 64>}, {pipeline_mode = #tpu.pipeline_mode<synchronous>, transform_indices = @transform_1, window_bounds = array<i64: 36, 128>}, {transform_indices = @transform_2, window_bounds = array<i64: 1, 256, 128>}, {pipeline_mode = #tpu.pipeline_mode<synchronous>, transform_indices = @transform_3, window_bounds = array<i64: 1, 128>}, {pipeline_mode = #tpu.pipeline_mode<synchronous>, transform_indices = @transform_4, window_bounds = array<i64: 1, 128>}]} {
    %c0_i32 = arith.constant 0 : i32
    %0 = arith.cmpi eq, %arg0, %c0_i32 : i32
    %1 = arith.extui %0 : i1 to i32
    %c0_i32_0 = arith.constant 0 : i32
    %2 = arith.cmpi ne, %1, %c0_i32_0 : i32
    scf.if %2 {
      %cst_20 = arith.constant 0.000000e+00 : f32
      %42 = vector.broadcast %cst_20 : f32 to vector<18x72xf32>
      %c0_21 = arith.constant 0 : index
      %c0_22 = arith.constant 0 : index
      %43 = vector.load %arg6[%c0_21, %c0_22] : memref<18x72xf32, #tpu.memory_space<vmem>>, vector<18x72xf32>
      tpu.vector_store %arg6[%c0_21, %c0_22], %42 {strides = array<i32>} : memref<18x72xf32, #tpu.memory_space<vmem>>, vector<18x72xf32>,
      %cst_23 = arith.constant 0.000000e+00 : f32
      %44 = vector.broadcast %cst_23 : f32 to vector<1x128xf32>
      %c0_24 = arith.constant 0 : index
      %c0_25 = arith.constant 0 : index
      %45 = vector.load %arg4[%c0_24, %c0_25] : memref<1x128xf32, #tpu.memory_space<vmem>>, vector<1x128xf32>
      tpu.vector_store %arg4[%c0_24, %c0_25], %44 {strides = array<i32>} : memref<1x128xf32, #tpu.memory_space<vmem>>, vector<1x128xf32>,
      %cst_26 = arith.constant 0.000000e+00 : f32
      %46 = vector.broadcast %cst_26 : f32 to vector<1x128xf32>
      %c0_27 = arith.constant 0 : index
      %c0_28 = arith.constant 0 : index
      %47 = vector.load %arg5[%c0_27, %c0_28] : memref<1x128xf32, #tpu.memory_space<vmem>>, vector<1x128xf32>
      tpu.vector_store %arg5[%c0_27, %c0_28], %46 {strides = array<i32>} : memref<1x128xf32, #tpu.memory_space<vmem>>, vector<1x128xf32>,
    } else {
    }
    %c0 = arith.constant 0 : index
    %c0_1 = arith.constant 0 : index
    %c0_2 = arith.constant 0 : index
    %3 = vector.load %arg1[%c0, %c0_1, %c0_2] : memref<1x16x64xf32, #tpu.memory_space<vmem>>, vector<1x16x64xf32>
    %4 = vector.shape_cast %3 : vector<1x16x64xf32> to vector<16x64xf32>
    %c1 = arith.constant 1 : index
    %c4 = arith.constant 4 : index
    %5 = vector.load %arg6[%c1, %c4] : memref<18x72xf32, #tpu.memory_space<vmem>>, vector<16x64xf32>
    tpu.vector_store %arg6[%c1, %c4], %4 {strides = array<i32>} : memref<18x72xf32, #tpu.memory_space<vmem>>, vector<16x64xf32>,
    %c0_3 = arith.constant 0 : index
    %c0_4 = arith.constant 0 : index
    %6 = vector.load %arg6[%c0_3, %c0_4] : memref<18x72xf32, #tpu.memory_space<vmem>>, vector<18x72xf32>
    %7 = arith.truncf %6 : vector<18x72xf32> to vector<18x72xbf16>
    %8 = vector.extract_strided_slice %7 {offsets = [0, 0], sizes = [16, 72], strides = [1, 1]} : vector<18x72xbf16> to vector<16x72xbf16>
    %9 = vector.shape_cast %8 : vector<16x72xbf16> to vector<16x18x4xbf16>
    %10 = vector.extract_strided_slice %9 {offsets = [0, 0, 0], sizes = [16, 16, 4], strides = [1, 1, 1]} : vector<16x18x4xbf16> to vector<16x16x4xbf16>
    %11 = vector.extract_strided_slice %9 {offsets = [0, 1, 0], sizes = [16, 16, 4], strides = [1, 1, 1]} : vector<16x18x4xbf16> to vector<16x16x4xbf16>
    %12 = vector.extract_strided_slice %9 {offsets = [0, 2, 0], sizes = [16, 16, 4], strides = [1, 1, 1]} : vector<16x18x4xbf16> to vector<16x16x4xbf16>
    %13 = vector.extract_strided_slice %7 {offsets = [1, 0], sizes = [16, 72], strides = [1, 1]} : vector<18x72xbf16> to vector<16x72xbf16>
    %14 = vector.shape_cast %13 : vector<16x72xbf16> to vector<16x18x4xbf16>
    %15 = vector.extract_strided_slice %14 {offsets = [0, 0, 0], sizes = [16, 16, 4], strides = [1, 1, 1]} : vector<16x18x4xbf16> to vector<16x16x4xbf16>
    %16 = vector.extract_strided_slice %14 {offsets = [0, 1, 0], sizes = [16, 16, 4], strides = [1, 1, 1]} : vector<16x18x4xbf16> to vector<16x16x4xbf16>
    %17 = vector.extract_strided_slice %14 {offsets = [0, 2, 0], sizes = [16, 16, 4], strides = [1, 1, 1]} : vector<16x18x4xbf16> to vector<16x16x4xbf16>
    %18 = vector.extract_strided_slice %7 {offsets = [2, 0], sizes = [16, 72], strides = [1, 1]} : vector<18x72xbf16> to vector<16x72xbf16>
    %19 = vector.shape_cast %18 : vector<16x72xbf16> to vector<16x18x4xbf16>
    %20 = vector.extract_strided_slice %19 {offsets = [0, 0, 0], sizes = [16, 16, 4], strides = [1, 1, 1]} : vector<16x18x4xbf16> to vector<16x16x4xbf16>
    %21 = vector.extract_strided_slice %19 {offsets = [0, 1, 0], sizes = [16, 16, 4], strides = [1, 1, 1]} : vector<16x18x4xbf16> to vector<16x16x4xbf16>
    %22 = vector.extract_strided_slice %19 {offsets = [0, 2, 0], sizes = [16, 16, 4], strides = [1, 1, 1]} : vector<16x18x4xbf16> to vector<16x16x4xbf16>
    %23 = tpu.concatenate %10, %11, %12, %15, %16, %17, %20, %21, %22 in 2 : vector<16x16x4xbf16>, vector<16x16x4xbf16>, vector<16x16x4xbf16>, vector<16x16x4xbf16>, vector<16x16x4xbf16>, vector<16x16x4xbf16>, vector<16x16x4xbf16>, vector<16x16x4xbf16>, vector<16x16x4xbf16> -> vector<16x16x36xbf16>
    %24 = vector.shape_cast %23 : vector<16x16x36xbf16> to vector<256x36xbf16>
    %c0_5 = arith.constant 0 : index
    %c0_6 = arith.constant 0 : index
    %25 = vector.load %arg2[%c0_5, %c0_6] : memref<36x128xbf16, #tpu.memory_space<vmem>>, vector<36x128xbf16>
    %cst = arith.constant dense<0.000000e+00> : vector<256x128xf32>
    %26 = tpu.matmul %24, %25, %cst {dimension_numbers = #tpu.dot_dimension_numbers<[1], [0], [0], [1], [0, 0, 1, 1], [], []>} : vector<256x36xbf16>, vector<36x128xbf16>, vector<256x128xf32> -> vector<256x128xf32>
    %27 = arith.truncf %26 : vector<256x128xf32> to vector<256x128xbf16>
    %c0_7 = arith.constant 0 : index
    %c0_8 = arith.constant 0 : index
    %c0_9 = arith.constant 0 : index
    %28 = vector.load %arg3[%c0_7, %c0_8, %c0_9] : memref<1x256x128xbf16, #tpu.memory_space<vmem>>, vector<1x256x128xbf16>
    %29 = vector.shape_cast %28 : vector<1x256x128xbf16> to vector<256x128xbf16>
    %30 = vector.shape_cast %27 : vector<256x128xbf16> to vector<1x256x128xbf16>
    tpu.vector_store %arg3[%c0_7, %c0_8, %c0_9], %30 {strides = array<i32>} : memref<1x256x128xbf16, #tpu.memory_space<vmem>>, vector<1x256x128xbf16>,
    %c0_10 = arith.constant 0 : index
    %c0_11 = arith.constant 0 : index
    %31 = vector.load %arg4[%c0_10, %c0_11] : memref<1x128xf32, #tpu.memory_space<vmem>>, vector<1x128xf32>
    %cst_12 = arith.constant dense<0.000000e+00> : vector<128xf32>
    %32 = vector.multi_reduction <add>, %26, %cst_12 [0] : vector<256x128xf32> to vector<128xf32>
    %33 = vector.shape_cast %32 : vector<128xf32> to vector<1x128xf32>
    %34 = arith.addf %31, %33 : vector<1x128xf32>
    %c0_13 = arith.constant 0 : index
    %c0_14 = arith.constant 0 : index
    %35 = vector.load %arg4[%c0_13, %c0_14] : memref<1x128xf32, #tpu.memory_space<vmem>>, vector<1x128xf32>
    tpu.vector_store %arg4[%c0_13, %c0_14], %34 {strides = array<i32>} : memref<1x128xf32, #tpu.memory_space<vmem>>, vector<1x128xf32>,
    %c0_15 = arith.constant 0 : index
    %c0_16 = arith.constant 0 : index
    %36 = vector.load %arg5[%c0_15, %c0_16] : memref<1x128xf32, #tpu.memory_space<vmem>>, vector<1x128xf32>
    %37 = arith.mulf %26, %26 : vector<256x128xf32>
    %cst_17 = arith.constant dense<0.000000e+00> : vector<128xf32>
    %38 = vector.multi_reduction <add>, %37, %cst_17 [0] : vector<256x128xf32> to vector<128xf32>
    %39 = vector.shape_cast %38 : vector<128xf32> to vector<1x128xf32>
    %40 = arith.addf %36, %39 : vector<1x128xf32>
    %c0_18 = arith.constant 0 : index
    %c0_19 = arith.constant 0 : index
    %41 = vector.load %arg5[%c0_18, %c0_19] : memref<1x128xf32, #tpu.memory_space<vmem>>, vector<1x128xf32>
    tpu.vector_store %arg5[%c0_18, %c0_19], %40 {strides = array<i32>} : memref<1x128xf32, #tpu.memory_space<vmem>>, vector<1x128xf32>,
    return
  }
  func.func @transform_0(%arg0: i32) -> (i32, i32, i32) {
    %c0_i32 = arith.constant 0 : i32
    %c0_i32_0 = arith.constant 0 : i32
    %c0_i32_1 = arith.constant 0 : i32
    return %arg0, %c0_i32, %c0_i32_0 : i32, i32, i32
  }
  func.func @transform_1(%arg0: i32) -> (i32, i32) {
    %c0_i32 = arith.constant 0 : i32
    %c0_i32_0 = arith.constant 0 : i32
    %c0_i32_1 = arith.constant 0 : i32
    return %c0_i32, %c0_i32_0 : i32, i32
  }
  func.func @transform_2(%arg0: i32) -> (i32, i32, i32) {
    %c0_i32 = arith.constant 0 : i32
    %c0_i32_0 = arith.constant 0 : i32
    %c0_i32_1 = arith.constant 0 : i32
    return %arg0, %c0_i32, %c0_i32_0 : i32, i32, i32
  }
  func.func @transform_3(%arg0: i32) -> (i32, i32) {
    %c0_i32 = arith.constant 0 : i32
    %c0_i32_0 = arith.constant 0 : i32
    %c0_i32_1 = arith.constant 0 : i32
    return %c0_i32, %c0_i32_0 : i32, i32
  }
  func.func @transform_4(%arg0: i32) -> (i32, i32) {
    %c0_i32 = arith.constant 0 : i32
    %c0_i32_0 = arith.constant 0 : i32
    %c0_i32_1 = arith.constant 0 : i32
    return %c0_i32, %c0_i32_0 : i32, i32
  }
}

</mosaic_0001>

<bundles_post_ra>
// kernel: conv_bn_silu.3
= control target key start
LH: loop header
LB: loop body
LE: loop exit
PB: predicated region body
PF: predicated region fallthrough
CT: control target
= control target key end

     0   :  { %s786_s18 = smov 0   ;;  %s788_s19 = smov 0   ;;  %s981_s0 = inlined_call_operand.vmem [shape: bf16[2,256,128], index: 0, kind: input, shape index: {}]   ;;  %s982_s1 = inlined_call_operand.vmem [shape: f32[1,128], index: 1, kind: input, shape index: {}]   ;;  %s983_s2 = inlined_call_operand.vmem [shape: f32[1,128], index: 2, kind: input, shape index: {}]   ;;  %s984_s3 = inlined_call_operand.vmem [shape: f32[1,128], index: 3, kind: input, shape index: {}]   ;;  %s985_s4 = inlined_call_operand.vmem [shape: f32[1,128], index: 4, kind: input, shape index: {}]   ;;  %s986_s5 = inlined_call_operand.vmem [shape: f32[2,256,128], index: 5, kind: output, shape index: {}]  }
   0x1   :  { %s790_s20 = smov 0   ;;  %s792_s21 = smov 0  }
   0x2   :  { %s794_s22 = smov 0  }
   0x3 LB: > { %s24_s23 = sadd.s32 1, %s746_s20  ;;  %s27_s24 = sadd.s32 1, %s750_s21  ;;  %s754_s22 = sphi %s794_s22, %s15_s22   ;;  %s750_s21 = sphi %s792_s21, %s990_s21   ;;  %s746_s20 = sphi %s790_s20, %s989_s20   ;;  %s742_s19 = sphi %s788_s19, %s988_s19   ;;  %s738_s18 = sphi %s786_s18, %s987_s18  }
   0x4   : > { %p25_p0 = scmp.ge.s32.totalorder %s24_s23, 2  ;;  %p562_p1 = scmp.ge.s32.totalorder %s754_s22, 1 }
   0x5   : > { %p208_p2 = scmp.lt.s32.totalorder %s754_s22, 5 }
   0x6   : > { %s992_s23 = smov (%p25_p0, %s24_s23), 0  ;;  %s994_s24 = smov (!%p25_p0, %s27_s24), %s750_s21 }
   0x7   : > { %p209_p3 = pnand %p562_p1, %p208_p2  ;;  %p29_p4 = scmp.ge.s32.totalorder %s994_s24, 2 }
   0x8   : > { %s563_s29 = sshll.u32 (!%p209_p3), %s738_s18, 4  ;;  %p245_p5 = scmp.lt.s32.totalorder (!%p209_p3), %s742_s19, 1 }
   0x9   : > { %s996_s24 = smov (%p29_p4, %s994_s24), 0  ;;  %212 = sbr.rel (%p209_p3) target bundleno = 98 (0x62), region = 40 }
   0xa   : > { %p247_p6 = scmp.lt.s32.totalorder (!%p209_p3), %s563_s29, 31 }
   0xe   : > { %v264_v0 = vld [vmem:[%s982_s1] sm:$0x1]  ;;  %s998_s19 = smov (!%p245_p5, %s742_s19), 1  ;;  %s1000_s29 = smov (!%p247_p6, %s563_s29), 31 }
   0xf   : > { %v266_v1 = vld [vmem:[%s983_s2] sm:$0x1]  ;;  %v265_v2 = vmul.f32 0.001953125, %v264_v0  ;;  %s564_s30 = sshll.u32 %s998_s19, 5 }
  0x10   : > { %v267_v3 = vmul.f32 0.001953125, %v266_v1  ;;  %s822_s6 = sadd.s32 %s564_s30, %s1000_s29  ;;  %v270_v12 = vld [vmem:[%s984_s3] sm:$0x1] }
  0x11   : > { %v268_v4 = vmul.f32 %v265_v2, %v265_v2  ;;  %s565_s7 = sshll.u32 %s822_s6, 2  ;;  %v283_v24 = vld [vmem:[%s985_s4] sm:$0x1]  ;;  %s568_s15 = sshll.u32 %s822_s6, 3 }
  0x12   : > { %s828_s10 = scalar_lea.vmem %s981_s0, %s565_s7  ;;  %s930_s18 = scalar_lea.vmem %s986_s5, %s568_s15 }
  0x13   : > { %v269_v5 = vsub.f32 %v267_v3, %v268_v4  ;;  %v572_v14 = vld [vmem:[%s828_s10] sm:$0xff]   ;;  %v603_v15 = vld [vmem:[%s828_s10 + $0x8] sm:$0xff]   ;;  %v604_v16 = vld [vmem:[%s828_s10 + $0x10] sm:$0xff]  }
  0x14   : > { %v605_v17 = vld [vmem:[%s828_s10 + $0x18] sm:$0xff]   ;;  %v573_v20 = vunpack.c.l.bf16 %v572_v14  ;;  %v574_v21 = vunpack.c.h.bf16 %v572_v14  ;;  %v577_v22 = vunpack.c.l.bf16 %v603_v15  ;;  %v606_v23 = vld [vmem:[%s828_s10 + $0x20] sm:$0xff]   ;;  %v578_v25 = vunpack.c.h.bf16 %v603_v15  ;;  %v607_v56 = vld [vmem:[%s828_s10 + $0x28] sm:$0xff]  }
  0x15   : > { %v271_v6 = vadd.f32 1e-05, %v269_v5  ;;  %v581_v26 = vunpack.c.l.bf16 %v604_v16  ;;  %v582_v27 = vunpack.c.h.bf16 %v604_v16  ;;  %v585_v28 = vunpack.c.l.bf16 %v605_v17  ;;  %v608_v61 = vld [vmem:[%s828_s10 + $0x30] sm:$0xff]  }
  0x16   : > { %v586_v31 = vunpack.c.h.bf16 %v605_v17  ;;  %v589_v32 = vunpack.c.l.bf16 %v606_v23  ;;  %v590_v60 = vunpack.c.h.bf16 %v606_v23  ;;  %v593_v4 = vunpack.c.l.bf16 %v607_v56 }
  0x17   : > { %650 = vrsqrt.f32 %v271_v6  ;;  %vm278_vm0 = vweird.f32 %v271_v6 }
  0x1d   : > { %v651_v7 = vpop.eup %650 }
  0x1e   : > { %v273_v8 = vmul.f32 %v651_v7, %v271_v6  ;;  %vm279_vm1 = vweird.f32 %v651_v7 }
  0x1f   : > { %vm280_vm2 = vmor %vm278_vm0, %vm279_vm1 }
  0x20   : > { %v274_v9 = vmul.f32 %v651_v7, %v273_v8  ;;  %v609_v8 = vld [vmem:[%s828_s10 + $0x38] sm:$0xff]  }
  0x21   : > { %v601_v16 = vunpack.c.l.bf16 %v609_v8 }
  0x22   : > { %v275_v10 = vmul.f32 0.5, %v274_v9 }
  0x24   : > { %v276_v11 = vsub.f32 1.5, %v275_v10  ;;  %v597_v10 = vunpack.c.l.bf16 %v608_v61 }
  0x26   : > { %v277_v13 = vmul.f32 %v651_v7, %v276_v11 }
  0x28   : > { %v281_v18 = vsel %vm280_vm2, %v651_v7, %v277_v13  ;;  %v594_v7 = vunpack.c.h.bf16 %v607_v56  ;;  %v598_v13 = vunpack.c.h.bf16 %v608_v61 }
  0x29   : > { %v282_v19 = vmul.f32 %v281_v18, %v270_v12 }
  0x2b   : > { %v284_v29 = vmul.f32 %v282_v19, %v265_v2  ;;  %v841_v30 = vperm.slane %v282_v19, 0  ;;  %v602_v19 = vunpack.c.h.bf16 %v609_v8 }
  0x2d   : > { %v285_v33 = vsub.f32 %v283_v24, %v284_v29  ;;  %v321_v34 = vmul.f32 %v573_v20, %v841_v30  ;;  %v322_v35 = vmul.f32 %v574_v21, %v841_v30  ;;  %v323_v36 = vmul.f32 %v577_v22, %v841_v30 }
  0x2e   : > { %v324_v37 = vmul.f32 %v578_v25, %v841_v30  ;;  %v325_v38 = vmul.f32 %v581_v26, %v841_v30  ;;  %v326_v39 = vmul.f32 %v582_v27, %v841_v30  ;;  %v327_v40 = vmul.f32 %v585_v28, %v841_v30 }
  0x2f   : > { %v850_v41 = vperm.slane %v285_v33, 0  ;;  %v328_v42 = vmul.f32 %v586_v31, %v841_v30  ;;  %v329_v43 = vmul.f32 %v589_v32, %v841_v30  ;;  %v330_v12 = vmul.f32 %v590_v60, %v841_v30 }
  0x30   : > { %v331_v15 = vmul.f32 %v593_v4, %v841_v30  ;;  %v332_v18 = vmul.f32 %v594_v7, %v841_v30  ;;  %v333_v20 = vmul.f32 %v597_v10, %v841_v30  ;;  %v334_v23 = vmul.f32 %v598_v13, %v841_v30 }
  0x31   : > { %v855_v44 = vadd.f32 %v850_v41, %v321_v34  ;;  %v858_v45 = vadd.f32 %v850_v41, %v322_v35  ;;  %v861_v46 = vadd.f32 %v850_v41, %v323_v36  ;;  %v864_v47 = vadd.f32 %v850_v41, %v324_v37 }
  0x32   : > { %v867_v48 = vadd.f32 %v850_v41, %v325_v38  ;;  %v870_v49 = vadd.f32 %v850_v41, %v326_v39  ;;  %v873_v50 = vadd.f32 %v850_v41, %v327_v40  ;;  %v876_v51 = vadd.f32 %v850_v41, %v328_v42 }
  0x33   : > { %v356_v52 = vsub.f32 0.0, %v855_v44  ;;  %v357_v53 = vsub.f32 0.0, %v858_v45  ;;  %v358_v54 = vsub.f32 0.0, %v861_v46  ;;  %v359_v55 = vsub.f32 0.0, %v864_v47 }
  0x34   : > { %v360_v57 = vsub.f32 0.0, %v867_v48  ;;  %v361_v58 = vsub.f32 0.0, %v870_v49  ;;  %v362_v59 = vsub.f32 0.0, %v873_v50  ;;  %v888_v1 = vadd.f32 %v850_v41, %v329_v43 }
  0x35   : > { %v372_v62 = vmul.f32 1.442695, %v356_v52  ;;  %v374_v63 = vmul.f32 1.442695, %v357_v53  ;;  %v376_v0 = vmul.f32 1.442695, %v358_v54  ;;  %v898_v22 = vadd.f32 %v850_v41, %v330_v12 }
  0x36   : > { %v378_v2 = vmul.f32 1.442695, %v359_v55  ;;  %v363_v3 = vsub.f32 0.0, %v876_v51  ;;  %v380_v5 = vmul.f32 1.442695, %v360_v57  ;;  %v364_v6 = vsub.f32 0.0, %v888_v1 }
  0x37   : > { %652 = vpow2.f32 %v372_v62  ;;  %v382_v9 = vmul.f32 1.442695, %v361_v58  ;;  %v384_v11 = vmul.f32 1.442695, %v362_v59  ;;  %v902_v26 = vadd.f32 %v850_v41, %v331_v15 }
  0x38   : > { %654 = vpow2.f32 %v374_v63  ;;  %v386_v14 = vmul.f32 1.442695, %v363_v3  ;;  %v388_v17 = vmul.f32 1.442695, %v364_v6  ;;  %v335_v27 = vmul.f32 %v601_v16, %v841_v30 }
  0x39   : > { %656 = vpow2.f32 %v376_v0  ;;  %v906_v31 = vadd.f32 %v850_v41, %v332_v18  ;;  %v336_v32 = vmul.f32 %v602_v19, %v841_v30  ;;  %v910_v35 = vadd.f32 %v850_v41, %v333_v20 }
  0x3a   : > { %658 = vpow2.f32 %v378_v2  ;;  %v365_v38 = vsub.f32 0.0, %v898_v22  ;;  %v914_v39 = vadd.f32 %v850_v41, %v334_v23  ;;  %v366_v30 = vsub.f32 0.0, %v902_v26 }
  0x3b   : > { %660 = vpow2.f32 %v380_v5  ;;  %v918_v43 = vadd.f32 %v850_v41, %v335_v27  ;;  %v367_v54 = vsub.f32 0.0, %v906_v31  ;;  %v923_v55 = vadd.f32 %v850_v41, %v336_v32 }
  0x3c   : > { %662 = vpow2.f32 %v382_v9  ;;  %v368_v58 = vsub.f32 0.0, %v910_v35  ;;  %v390_v61 = vmul.f32 1.442695, %v365_v38  ;;  %v369_v62 = vsub.f32 0.0, %v914_v39 }
  0x3d   : > { %v653_v21 = vpop.eup %652  ;;  %664 = vpow2.f32 %v384_v11  ;;  %v392_v0 = vmul.f32 1.442695, %v366_v30  ;;  %v370_v2 = vsub.f32 0.0, %v918_v43  ;;  %v394_v5 = vmul.f32 1.442695, %v367_v54 }
  0x3e   : > { %v655_v24 = vpop.eup %654  ;;  %v404_v25 = vadd.f32 1.0, %v653_v21  ;;  %666 = vpow2.f32 %v386_v14  ;;  %v371_v6 = vsub.f32 0.0, %v923_v55  ;;  %v396_v9 = vmul.f32 1.442695, %v368_v58 }
  0x3f   : > { %v657_v28 = vpop.eup %656  ;;  %v405_v29 = vadd.f32 1.0, %v655_v24  ;;  %668 = vpow2.f32 %v388_v17  ;;  %v398_v12 = vmul.f32 1.442695, %v369_v62  ;;  %v400_v14 = vmul.f32 1.442695, %v370_v2 }
  0x40   : > { %v659_v33 = vpop.eup %658  ;;  %670 = vrcp.f32 %v404_v25  ;;  %v406_v34 = vadd.f32 1.0, %v657_v28  ;;  %v402_v16 = vmul.f32 1.442695, %v371_v6 }
  0x41   : > { %v661_v36 = vpop.eup %660  ;;  %672 = vrcp.f32 %v405_v29  ;;  %v407_v37 = vadd.f32 1.0, %v659_v33 }
  0x42   : > { %v663_v40 = vpop.eup %662  ;;  %674 = vrcp.f32 %v406_v34  ;;  %v408_v42 = vadd.f32 1.0, %v661_v36 }
  0x43   : > { %v665_v52 = vpop.eup %664  ;;  %676 = vrcp.f32 %v407_v37  ;;  %v409_v53 = vadd.f32 1.0, %v663_v40 }
  0x44   : > { %v667_v56 = vpop.eup %666  ;;  %678 = vrcp.f32 %v408_v42  ;;  %v410_v57 = vadd.f32 1.0, %v665_v52 }
  0x45   : > { %v669_v59 = vpop.eup %668  ;;  %680 = vrcp.f32 %v409_v53  ;;  %v411_v60 = vadd.f32 1.0, %v667_v56 }
  0x46   : > { %v671_v63 = vpop.eup %670  ;;  %682 = vrcp.f32 %v410_v57  ;;  %v412_v41 = vadd.f32 1.0, %v669_v59 }
  0x47   : > { %v673_v3 = vpop.eup %672  ;;  %v436_v4 = vmul.f32 %v671_v63, %v855_v44  ;;  %684 = vrcp.f32 %v411_v60 }
  0x48   : > { %v675_v7 = vpop.eup %674  ;;  %v437_v8 = vmul.f32 %v673_v3, %v858_v45  ;;  %686 = vrcp.f32 %v412_v41 }
  0x49   : > { %v677_v10 = vpop.eup %676  ;;  %452 = vst [vmem:[%s930_s18] sm:$0xff] %v436_v4  ;;  %v438_v11 = vmul.f32 %v675_v7, %v861_v46  ;;  %688 = vpow2.f32 %v390_v61 }
  0x4a   : > { %v679_v13 = vpop.eup %678  ;;  %453 = vst [vmem:[%s930_s18 + $0x8] sm:$0xff] %v437_v8  ;;  %v439_v44 = vmul.f32 %v677_v10, %v864_v47  ;;  %690 = vpow2.f32 %v392_v0 }
  0x4b   : > { %v681_v15 = vpop.eup %680  ;;  %454 = vst [vmem:[%s930_s18 + $0x10] sm:$0xff] %v438_v11  ;;  %v440_v45 = vmul.f32 %v679_v13, %v867_v48  ;;  %692 = vpow2.f32 %v394_v5 }
  0x4c   : > { %v683_v17 = vpop.eup %682  ;;  %455 = vst [vmem:[%s930_s18 + $0x18] sm:$0xff] %v439_v44  ;;  %v441_v46 = vmul.f32 %v681_v15, %v870_v49  ;;  %694 = vpow2.f32 %v396_v9 }
  0x4d   : > { %v685_v18 = vpop.eup %684  ;;  %456 = vst [vmem:[%s930_s18 + $0x20] sm:$0xff] %v440_v45  ;;  %v442_v47 = vmul.f32 %v683_v17, %v873_v50  ;;  %696 = vpow2.f32 %v398_v12 }
  0x4e   : > { %v687_v19 = vpop.eup %686  ;;  %457 = vst [vmem:[%s930_s18 + $0x28] sm:$0xff] %v441_v46  ;;  %v443_v20 = vmul.f32 %v685_v18, %v876_v51  ;;  %698 = vpow2.f32 %v400_v14 }
  0x4f   : > { %v689_v48 = vpop.eup %688  ;;  %458 = vst [vmem:[%s930_s18 + $0x30] sm:$0xff] %v442_v47  ;;  %v444_v21 = vmul.f32 %v687_v19, %v888_v1  ;;  %700 = vpow2.f32 %v402_v16 }
  0x50   : > { %v691_v23 = vpop.eup %690  ;;  %459 = vst [vmem:[%s930_s18 + $0x38] sm:$0xff] %v443_v20  ;;  %v413_v49 = vadd.f32 1.0, %v689_v48 }
  0x51   : > { %v693_v24 = vpop.eup %692  ;;  %460 = vst [vmem:[%s930_s18 + $0x40] sm:$0xff] %v444_v21  ;;  %v414_v25 = vadd.f32 1.0, %v691_v23 }
  0x52   : > { %v695_v27 = vpop.eup %694  ;;  %702 = vrcp.f32 %v413_v49  ;;  %v415_v50 = vadd.f32 1.0, %v693_v24 }
  0x53   : > { %v697_v28 = vpop.eup %696  ;;  %704 = vrcp.f32 %v414_v25  ;;  %v416_v29 = vadd.f32 1.0, %v695_v27 }
  0x54   : > { %v699_v32 = vpop.eup %698  ;;  %706 = vrcp.f32 %v415_v50  ;;  %v417_v51 = vadd.f32 1.0, %v697_v28 }
  0x55   : > { %v701_v33 = vpop.eup %700  ;;  %708 = vrcp.f32 %v416_v29  ;;  %v418_v1 = vadd.f32 1.0, %v699_v32 }
  0x56   : > { %710 = vrcp.f32 %v417_v51  ;;  %v419_v34 = vadd.f32 1.0, %v701_v33 }
  0x57   : > { %712 = vrcp.f32 %v418_v1 }
  0x58   : > { %v703_v36 = vpop.eup %702  ;;  %714 = vrcp.f32 %v419_v34 }
  0x59   : > { %v705_v37 = vpop.eup %704  ;;  %v445_v38 = vmul.f32 %v703_v36, %v898_v22 }
  0x5a   : > { %v707_v40 = vpop.eup %706  ;;  %v446_v42 = vmul.f32 %v705_v37, %v902_v26 }
  0x5b   : > { %v709_v30 = vpop.eup %708  ;;  %461 = vst [vmem:[%s930_s18 + $0x48] sm:$0xff] %v445_v38  ;;  %v447_v52 = vmul.f32 %v707_v40, %v906_v31 }
  0x5c   : > { %v711_v53 = vpop.eup %710  ;;  %462 = vst [vmem:[%s930_s18 + $0x50] sm:$0xff] %v446_v42  ;;  %v448_v54 = vmul.f32 %v709_v30, %v910_v35 }
  0x5d   : > { %v713_v56 = vpop.eup %712  ;;  %463 = vst [vmem:[%s930_s18 + $0x58] sm:$0xff] %v447_v52  ;;  %v449_v57 = vmul.f32 %v711_v53, %v914_v39 }
  0x5e   : > { %v715_v58 = vpop.eup %714  ;;  %464 = vst [vmem:[%s930_s18 + $0x60] sm:$0xff] %v448_v54  ;;  %v450_v22 = vmul.f32 %v713_v56, %v918_v43 }
  0x5f   : > { %465 = vst [vmem:[%s930_s18 + $0x68] sm:$0xff] %v449_v57  ;;  %v451_v26 = vmul.f32 %v715_v58, %v923_v55 }
  0x60   : > { %466 = vst [vmem:[%s930_s18 + $0x70] sm:$0xff] %v450_v22 }
  0x61   : > { %467 = vst [vmem:[%s930_s18 + $0x78] sm:$0xff] %v451_v26 }
  0x62 PF: > { %s15_s22 = sadd.s32 1, %s754_s22   ;;  %s987_s18 = smov %s746_s20 }
  0x63   : > { %p12_p7 = scmp.ge.s32.totalorder %s15_s22, 6   ;;  %s988_s19 = smov %s750_s21 }
  0x64   : > { %s989_s20 = smov %s992_s23  ;;  %s990_s21 = smov %s996_s24 }
  0x65   :  { %14 = sbr.rel (!%p12_p7) target bundleno = 3 (0x3), region = 70 }

// kernel: conv_bn_silu.2
= control target key start
LH: loop header
LB: loop body
LE: loop exit
PB: predicated region body
PF: predicated region fallthrough
CT: control target
= control target key end

     0   :  { %s4416_s15 = smov 0   ;;  %s7736_s0 = inlined_call_operand.vmem [shape: f32[2,16,64], index: 0, kind: input, shape index: {}]   ;;  %s7737_s1 = inlined_call_operand.vmem [shape: bf16[36,128], index: 1, kind: input, shape index: {}]   ;;  %s7738_s2 = inlined_call_operand.vmem [shape: bf16[2,256,128], index: 2, kind: output, shape index: {0}]   ;;  %s7739_s3 = inlined_call_operand.vmem [shape: f32[1,128], index: 3, kind: output, shape index: {1}]   ;;  %s7740_s4 = inlined_call_operand.vmem [shape: f32[1,128], index: 4, kind: output, shape index: {2}]  }
   0x1 LB: > { %s4157_s16 = sadd.s32 4294967295, %s4361_s15   ;;  %p4161_p0 = scmp.ge.s32.totalorder %s4361_s15, 1  ;;  %s4361_s15 = sphi %s4416_s15, %s15_s15  }
   0x2   : > { %p157_p1 = scmp.lt.s32.totalorder %s4361_s15, 3 }
   0x4   : > { %p158_p2 = pnand %p4161_p0, %p157_p1 }
   0x6   : > { %161 = sbr.rel (%p158_p2) target bundleno = 1069 (0x42d), region = 28 }
   0xb   : > { %p183_p3 = scmp.lt.s32.totalorder %s4157_s16, 1  ;;  %p4166_p4 = scmp.ne.s32.totalorder %s4157_s16, 0 }
   0xd   : > { %s184_s17 = scalar_select %p183_p3, %s4157_s16, 1 }
   0xe   : > { %197 = sbr.rel (%p4166_p4) target bundleno = 25 (0x19), region = 32 }
   0xf   : > { %s4211_s18 = sshll.u32 %s184_s17, 4  ;;  %s4212_s19 = sshll.u32 %s184_s17, 7 }
  0x10   : > { %s187_s22 = scalar_lea.vmem %s7736_s0, %s4211_s18  ;;  %s4430_s25 = scalar_lea.vmem %s7738_s2, %s4212_s19 }
  0x13   : > { %vm198_vm0 = vcmask 588800   ;;  %v4363_v0 = vmov 0.0   ;;  %vm201_vm1 = vcmask 582656  }
  0x14   : > { %199 = vst.msk [vmem:[#allocation2] sm:$0xff] %vm198_vm0, %v4363_v0 }
  0x15   : > { %200 = vst.msk [vmem:[#allocation2 + $0x8] sm:$0xff] %vm198_vm0, %v4363_v0 }
  0x16   : > { %203 = vst [vmem:[%s7739_s3] sm:$0x1] %v4363_v0 }
  0x17   : > { %204 = vst [vmem:[%s7740_s4] sm:$0x1] %v4363_v0 }
  0x18   : > { %202 = vst.msk [vmem:[#allocation2 + $0x10] sm:$0x3] %vm201_vm1, %v4363_v0 }
  0x19 PF: > { %v205_v1 = vld [vmem:[%s187_s22] sm:$0xff]  ;;  %s4364_s30 = smov 4   ;;  %v206_v2 = vld [vmem:[%s187_s22 + $0x8] sm:$0xff]  ;;  %vm215_vm2 = vcmask 556064   ;;  %s4365_s5 = smov 116   ;;  %vm1573_vm3 = vcmask 1042432  }
  0x1a   : > { %209 = vrot.lane.b32.xlu0 %v205_v1, %s4364_s30  ;;  %s4366_s6 = smov 120   ;;  %s4367_s7 = smov 124   ;;  %vm1574_vm4 = vcmask 1046532   ;;  %vm770_vm6 = vsmask.f32 3328  ;;  %vm435_vm9 = vcmask 1047556  }
  0x1b   : > { %s4368_s8 = smov 112   ;;  %s4369_s9 = smov 104   ;;  %vm4557_vm5 = vmor %vm1573_vm3, %vm1574_vm4  ;;  %vm771_vm7 = vsmask.f32 7440  ;;  %v4382_v54 = vmov 1983009808  }
  0x1c   : > { %s4370_s10 = smov 100   ;;  %s4371_s11 = smov 108   ;;  %vm4584_vm8 = vmor %vm770_vm6, %vm771_vm7  ;;  %v438_v55 = vunpack.c.l.s4 %v4382_v54  ;;  %vm2495_vm10 = vcmask 1046528   ;;  %vm2270_vm11 = vsmask.f32 7424  ;;  %vm3504_vm12 = vcmask 31744  }
  0x1d   : > { %s4372_s12 = smov 92   ;;  %s4373_s13 = smov 88   ;;  %vm3537_vm13 = vcmask 64512   ;;  %vm3821_vm14 = vcmask 1041408   ;;  %vm3570_vm15 = vcmask 97280   ;;  %vm3603_vm0 = vcmask 130048  }
  0x1e   : > { %s4374_s14 = smov 96   ;;  %s4375_s16 = smov 80   ;;  %vm3636_vm1 = vcmask 162816   ;;  %vm3702_vm3 = vcmask 228352   ;;  %vm3735_vm4 = vcmask 261120  }
  0x1f   : > { %s4376_s17 = smov 76   ;;  %s4377_s18 = smov 84  }
  0x20   : > { %s4378_s19 = smov 68   ;;  %s4379_s20 = smov 64  }
  0x21   : > { %s4380_s21 = smov 72   ;;  %s4381_s22 = smov 60  }
  0x22   : > { %211 = vrot.lane.b32.xlu0 %v206_v2, %s4364_s30  ;;  %s4384_s23 = smov 8   ;;  %s4385_s24 = smov 24  }
  0x23   : > { %s4386_s26 = smov 32   ;;  %s4387_s27 = smov 12  }
  0x24   : > { %s4388_s28 = smov 28   ;;  %s4389_s29 = smov 20  }
  0x8c   : > { %v210_v3 = vpop.permute.xlu0 %209 }
  0x8d   : > { %216 = vst.msk [vmem:[#allocation2 + $0x1] sm:$0xff] %vm215_vm2, %v210_v3 }
  0x94   : > { %v218_v4 = vld [vmem:[#allocation2] sm:$0xff]  ;;  %v212_v5 = vpop.permute.xlu0 %211 }
  0x95   : > { %v4440_v6 = vpack.c.bf16 %v218_v4, %v218_v4  ;;  %217 = vst.msk [vmem:[#allocation2 + $0x9] sm:$0xff] %vm215_vm2, %v212_v5  ;;  %vm3669_vm2 = vcmask 195584  }
  0x97   : > { %234 = vrot.lane.b32.xlu0 %v4440_v6, %s4365_s5  ;;  %230 = vrot.lane.b32.xlu2 %v4440_v6, %s4366_s6  ;;  %v298_v16 = vshrl.u32 %v4440_v6, 16  ;;  %v775_v17 = vshll.u32 %v4440_v6, 16  ;;  %v4167_v34 = vrot.slane %v4440_v6, 9 }
  0x98   : > { %226 = vrot.lane.b32.xlu1 %v4440_v6, %s4367_s7 }
  0x99   : > { %v774_v23 = vrot.slane %v298_v16, 4  ;;  %v777_v24 = vrot.slane %v775_v17, 5 }
  0x9b   : > { %v778_v38 = vor.u32 %v777_v24, %v774_v23 }
  0x9c   : > { %v219_v7 = vld [vmem:[#allocation2 + $0x8] sm:$0xff]  ;;  %v220_v9 = vld [vmem:[#allocation2 + $0x10] sm:$0x3] }
  0x9d   : > { %v4448_v8 = vpack.c.bf16 %v219_v7, %v219_v7  ;;  %v4504_v10 = vpack.c.bf16 %v220_v9, %v220_v9  ;;  %v779_v52 = vrot.slane %v778_v38, 4 }
  0x9f   : > { %240 = vrot.lane.b32.xlu0 %v4448_v8, %s4368_s8  ;;  %232 = vrot.lane.b32.xlu2 %v4448_v8, %s4366_s6  ;;  %v368_v14 = vshrl.u32 %v4448_v8, 16  ;;  %v780_v15 = vshll.u32 %v4448_v8, 16  ;;  %v1578_v22 = vrot.slane %v4448_v8, 5  ;;  %v789_v35 = vshll.u32 %v4504_v10, 16 }
  0xa0   : > { %228 = vrot.lane.b32.xlu1 %v4448_v8, %s4367_s7  ;;  %v1581_v43 = vrot.slane %v4504_v10, 5 }
  0xa1   : > { %v782_v18 = vrot.slane %v780_v15, 5  ;;  %v785_v19 = vrot.slane %v368_v14, 4  ;;  %v1580_v37 = vrot.slane %v1578_v22, 4  ;;  %v4572_v39 = vsel %vm4557_vm5, %v4167_v34, %v1578_v22 }
  0xa2   : > { %v791_v47 = vrot.slane %v789_v35, 5  ;;  %v1706_v60 = vshrl.u32 %v4572_v39, 16  ;;  %v4631_v15 = vunpack.c.0.s8 %v438_v55 }
  0xa3   : > { %v786_v26 = vor.u32 %v785_v19, %v782_v18  ;;  %v4594_v50 = vsel %vm4557_vm5, %v1580_v37, %v1581_v43  ;;  %v4616_v63 = vsel %vm4584_vm8, %v779_v52, %v782_v18 }
  0xa4   : > { %7881 = vst [vmem:[#allocation7_spill] sm:$0xff] %v4616_v63 }
  0xa5   : > { %v787_v40 = vrot.slane %v786_v26, 4 }
  0xa7   : > { %246 = vrot.lane.b32.xlu0 %v4440_v6, %s4369_s9  ;;  %238 = vrot.lane.b32.xlu2 %v4440_v6, %s4368_s8  ;;  %v4601_v56 = vsel %vm4584_vm8, %v787_v40, %v791_v47 }
  0xa8   : > { %236 = vrot.lane.b32.xlu1 %v4448_v8, %s4365_s5  ;;  %7878 = vst [vmem:[#allocation4_spill] sm:$0xff] %v4601_v56 }
  0xaf   : > { %252 = vrot.lane.b32.xlu0 %v4448_v8, %s4370_s10  ;;  %244 = vrot.lane.b32.xlu2 %v4448_v8, %s4371_s11 }
  0xb0   : > { %242 = vrot.lane.b32.xlu1 %v4440_v6, %s4371_s11 }
  0xb7   : > { %258 = vrot.lane.b32.xlu0 %v4440_v6, %s4372_s12  ;;  %250 = vrot.lane.b32.xlu2 %v4440_v6, %s4370_s10 }
  0xb8   : > { %248 = vrot.lane.b32.xlu1 %v4448_v8, %s4369_s9 }
  0xbf   : > { %264 = vrot.lane.b32.xlu0 %v4448_v8, %s4373_s13  ;;  %256 = vrot.lane.b32.xlu2 %v4448_v8, %s4374_s14 }
  0xc0   : > { %254 = vrot.lane.b32.xlu1 %v4440_v6, %s4374_s14 }
  0xc7   : > { %270 = vrot.lane.b32.xlu0 %v4440_v6, %s4375_s16  ;;  %262 = vrot.lane.b32.xlu2 %v4440_v6, %s4373_s13 }
  0xc8   : > { %260 = vrot.lane.b32.xlu1 %v4448_v8, %s4372_s12 }
  0xcf   : > { %276 = vrot.lane.b32.xlu0 %v4448_v8, %s4376_s17  ;;  %268 = vrot.lane.b32.xlu2 %v4448_v8, %s4377_s18 }
  0xd0   : > { %266 = vrot.lane.b32.xlu1 %v4440_v6, %s4377_s18 }
  0xd7   : > { %282 = vrot.lane.b32.xlu0 %v4440_v6, %s4378_s19  ;;  %274 = vrot.lane.b32.xlu2 %v4440_v6, %s4376_s17 }
  0xd8   : > { %272 = vrot.lane.b32.xlu1 %v4448_v8, %s4375_s16 }
  0xdf   : > { %288 = vrot.lane.b32.xlu0 %v4448_v8, %s4379_s20  ;;  %280 = vrot.lane.b32.xlu2 %v4448_v8, %s4380_s21 }
  0xe0   : > { %278 = vrot.lane.b32.xlu1 %v4440_v6, %s4380_s21 }
  0xe7   : > { %736 = vrot.lane.b32.xlu0 %v4504_v10, %s4367_s7  ;;  %286 = vrot.lane.b32.xlu2 %v4440_v6, %s4379_s20 }
  0xe8   : > { %284 = vrot.lane.b32.xlu1 %v4448_v8, %s4378_s19 }
  0xef   : > { %742 = vrot.lane.b32.xlu0 %v4504_v10, %s4368_s8  ;;  %292 = vrot.lane.b32.xlu2 %v4448_v8, %s4381_s22 }
  0xf0   : > { %290 = vrot.lane.b32.xlu1 %v4440_v6, %s4381_s22 }
  0xf1   : > { %v4518_v11 = vpop.permute.xlu2 %230 }
  0xf2   : > { %v306_v20 = vshrl.u32 %v4518_v11, 16  ;;  %v815_v21 = vshll.u32 %v4518_v11, 16  ;;  %v4169_v51 = vrot.slane %v4518_v11, 9 }
  0xf4   : > { %v814_v27 = vrot.slane %v306_v20, 4  ;;  %v817_v28 = vrot.slane %v815_v21, 5 }
  0xf6   : > { %v818_v41 = vor.u32 %v817_v28, %v814_v27 }
  0xf7   : > { %748 = vrot.lane.b32.xlu0 %v4504_v10, %s4370_s10  ;;  %740 = vrot.lane.b32.xlu2 %v4504_v10, %s4365_s5  ;;  %s4390_s5 = smov 16  }
  0xf8   : > { %738 = vrot.lane.b32.xlu1 %v4504_v10, %s4366_s6  ;;  %v819_v57 = vrot.slane %v818_v41, 4 }
  0xf9   : > { %v4526_v12 = vpop.permute.xlu2 %232 }
  0xfa   : > { %v820_v36 = vshll.u32 %v4526_v12, 16  ;;  %v7742_v42 = vshrl.u32 %v4526_v12, 16  ;;  %v1592_v44 = vrot.slane %v4526_v12, 5 }
  0xfc   : > { %v4588_v49 = vrot.slane %v820_v36, 5  ;;  %v4605_v58 = vrot.slane %v7742_v42, 4  ;;  %v4612_v61 = vsel %vm4557_vm5, %v4169_v51, %v1592_v44  ;;  %v4627_v5 = vrot.slane %v1592_v44, 4 }
  0xfd   : > { %7880 = vst [vmem:[#allocation6_spill] sm:$0xff] %v4612_v61 }
  0xfe   : > { %7877 = vst [vmem:[#allocation3_spill] sm:$0xff] %v4588_v49  ;;  %v4622_v1 = vsel %vm4584_vm8, %v819_v57, %v4588_v49 }
  0xff   : > { %754 = vrot.lane.b32.xlu0 %v4504_v10, %s4373_s13  ;;  %746 = vrot.lane.b32.xlu2 %v4504_v10, %s4369_s9  ;;  %7879 = vst [vmem:[#allocation5_spill] sm:$0xff] %v4605_v58  ;;  %v1145_v23 = vshrl.u32 %v4622_v1, 16 }
 0x100   : > { %744 = vrot.lane.b32.xlu1 %v4504_v10, %s4371_s11  ;;  %7882 = vst [vmem:[#allocation8_spill] sm:$0xff] %v4622_v1 }
 0x101   : > { %v4534_v13 = vpop.permute.xlu2 %238  ;;  %7883 = vst [vmem:[#allocation9_spill] sm:$0xff] %v4627_v5 }
 0x102   : > { %v7743_v31 = vshrl.u32 %v4534_v13, 16  ;;  %v855_v32 = vshll.u32 %v4534_v13, 16  ;;  %v4171_v26 = vrot.slane %v4534_v13, 9 }
 0x104   : > { %v854_v45 = vrot.slane %v7743_v31, 4  ;;  %v857_v46 = vrot.slane %v855_v32, 5 }
 0x106   : > { %v858_v62 = vor.u32 %v857_v46, %v854_v45 }
 0x107   : > { %760 = vrot.lane.b32.xlu0 %v4504_v10, %s4376_s17  ;;  %752 = vrot.lane.b32.xlu2 %v4504_v10, %s4372_s12 }
 0x108   : > { %750 = vrot.lane.b32.xlu1 %v4504_v10, %s4374_s14  ;;  %v4641_v24 = vrot.slane %v858_v62, 4 }
 0x109   : > { %v4553_v25 = vpop.permute.xlu2 %244  ;;  %v4565_v33 = vpop.permute.xlu0 %234 }
 0x10a   : > { %v4561_v30 = vpop.permute.xlu1 %226  ;;  %v307_v7 = vshrl.u32 %v4565_v33, 16  ;;  %v835_v9 = vshll.u32 %v4565_v33, 16  ;;  %v385_v21 = vshrl.u32 %v4553_v25, 16  ;;  %v880_v22 = vshll.u32 %v4553_v25, 16 }
 0x10b   : > { %v299_v2 = vshrl.u32 %v4561_v30, 16  ;;  %v795_v3 = vshll.u32 %v4561_v30, 16  ;;  %v7741_v27 = vrot.slane %v4553_v25, 5  ;;  %v4168_v51 = vrot.slane %v4561_v30, 9 }
 0x10c   : > { %v834_v36 = vrot.slane %v307_v7, 4  ;;  %v837_v37 = vrot.slane %v835_v9, 5  ;;  %v4656_v43 = vrot.slane %v880_v22, 5  ;;  %v4658_v44 = vrot.slane %v385_v21, 4 }
 0x10d   : > { %v794_v28 = vrot.slane %v299_v2, 4  ;;  %v797_v32 = vrot.slane %v795_v3, 5  ;;  %v4672_v62 = vrot.slane %v7741_v27, 4  ;;  %v4676_v22 = vpack.i.b16 %v299_v2, %v298_v16 }
 0x10e   : > { %7884 = vst [vmem:[#allocation10_spill] sm:$0xff] %v4656_v43  ;;  %v838_v4 = vor.u32 %v837_v37, %v834_v36  ;;  %v4170_v16 = vrot.slane %v4565_v33, 9 }
 0x10f   : > { %766 = vrot.lane.b32.xlu0 %v4504_v10, %s4379_s20  ;;  %758 = vrot.lane.b32.xlu2 %v4504_v10, %s4375_s16  ;;  %7885 = vst [vmem:[#allocation11_spill] sm:$0xff] %v4658_v44  ;;  %v798_v57 = vor.u32 %v797_v32, %v794_v28  ;;  %v4684_v28 = vpack.i.b16 %v307_v7, %v306_v20 }
 0x110   : > { %756 = vrot.lane.b32.xlu1 %v4504_v10, %s4377_s18  ;;  %7886 = vst [vmem:[#allocation12_spill] sm:$0xff] %v4672_v62 }
 0x111   : > { %v4597_v53 = vpop.permute.xlu2 %250  ;;  %v4633_v17 = vpop.permute.xlu0 %240  ;;  %v799_v37 = vrot.slane %v798_v57, 4 }
 0x112   : > { %v4607_v59 = vpop.permute.xlu1 %228  ;;  %v382_v34 = vpack.i.b16 %v4553_v25, %v4633_v17  ;;  %v384_v35 = vshrl.u32 %v4633_v17, 16  ;;  %v323_v38 = vshrl.u32 %v4597_v53, 16  ;;  %v915_v40 = vshll.u32 %v4597_v53, 16 }
 0x113   : > { %v800_v46 = vshll.u32 %v4607_v59, 16  ;;  %v369_v52 = vshrl.u32 %v4607_v59, 16  ;;  %v1585_v54 = vrot.slane %v4607_v59, 5  ;;  %v860_v47 = vshll.u32 %v4633_v17, 16 }
 0x114   : > { %v386_v3 = vpack.i.b16 %v385_v21, %v384_v35  ;;  %v585_v9 = vrot.slane %v382_v34, 4  ;;  %v914_v18 = vrot.slane %v323_v38, 4  ;;  %v917_v0 = vrot.slane %v915_v40, 5 }
 0x115   : > { %v366_v21 = vpack.i.b16 %v4607_v59, %v4448_v8  ;;  %v4688_v32 = vrot.slane %v800_v46, 5  ;;  %v4691_v2 = vrot.slane %v369_v52, 4  ;;  %v4695_v34 = vsel %vm4557_vm5, %v4168_v51, %v1585_v54 }
 0x116   : > { %v613_v7 = vrot.slane %v386_v3, 4  ;;  %v839_v59 = vrot.slane %v838_v4, 4  ;;  %v918_v46 = vor.u32 %v917_v0, %v914_v18  ;;  %v370_v51 = vpack.i.b16 %v369_v52, %v368_v14 }
 0x117   : > { %764 = vrot.lane.b32.xlu2 %v4504_v10, %s4378_s19  ;;  %v586_v20 = vsel %vm435_vm9, %v585_v9, %v366_v21  ;;  %v4712_v57 = vsel %vm4584_vm8, %v799_v37, %v4688_v32  ;;  %v4714_v3 = vrot.slane %v1585_v54, 4  ;;  %v1707_v9 = vshrl.u32 %v4695_v34, 16 }
 0x118   : > { %762 = vrot.lane.b32.xlu1 %v4504_v10, %s4380_s21  ;;  %7887 = vst [vmem:[#allocation13_spill] sm:$0xff] %v4712_v57  ;;  %v4722_v0 = vperm.slane %v586_v20, %v4631_v15  ;;  %v1606_v8 = vrot.slane %v4633_v17, 5  ;;  %v614_v4 = vsel %vm435_vm9, %v613_v7, %v370_v51  ;;  %v4739_v17 = vrot.slane %v860_v47, 5 }
 0x119   : > { %v4654_v41 = vpop.permute.xlu2 %256  ;;  %v4700_v19 = vpop.permute.xlu0 %246  ;;  %v4747_v51 = vpack.i.b16 %v1707_v9, %v1706_v60  ;;  %v4749_v18 = vrot.slane %v384_v35, 4  ;;  %v4757_v47 = vperm.slane %v614_v4, %v4631_v15 }
 0x11a   : > { %v4668_v55 = vpop.permute.xlu1 %236  ;;  %7888 = vst [vmem:[#allocation14_spill] sm:$0xff] %v4722_v0  ;;  %v322_v54 = vshrl.u32 %v4700_v19, 16  ;;  %v7744_v20 = vshrl.u32 %v4654_v41, 16  ;;  %v4763_v7 = vsel %vm4557_vm5, %v4171_v26, %v1606_v8  ;;  %v940_v60 = vshll.u32 %v4654_v41, 16 }
 0x11b   : > { %v840_v36 = vshll.u32 %v4668_v55, 16  ;;  %7890 = vst [vmem:[#allocation16_spill] sm:$0xff] %v4739_v17  ;;  %v1599_v35 = vrot.slane %v4668_v55, 5  ;;  %v320_v9 = vpack.i.b16 %v4597_v53, %v4700_v19  ;;  %v4776_v4 = vsel %vm4584_vm8, %v4641_v24, %v4739_v17 }
 0x11c   : > { %7891 = vst [vmem:[#allocation17_spill] sm:$0xff] %v4747_v51  ;;  %v4778_v26 = vrot.slane %v1606_v8, 4  ;;  %v895_v42 = vshll.u32 %v4700_v19, 16  ;;  %v4792_v8 = vrot.slane %v940_v60, 5  ;;  %v1153_v1 = vshrl.u32 %v4776_v4, 16 }
 0x11d   : > { %v4705_v27 = vrot.slane %v840_v36, 5  ;;  %v4735_v36 = vrot.slane %v918_v46, 4  ;;  %7892 = vst [vmem:[#allocation18_spill] sm:$0xff] %v4749_v18  ;;  %v441_v37 = vrot.slane %v320_v9, 4  ;;  %v894_v62 = vrot.slane %v322_v54, 4 }
 0x11e   : > { %7894 = vst [vmem:[#allocation20_spill] sm:$0xff] %v4757_v47 }
 0x11f   : > { %v4728_v14 = vsel %vm4584_vm8, %v839_v59, %v4705_v27  ;;  %7895 = vst [vmem:[#allocation21_spill] sm:$0xff] %v4776_v4 }
 0x120   : > { %768 = vrot.lane.b32.xlu1 %v4504_v10, %s4381_s22  ;;  %7889 = vst [vmem:[#allocation15_spill] sm:$0xff] %v4728_v14  ;;  %v1146_v52 = vshrl.u32 %v4728_v14, 16  ;;  %v4782_v10 = vrot.slane %v7744_v20, 4  ;;  %v4798_v14 = vsel %vm4557_vm5, %v4170_v16, %v1599_v35  ;;  %v897_v16 = vrot.slane %v895_v42, 5 }
 0x121   : > { %v4717_v21 = vpop.permute.xlu2 %262  ;;  %v4789_v45 = vpop.permute.xlu0 %252  ;;  %7897 = vst [vmem:[#allocation23_spill] sm:$0xff] %v4792_v8  ;;  %v1715_v18 = vshrl.u32 %v4798_v14, 16 }
 0x122   : > { %v4742_v59 = vpop.permute.xlu1 %242  ;;  %v4753_v46 = vpack.i.b16 %v1146_v52, %v1145_v23  ;;  %v324_v23 = vpack.i.b16 %v323_v38, %v322_v54  ;;  %7896 = vst [vmem:[#allocation22_spill] sm:$0xff] %v4782_v10  ;;  %v975_v51 = vshll.u32 %v4717_v21, 16  ;;  %v920_v63 = vshll.u32 %v4789_v45, 16 }
 0x123   : > { %v315_v52 = vshrl.u32 %v4742_v59, 16  ;;  %v875_v40 = vshll.u32 %v4742_v59, 16  ;;  %7898 = vst [vmem:[#allocation24_spill] sm:$0xff] %v4798_v14  ;;  %v312_v60 = vpack.i.b16 %v4742_v59, %v4534_v13  ;;  %v4172_v54 = vrot.slane %v4742_v59, 9 }
 0x124   : > { %7893 = vst [vmem:[#allocation19_spill] sm:$0xff] %v4753_v46  ;;  %v377_v46 = vshrl.u32 %v4668_v55, 16  ;;  %v469_v38 = vrot.slane %v324_v23, 4  ;;  %v7900_v9 = vshrl.u32 %v4717_v21, 16  ;;  %v898_v5 = vor.u32 %v897_v16, %v894_v62 }
 0x125   : > { %v874_v31 = vrot.slane %v315_v52, 4  ;;  %v877_v20 = vrot.slane %v875_v40, 5  ;;  %v434_v40 = vrot.slane %v312_v60, 4  ;;  %v7903_v59 = vrot.slane %v4654_v41, 5 }
 0x126   : > { %v4811_v23 = vrot.slane %v377_v46, 4  ;;  %v470_v42 = vsel %vm435_vm9, %v469_v38, %v4684_v28  ;;  %v974_v47 = vrot.slane %v7900_v9, 4  ;;  %v4844_v9 = vrot.slane %v1599_v35, 4 }
 0x127   : > { %v878_v24 = vor.u32 %v877_v20, %v874_v31  ;;  %v7899_v31 = vpack.i.b16 %v4565_v33, %v4518_v11  ;;  %v7902_v11 = vshrl.u32 %v4534_v13, 16  ;;  %v4838_v38 = vrot.slane %v7903_v59, 4 }
 0x128   : > { %v7909_v16 = vrot.slane %v4553_v25, 5  ;;  %v7911_v35 = vpack.i.b16 %v4561_v30, %v4440_v6  ;;  %v7912_v25 = vshrl.u32 %v4612_v61, 16  ;;  %v1627_v4 = vrot.slane %v4789_v45, 5 }
 0x129   : > { %v4800_v57 = vpop.permute.xlu2 %268  ;;  %v879_v44 = vrot.slane %v878_v24, 4  ;;  %v442_v20 = vsel %vm435_vm9, %v441_v37, %v7899_v31  ;;  %v977_v24 = vrot.slane %v975_v51, 5  ;;  %v316_v33 = vpack.i.b16 %v315_v52, %v7902_v11  ;;  %7904 = vst [vmem:[#allocation26_spill] sm:$0xff] %v4838_v38  ;;  %v4859_v11 = vpop.permute.xlu0 %258 }
 0x12a   : > { %v4814_v17 = vpop.permute.xlu1 %248  ;;  %v7905_v51 = vshrl.u32 %v4526_v12, 16  ;;  %v4851_v62 = vperm.slane %v442_v20, %v4631_v15  ;;  %v1614_v31 = vsel %vm4557_vm5, %v4172_v54, %v7909_v16  ;;  %v436_v59 = vsel %vm435_vm9, %v434_v40, %v7911_v35 }
 0x12b   : > { %v4829_v10 = vsel %vm4584_vm8, %v879_v44, %v4656_v43  ;;  %v4846_v44 = vrot.slane %v920_v63, 5  ;;  %v978_v63 = vor.u32 %v977_v24, %v974_v47  ;;  %v900_v20 = vshll.u32 %v4814_v17, 16 }
 0x12c   : > { %7901 = vst [vmem:[#allocation25_spill] sm:$0xff] %v4829_v10  ;;  %v1154_v28 = vshrl.u32 %v4829_v10, 16  ;;  %v4842_v60 = vpack.i.b16 %v377_v46, %v7905_v51  ;;  %v4862_v46 = vperm.slane %v470_v42, %v4631_v15  ;;  %v899_v54 = vrot.slane %v898_v5, 4 }
 0x12d   : > { %7906 = vst [vmem:[#allocation27_spill] sm:$0xff] %v4846_v44  ;;  %v463_v51 = vrot.slane %v316_v33, 4  ;;  %v1720_v47 = vpack.i.b16 %v1614_v31, %v4763_v7  ;;  %v4882_v6 = vsel %vm4584_vm8, %v4735_v36, %v4846_v44  ;;  %v392_v30 = vshrl.u32 %v4814_v17, 16 }
 0x12e   : > { %7907 = vst [vmem:[#allocation28_spill] sm:$0xff] %v4851_v62  ;;  %v4853_v52 = vpack.i.b16 %v1154_v28, %v1153_v1  ;;  %v4873_v28 = vpack.i.b16 %v1715_v18, %v7912_v25  ;;  %v4885_v40 = vrot.slane %v900_v20, 5  ;;  %v4173_v42 = vrot.slane %v4700_v19, 9 }
 0x12f   : > { %7910 = vst [vmem:[#allocation30_spill] sm:$0xff] %v4862_v46  ;;  %v4890_v5 = vperm.slane %v436_v59, %v4631_v15  ;;  %v393_v24 = vshrl.u32 %v4789_v45, 16  ;;  %v447_v33 = vrot.slane %v4851_v62, 4  ;;  %v4895_v25 = vrot.slane %v978_v63, 4 }
 0x130   : > { %7908 = vst [vmem:[#allocation29_spill] sm:$0xff] %v4853_v52  ;;  %v4900_v36 = vsel %vm4584_vm8, %v899_v54, %v4885_v40  ;;  %v1162_v19 = vshrl.u32 %v4882_v6, 16  ;;  %v390_v59 = vpack.i.b16 %v4789_v45, %v4814_v17  ;;  %v464_v63 = vsel %vm435_vm9, %v463_v51, %v4676_v22 }
 0x131   : > { %7913 = vst [vmem:[#allocation31_spill] sm:$0xff] %v4873_v28  ;;  %v4875_v16 = vpop.permute.xlu2 %274  ;;  %v1161_v13 = vshrl.u32 %v4900_v36, 16  ;;  %v1723_v35 = vshrl.u32 %v1614_v31, 16  ;;  %v1842_v1 = vrot.slane %v1720_v47, 4  ;;  %v394_v18 = vpack.i.b16 %v393_v24, %v392_v30 }
 0x132   : > { %7914 = vst [vmem:[#allocation32_spill] sm:$0xff] %v4882_v6  ;;  %v4902_v20 = vpop.permute.xlu1 %254  ;;  %v4914_v54 = vsel %vm435_vm9, %v447_v33, %v4890_v5  ;;  %v4916_v52 = vrot.slane %v393_v24, 4  ;;  %v1000_v6 = vshll.u32 %v4800_v57, 16  ;;  %v1620_v22 = vrot.slane %v4814_v17, 5  ;;  %v4930_v33 = vpop.permute.xlu0 %264 }
 0x133   : > { %7915 = vst [vmem:[#allocation33_spill] sm:$0xff] %v4890_v5  ;;  %v4919_v10 = vpack.i.b16 %v1162_v19, %v1161_v13  ;;  %v4926_v31 = vperm.slane %v464_v63, %v4631_v15  ;;  %v591_v51 = vrot.slane %v390_v59, 4  ;;  %v955_v24 = vshll.u32 %v4859_v11, 16 }
 0x134   : > { %7916 = vst [vmem:[#allocation34_spill] sm:$0xff] %v4900_v36  ;;  %v7921_v45 = vshrl.u32 %v4763_v7, 16  ;;  %v7923_v19 = vpack.i.b16 %v4695_v34, %v4572_v39  ;;  %v619_v17 = vrot.slane %v394_v18, 4  ;;  %v330_v63 = vshrl.u32 %v4902_v20, 16 }
 0x135   : > { %7917 = vst [vmem:[#allocation35_spill] sm:$0xff] %v4914_v54  ;;  %v7925_v47 = vrot.slane %v4597_v53, 9  ;;  %v4953_v39 = vrot.slane %v1000_v6, 5  ;;  %v7927_v34 = vshrl.u32 %v4800_v57, 16  ;;  %v1621_v18 = vsel %vm4557_vm5, %v4173_v42, %v1620_v22 }
 0x136   : > { %7918 = vst [vmem:[#allocation36_spill] sm:$0xff] %v4916_v52  ;;  %v4934_v13 = vpack.i.b16 %v1723_v35, %v7921_v45  ;;  %v4940_v37 = vsel %vm435_vm9, %v1842_v1, %v7923_v19  ;;  %v935_v35 = vshll.u32 %v4902_v20, 16  ;;  %v934_v19 = vrot.slane %v330_v63, 4 }
 0x137   : > { %7919 = vst [vmem:[#allocation37_spill] sm:$0xff] %v4919_v10  ;;  %v1628_v36 = vsel %vm4557_vm5, %v7925_v47, %v1627_v4  ;;  %v4957_v1 = vrot.slane %v7927_v34, 4  ;;  %v7929_v53 = vpack.i.b16 %v4668_v55, %v4526_v12  ;;  %v7930_v59 = vshrl.u32 %v4859_v11, 16 }
 0x138   : > { %7920 = vst [vmem:[#allocation38_spill] sm:$0xff] %v4926_v31  ;;  %v957_v10 = vrot.slane %v955_v24, 5  ;;  %v937_v28 = vrot.slane %v935_v35, 5  ;;  %v620_v34 = vsel %vm435_vm9, %v619_v17, %v4842_v60  ;;  %v1035_v42 = vshll.u32 %v4875_v16, 16 }
 0x139   : > { %7922 = vst [vmem:[#allocation39_spill] sm:$0xff] %v4934_v13  ;;  %v4951_v45 = vpop.permute.xlu2 %280  ;;  %v592_v47 = vsel %vm435_vm9, %v591_v51, %v7929_v53  ;;  %v954_v7 = vrot.slane %v7930_v59, 4  ;;  %v4975_v55 = vrot.slane %v392_v30, 4  ;;  %v1730_v51 = vshrl.u32 %v1621_v18, 16 }
 0x13a   : > { %7924 = vst [vmem:[#allocation40_spill] sm:$0xff] %v4940_v37  ;;  %v4972_v14 = vpop.permute.xlu1 %260  ;;  %v938_v53 = vor.u32 %v937_v28, %v934_v19  ;;  %v4977_v59 = vrot.slane %v1627_v4, 4  ;;  %v1731_v24 = vshrl.u32 %v1628_v36, 16  ;;  %v7932_v35 = vrot.slane %v4800_v57, 5 }
 0x13b   : > { %7926 = vst [vmem:[#allocation41_spill] sm:$0xff] %v4953_v39  ;;  %v4984_v60 = vperm.slane %v592_v47, %v4631_v15  ;;  %v4989_v61 = vperm.slane %v620_v34, %v4631_v15  ;;  %v1728_v30 = vpack.i.b16 %v1628_v36, %v1621_v18  ;;  %v958_v12 = vor.u32 %v957_v10, %v954_v7  ;;  %v5001_v34 = vpop.permute.xlu0 %270 }
 0x13c   : > { %7928 = vst [vmem:[#allocation42_spill] sm:$0xff] %v4957_v1  ;;  %v4981_v6 = vrot.slane %v7932_v35, 4  ;;  %v7936_v4 = vshrl.u32 %v4875_v16, 16  ;;  %v1037_v13 = vrot.slane %v1035_v42, 5  ;;  %v939_v37 = vrot.slane %v938_v53, 4 }
 0x13d   : > { %7931 = vst [vmem:[#allocation43_spill] sm:$0xff] %v4977_v59  ;;  %v4996_v47 = vrot.slane %v1620_v22, 4  ;;  %v4175_v17 = vrot.slane %v4902_v20, 9  ;;  %v7938_v36 = vrot.slane %v4722_v0, 4  ;;  %v1648_v18 = vrot.slane %v4930_v33, 5 }
 0x13e   : > { %7933 = vst [vmem:[#allocation44_spill] sm:$0xff] %v4981_v6  ;;  %v1034_v19 = vrot.slane %v7936_v4, 4  ;;  %v4998_v6 = vpack.i.b16 %v1731_v24, %v1730_v51  ;;  %v960_v42 = vshll.u32 %v4972_v14, 16  ;;  %v5013_v51 = vrot.slane %v1728_v30, 4 }
 0x13f   : > { %7934 = vst [vmem:[#allocation45_spill] sm:$0xff] %v4984_v60  ;;  %v5008_v7 = vsel %vm435_vm9, %v4984_v60, %v7938_v36  ;;  %v959_v53 = vrot.slane %v958_v12, 4  ;;  %v980_v35 = vshll.u32 %v4930_v33, 16  ;;  %v5022_v36 = vsel %vm4584_vm8, %v939_v37, %v4792_v8 }
 0x140   : > { %7935 = vst [vmem:[#allocation46_spill] sm:$0xff] %v4989_v61  ;;  %v1038_v10 = vor.u32 %v1037_v13, %v1034_v19  ;;  %v5024_v28 = vrot.slane %v960_v42, 5  ;;  %v7942_v12 = vrot.slane %v4654_v41, 5  ;;  %v408_v13 = vshrl.u32 %v4930_v33, 16 }
 0x141   : > { %7937 = vst [vmem:[#allocation47_spill] sm:$0xff] %v4998_v6  ;;  %v5016_v4 = vpop.permute.xlu2 %286  ;;  %v7943_v19 = vshrl.u32 %v4859_v11, 16  ;;  %v7944_v37 = vrot.slane %v4717_v21, 9  ;;  %v7951_v1 = vshrl.u32 %v4951_v45, 16  ;;  %v7955_v61 = vshrl.u32 %v4875_v16, 16 }
 0x142   : > { %7939 = vst [vmem:[#allocation48_spill] sm:$0xff] %v5008_v7  ;;  %v5033_v22 = vsel %vm4557_vm5, %v4175_v17, %v7942_v12  ;;  %v5050_v30 = vsel %vm4584_vm8, %v959_v53, %v5024_v28  ;;  %v5052_v17 = vpop.permute.xlu1 %266  ;;  %v1060_v12 = vshll.u32 %v4951_v45, 16  ;;  %v7947_v53 = vshrl.u32 %v4800_v57, 16 }
 0x143   : > { %7940 = vst [vmem:[#allocation49_spill] sm:$0xff] %v5013_v51  ;;  %v5038_v24 = vpack.i.b16 %v7943_v19, %v330_v63  ;;  %v5044_v42 = vsel %vm4557_vm5, %v7944_v37, %v1648_v18  ;;  %v1169_v63 = vshrl.u32 %v5022_v36, 16  ;;  %v1170_v6 = vshrl.u32 %v5050_v30, 16 }
 0x144   : > { %7941 = vst [vmem:[#allocation50_spill] sm:$0xff] %v5024_v28  ;;  %v1039_v37 = vrot.slane %v1038_v10, 4  ;;  %v5062_v51 = vrot.slane %v980_v35, 5  ;;  %v5066_v38 = vpack.i.b16 %v7947_v53, %v408_v13  ;;  %v346_v7 = vshrl.u32 %v5001_v34, 16 }
 0x145   : > { %7945 = vst [vmem:[#allocation51_spill] sm:$0xff] %v5044_v42  ;;  %v5068_v8 = vpack.i.b16 %v1170_v6, %v1169_v63  ;;  %v1015_v19 = vshll.u32 %v5001_v34, 16  ;;  %v5072_v46 = vrot.slane %v408_v13, 4  ;;  %v5074_v10 = vrot.slane %v1648_v18, 4 }
 0x146   : > { %7946 = vst [vmem:[#allocation52_spill] sm:$0xff] %v5062_v51  ;;  %v5079_v35 = vrot.slane %v7951_v1, 4  ;;  %v5081_v31 = vrot.slane %v1060_v12, 5  ;;  %v401_v6 = vshrl.u32 %v4972_v14, 16  ;;  %v5092_v18 = vsel %vm4584_vm8, %v4895_v25, %v5062_v51 }
 0x147   : > { %7948 = vst [vmem:[#allocation53_spill] sm:$0xff] %v5068_v8  ;;  %v5086_v8 = vpop.permute.xlu0 %276  ;;  %v1641_v13 = vrot.slane %v4972_v14, 5  ;;  %v344_v1 = vpack.i.b16 %v4875_v16, %v5001_v34  ;;  %v995_v12 = vshll.u32 %v5052_v17, 16  ;;  %v348_v53 = vpack.i.b16 %v7955_v61, %v346_v7 }
 0x148   : > { %7949 = vst [vmem:[#allocation54_spill] sm:$0xff] %v5072_v46  ;;  %v1017_v63 = vrot.slane %v1015_v19, 5  ;;  %v7956_v62 = vshrl.u32 %v5052_v17, 16  ;;  %v1040_v44 = vshll.u32 %v5086_v8, 16  ;;  %v1177_v52 = vshrl.u32 %v5092_v18, 16 }
 0x149   : > { %7950 = vst [vmem:[#allocation55_spill] sm:$0xff] %v5074_v10  ;;  %v1014_v10 = vrot.slane %v346_v7, 4  ;;  %v5102_v43 = vpop.permute.xlu2 %292  ;;  %v997_v59 = vrot.slane %v995_v12, 5  ;;  %v7957_v7 = vrot.slane %v4951_v45, 5  ;;  %v7960_v25 = vrot.slane %v4859_v11, 9 }
 0x14a   : > { %7952 = vst [vmem:[#allocation56_spill] sm:$0xff] %v5079_v35  ;;  %v994_v5 = vrot.slane %v7956_v62, 4  ;;  %v7959_v62 = vshrl.u32 %v4654_v41, 16  ;;  %v491_v54 = vrot.slane %v344_v1, 4  ;;  %v7786_v46 = vshrl.u32 %v5102_v43, 16  ;;  %v5127_v0 = vpop.permute.xlu1 %272 }
 0x14b   : > { %7953 = vst [vmem:[#allocation57_spill] sm:$0xff] %v5081_v31  ;;  %v5114_v19 = vrot.slane %v7957_v7, 4  ;;  %v5124_v12 = vsel %vm4557_vm5, %v7960_v25, %v1641_v13  ;;  %v5129_v61 = vrot.slane %v401_v6, 4  ;;  %v5131_v7 = vrot.slane %v1641_v13, 4 }
 0x14c   : > { %7954 = vst [vmem:[#allocation58_spill] sm:$0xff] %v5092_v18  ;;  %v5118_v60 = vpack.i.b16 %v401_v6, %v7959_v62  ;;  %v998_v51 = vor.u32 %v997_v59, %v994_v5  ;;  %v1018_v35 = vor.u32 %v1017_v63, %v1014_v10  ;;  %v5133_v49 = vrot.slane %v1040_v44, 5 }
 0x14d   : > { %7958 = vst [vmem:[#allocation59_spill] sm:$0xff] %v5114_v19  ;;  %v519_v19 = vrot.slane %v348_v53, 4  ;;  %v1120_v58 = vshll.u32 %v5102_v43, 16  ;;  %v5138_v25 = vrot.slane %v7786_v46, 4  ;;  %v1095_v6 = vshll.u32 %v5016_v4, 16 }
 0x14e   : > { %7961 = vst [vmem:[#allocation60_spill] sm:$0xff] %v5129_v61  ;;  %v999_v62 = vrot.slane %v998_v51, 4  ;;  %v1020_v13 = vshll.u32 %v5127_v0, 16  ;;  %v1739_v10 = vshrl.u32 %v5124_v12, 16  ;;  %v7963_v44 = vpack.i.b16 %v4859_v11, %v4902_v20 }
 0x14f   : > { %7962 = vst [vmem:[#allocation61_spill] sm:$0xff] %v5133_v49  ;;  %v5155_v63 = vrot.slane %v1120_v58, 5  ;;  %v520_v1 = vsel %vm435_vm9, %v519_v19, %v5038_v24  ;;  %v1019_v46 = vrot.slane %v1018_v35, 4  ;;  %v1043_v11 = vsel %vm4584_vm8, %v1039_v37, %v5133_v49 }
 0x150   : > { %v492_v51 = vsel %vm435_vm9, %v491_v54, %v7963_v44  ;;  %v5153_v53 = vsel %vm4584_vm8, %v999_v62, %v4953_v39  ;;  %v5168_v58 = vrot.slane %v1020_v13, 5  ;;  %v7965_v35 = vshrl.u32 %v5016_v4, 16 }
 0x151   : > { %7964 = vst [vmem:[#allocation62_spill] sm:$0xff] %v5153_v53  ;;  %v1178_v59 = vshrl.u32 %v5153_v53, 16  ;;  %v1097_v62 = vrot.slane %v1095_v6, 5  ;;  %v5177_v5 = vperm.slane %v492_v51, %v4631_v15  ;;  %v4178_v37 = vrot.slane %v5052_v17, 9  ;;  %v5187_v6 = vpop.permute.xlu0 %282 }
 0x152   : > { %v1094_v19 = vrot.slane %v7965_v35, 4  ;;  %v417_v20 = vshrl.u32 %v5086_v8, 16  ;;  %v1023_v13 = vsel %vm4584_vm8, %v1019_v46, %v5168_v58  ;;  %v5185_v54 = vperm.slane %v520_v1, %v4631_v15 }
 0x153   : > { %v5174_v44 = vpack.i.b16 %v1178_v59, %v1177_v52  ;;  %v1186_v24 = vshrl.u32 %v1043_v11, 16  ;;  %v1183_v18 = vpack.i.b16 %v1043_v11, %v1023_v13  ;;  %v1185_v35 = vshrl.u32 %v1023_v13, 16  ;;  %v741_v13 = vpop.permute.xlu2 %740 }
 0x154   : > { %v7967_v52 = vshrl.u32 %v5033_v22, 16  ;;  %v4179_v51 = vrot.slane %v5001_v34, 9  ;;  %v7969_v53 = vshrl.u32 %v5127_v0, 16  ;;  %v1098_v39 = vor.u32 %v1097_v62, %v1094_v19  ;;  %v5211_v19 = vpop.permute.xlu1 %278 }
 0x155   : > { %7966 = vst [vmem:[#allocation63_spill] sm:$0xff] %v5174_v44  ;;  %v414_v44 = vpack.i.b16 %v5086_v8, %v5127_v0  ;;  %v5199_v28 = vpack.i.b16 %v1186_v24, %v1185_v35  ;;  %v1329_v11 = vrot.slane %v1183_v18, 4  ;;  %v7971_v34 = vrot.slane %v4800_v57, 5 }
 0x156   : > { %v5191_v59 = vpack.i.b16 %v1739_v10, %v7967_v52  ;;  %v418_v46 = vpack.i.b16 %v417_v20, %v7969_v53  ;;  %v1662_v53 = vrot.slane %v5127_v0, 5  ;;  %v5214_v62 = vrot.slane %v417_v20, 4 }
 0x157   : > { %7970 = vst [vmem:[#allocation65_spill] sm:$0xff] %v5199_v28  ;;  %v5208_v52 = vsel %vm4557_vm5, %v4178_v37, %v7971_v34  ;;  %v1669_v18 = vrot.slane %v5086_v8, 5  ;;  %v7974_v35 = vpack.i.b16 %v5050_v30, %v5022_v36  ;;  %v7976_v61 = vshrl.u32 %v4717_v21, 16 }
 0x158   : > { %7968 = vst [vmem:[#allocation64_spill] sm:$0xff] %v5191_v59  ;;  %v7977_v37 = vshrl.u32 %v5052_v17, 16  ;;  %v641_v10 = vrot.slane %v414_v44, 4  ;;  %v669_v28 = vrot.slane %v418_v46, 4  ;;  %v1602_v59 = vrot.slane %v741_v13, 5 }
 0x159   : > { %7972 = vst [vmem:[#allocation66_spill] sm:$0xff] %v5208_v52  ;;  %v5221_v1 = vsel %vm435_vm9, %v1329_v11, %v7974_v35  ;;  %v5227_v56 = vrot.slane %v1098_v39, 4  ;;  %v1747_v20 = vshrl.u32 %v5208_v52, 16  ;;  %v354_v8 = vshrl.u32 %v5211_v19, 16  ;;  %v5262_v35 = vpop.permute.xlu0 %288 }
 0x15a   : > { %7973 = vst [vmem:[#allocation67_spill] sm:$0xff] %v5214_v62  ;;  %v340_v34 = vpack.i.b16 %v7977_v37, %v7976_v61  ;;  %v1055_v24 = vshll.u32 %v5211_v19, 16  ;;  %v1663_v36 = vsel %vm4557_vm5, %v4179_v51, %v1662_v53  ;;  %v355_v30 = vshrl.u32 %v5187_v6, 16 }
 0x15b   : > { %7975 = vst [vmem:[#allocation68_spill] sm:$0xff] %v5221_v1  ;;  %v1075_v11 = vshll.u32 %v5187_v6, 16  ;;  %v5239_v61 = vsel %vm4557_vm5, %v4844_v9, %v1602_v59  ;;  %v7978_v46 = vrot.slane %v4875_v16, 9  ;;  %v7979_v37 = vpack.i.b16 %v4972_v14, %v4654_v41 }
 0x15c   : > { %v670_v9 = vsel %vm435_vm9, %v669_v28, %v5118_v60  ;;  %v1054_v59 = vrot.slane %v354_v8, 4  ;;  %v1057_v39 = vrot.slane %v1055_v24, 5  ;;  %v7980_v52 = vshrl.u32 %v5044_v42, 16  ;;  %v747_v24 = vpop.permute.xlu2 %746 }
 0x15d   : > { %v1670_v51 = vsel %vm4557_vm5, %v7978_v46, %v1669_v18  ;;  %v642_v1 = vsel %vm435_vm9, %v641_v10, %v7979_v37  ;;  %v849_v49 = vshll.u32 %v741_v13, 16  ;;  %v352_v46 = vpack.i.b16 %v5187_v6, %v5211_v19 }
 0x15e   : > { %v5258_v44 = vpack.i.b16 %v1747_v20, %v7980_v52  ;;  %v1752_v16 = vpack.i.b16 %v1670_v51, %v1663_v36  ;;  %v1074_v62 = vrot.slane %v355_v30, 4  ;;  %v1077_v41 = vrot.slane %v1075_v11, 5 }
 0x15f   : > { %v356_v14 = vpack.i.b16 %v355_v30, %v354_v8  ;;  %v1058_v10 = vor.u32 %v1057_v39, %v1054_v59  ;;  %v5264_v37 = vrot.slane %v1669_v18, 4  ;;  %v5267_v60 = vperm.slane %v642_v1, %v4631_v15 }
 0x160   : > { %7981 = vst [vmem:[#allocation69_spill] sm:$0xff] %v5258_v44  ;;  %v5270_v28 = vperm.slane %v670_v9, %v4631_v15  ;;  %v7983_v52 = vshrl.u32 %v5127_v0, 16  ;;  %v1755_v20 = vshrl.u32 %v1670_v51, 16  ;;  %v7984_v44 = vrot.slane %v5102_v43, 5  ;;  %v5287_v51 = vpop.permute.xlu1 %284 }
 0x161   : > { %7982 = vst [vmem:[#allocation70_spill] sm:$0xff] %v5264_v37  ;;  %v5280_v8 = vrot.slane %v1662_v53, 4  ;;  %v1754_v18 = vshrl.u32 %v1663_v36, 16  ;;  %v7986_v1 = vor.u32 %v5138_v25, %v5155_v63  ;;  %v1898_v11 = vrot.slane %v1752_v16, 4 }
 0x162   : > { %v5274_v13 = vrot.slane %v7983_v52, 4  ;;  %v5278_v42 = vrot.slane %v7984_v44, 4  ;;  %v851_v39 = vrot.slane %v849_v49, 5  ;;  %v497_v9 = vrot.slane %v352_v46, 4 }
 0x163   : > { %v5285_v30 = vrot.slane %v7986_v1, 4  ;;  %v1078_v0 = vor.u32 %v1077_v41, %v1074_v62  ;;  %v525_v59 = vrot.slane %v356_v14, 4  ;;  %v1059_v52 = vrot.slane %v1058_v10, 4 }
 0x164   : > { %7985 = vst [vmem:[#allocation71_spill] sm:$0xff] %v5278_v42  ;;  %v1623_v37 = vrot.slane %v747_v24, 5  ;;  %v7988_v25 = vor.u32 %v4811_v23, %v4705_v27  ;;  %v5296_v16 = vpack.i.b16 %v1755_v20, %v1754_v18  ;;  %v4181_v49 = vrot.slane %v5211_v19, 9 }
 0x165   : > { %7987 = vst [vmem:[#allocation72_spill] sm:$0xff] %v5285_v30  ;;  %v430_v62 = vpack.i.b16 %v5102_v43, %v5262_v35  ;;  %v4182_v41 = vrot.slane %v5187_v6, 9  ;;  %v7990_v27 = vpack.i.b16 %v5052_v17, %v4717_v21  ;;  %v1080_v19 = vshll.u32 %v5287_v51, 16 }
 0x166   : > { %v847_v1 = vrot.slane %v7988_v25, 4  ;;  %7989 = vst [vmem:[#allocation73_spill] sm:$0xff] %v5296_v16  ;;  %v5304_v46 = vsel %vm4557_vm5, %v4996_v47, %v1623_v37  ;;  %v7991_v10 = vpack.i.b16 %v5124_v12, %v5033_v22  ;;  %v1079_v47 = vrot.slane %v1078_v0, 4  ;;  %v737_v22 = vpop.permute.xlu0 %736  ;;  %v5375_v12 = vpop.permute.xlu2 %752  ;;  %v8020_v16 = vld [vmem:[#allocation3_spill] sm:$0xff] }
 0x167   : > { %v498_v23 = vsel %vm435_vm9, %v497_v9, %v7990_v27  ;;  %v526_v6 = vsel %vm435_vm9, %v525_v59, %v340_v34  ;;  %v5326_v37 = vsel %vm4584_vm8, %v1059_v52, %v5081_v31  ;;  %v431_v17 = vshrl.u32 %v5262_v35, 16 }
 0x168   : > { %v5309_v14 = vsel %vm4584_vm8, %v847_v1, %v851_v39  ;;  %v5320_v20 = vsel %vm435_vm9, %v1898_v11, %v7991_v10  ;;  %7992 = vst [vmem:[#allocation74_spill] sm:$0xff] %v5326_v37  ;;  %v1100_v18 = vshll.u32 %v5262_v35, 16  ;;  %v5331_v39 = vrot.slane %v1080_v19, 5  ;;  %v5385_v44 = vpop.permute.xlu1 %290 }
 0x169   : > { %v5335_v11 = vperm.slane %v498_v23, %v4631_v15  ;;  %v7993_v34 = vrot.slane %v4951_v45, 5  ;;  %v5344_v0 = vperm.slane %v430_v62, %v4631_v15  ;;  %v5347_v59 = vperm.slane %v526_v6, %v4631_v15 }
 0x16a   : > { %v909_v52 = vshll.u32 %v747_v24, 16  ;;  %v1193_v25 = vshrl.u32 %v5326_v37, 16  ;;  %v5353_v1 = vsel %vm4584_vm8, %v1079_v47, %v5331_v39  ;;  %v422_v27 = vpack.i.b16 %v5287_v51, %v4951_v45 }
 0x16b   : > { %v5341_v9 = vsel %vm4557_vm5, %v4181_v49, %v7993_v34  ;;  %7994 = vst [vmem:[#allocation75_spill] sm:$0xff] %v5353_v1  ;;  %v425_v49 = vshrl.u32 %v5287_v51, 16  ;;  %v1194_v23 = vshrl.u32 %v5353_v1, 16  ;;  %v7995_v24 = vshrl.u32 %v5102_v43, 16 }
 0x16c   : > { %v5364_v6 = vrot.slane %v1100_v18, 5  ;;  %v5368_v53 = vrot.slane %v431_v17, 4  ;;  %v7998_v36 = vor.u32 %v4975_v55, %v4885_v40  ;;  %v8000_v19 = vrot.slane %v5177_v5, 4 }
 0x16d   : > { %v433_v10 = vpack.i.b16 %v7995_v24, %v431_v17  ;;  %v5373_v62 = vpack.i.b16 %v1194_v23, %v1193_v25  ;;  %v911_v17 = vrot.slane %v909_v52, 5  ;;  %v8001_v40 = vshrl.u32 %v4951_v45, 16 }
 0x16e   : > { %7996 = vst [vmem:[#allocation76_spill] sm:$0xff] %v5364_v6  ;;  %v907_v21 = vrot.slane %v7998_v36, 4  ;;  %v5381_v18 = vsel %vm435_vm9, %v5335_v11, %v8000_v19  ;;  %v647_v36 = vrot.slane %v422_v27, 4  ;;  %v1683_v25 = vrot.slane %v5287_v51, 5 }
 0x16f   : > { %7997 = vst [vmem:[#allocation77_spill] sm:$0xff] %v5368_v53  ;;  %v426_v55 = vpack.i.b16 %v425_v49, %v8001_v40  ;;  %v1588_v23 = vrot.slane %v737_v22, 5  ;;  %v5391_v47 = vperm.slane %v433_v10, %v4631_v15  ;;  %v5397_v19 = vsel %vm4584_vm8, %v5227_v56, %v5364_v6 }
 0x170   : > { %7999 = vst [vmem:[#allocation78_spill] sm:$0xff] %v5373_v62  ;;  %v8004_v52 = vrot.slane %v5262_v35, 5  ;;  %v1644_v45 = vrot.slane %v5375_v12, 5  ;;  %v809_v51 = vshll.u32 %v737_v22, 16  ;;  %v5421_v22 = vpop.permute.xlu0 %742  ;;  %v1684_v34 = vsel %vm4557_vm5, %v4182_v41, %v1683_v25 }
 0x171   : > { %8002 = vst [vmem:[#allocation79_spill] sm:$0xff] %v5391_v47  ;;  %v5409_v10 = vsel %vm4557_vm5, %v4714_v3, %v1588_v23  ;;  %v5425_v3 = vsel %vm4584_vm8, %v907_v21, %v911_v17  ;;  %v8006_v23 = vpack.i.b16 %v4800_v57, %v4930_v33  ;;  %v675_v56 = vrot.slane %v426_v55, 4 }
 0x172   : > { %8003 = vst [vmem:[#allocation80_spill] sm:$0xff] %v5397_v19  ;;  %v5401_v24 = vrot.slane %v8004_v52, 4  ;;  %v1777_v52 = vshrl.u32 %v5409_v10, 16  ;;  %v5419_v62 = vsel %vm4557_vm5, %v5131_v7, %v1644_v45  ;;  %v8007_v40 = vshrl.u32 %v4594_v50, 16 }
 0x173   : > { %v648_v27 = vsel %vm435_vm9, %v647_v36, %v8006_v23  ;;  %v8008_v7 = vshrl.u32 %v5385_v44, 16  ;;  %v1115_v1 = vshll.u32 %v5385_v44, 16  ;;  %v5440_v21 = vrot.slane %v425_v49, 4 }
 0x174   : > { %8005 = vst [vmem:[#allocation81_spill] sm:$0xff] %v5401_v24  ;;  %v5435_v37 = vpack.i.b16 %v1777_v52, %v8007_v40  ;;  %v8009_v57 = vor.u32 %v4691_v2, %v4688_v32  ;;  %v811_v17 = vrot.slane %v809_v51, 5  ;;  %v360_v55 = vpack.i.b16 %v5385_v44, %v5016_v4 }
 0x175   : > { %v1114_v45 = vrot.slane %v8008_v7, 4  ;;  %v652_v41 = vperm.slane %v648_v27, %v4631_v15  ;;  %v1760_v36 = vpack.i.b16 %v1684_v34, %v5341_v9  ;;  %v1117_v40 = vrot.slane %v1115_v1, 5 }
 0x176   : > { %v807_v33 = vrot.slane %v8009_v57, 4  ;;  %v4184_v52 = vrot.slane %v5385_v44, 9  ;;  %v5451_v7 = vrot.slane %v1683_v25, 4  ;;  %v1763_v49 = vshrl.u32 %v1684_v34, 16  ;;  %v739_v25 = vpop.permute.xlu1 %738  ;;  %v8017_v57 = vld [vmem:[#allocation50_spill] sm:$0xff] }
 0x177   : > { %v4383_v42 = vmov 1934713408   ;;  %v676_v32 = vsel %vm435_vm9, %v675_v56, %v5066_v38  ;;  %v1118_v2 = vor.u32 %v1117_v40, %v1114_v45  ;;  %v8010_v51 = vrot.slane %v5102_v43, 5 }
 0x178   : > { %v452_v30 = vunpack.c.l.s4 %v4383_v42  ;;  %v1609_v1 = vrot.slane %v5421_v22, 5  ;;  %v5466_v34 = vsel %vm4584_vm8, %v807_v33, %v811_v17  ;;  %v969_v42 = vshll.u32 %v5375_v12, 16 }
 0x179   : > { %v5459_v27 = vsel %vm4557_vm5, %v4184_v52, %v8010_v51  ;;  %v5470_v38 = vperm.slane %v360_v55, %v4631_v15  ;;  %v653_v43 = vrot.slane %v652_v41, 4  ;;  %v5472_v56 = vrot.slane %v1760_v36, 4 }
 0x17a   : > { %v1119_v45 = vrot.slane %v1118_v2, 4  ;;  %v5477_v40 = vsel %vm4557_vm5, %v4778_v26, %v1609_v1  ;;  %v8011_v52 = vrot.slane %v5267_v60, 4  ;;  %v5485_v12 = vperm.slane %v676_v32, %v4631_v15  ;;  %v8014_v2 = vld [vmem:[#allocation4_spill] sm:$0xff] }
 0x17b   : > { %v8012_v17 = vshrl.u32 %v5341_v9, 16  ;;  %v5491_v36 = vunpack.c.0.s8 %v452_v30  ;;  %v1208_v26 = vshrl.u32 %v5466_v34, 16  ;;  %v8016_v32 = vld [vmem:[#allocation60_spill] sm:$0xff]  ;;  %v869_v51 = vshll.u32 %v5421_v22, 16  ;;  %v8025_v22 = vld [vmem:[#allocation9_spill] sm:$0xff] }
 0x17c   : > { %v5482_v33 = vsel %vm435_vm9, %v652_v41, %v8011_v52  ;;  %v5499_v1 = vsel %vm4584_vm8, %v1119_v45, %v5155_v63  ;;  %v829_v41 = vshll.u32 %v739_v25, 16  ;;  %v749_v52 = vpop.permute.xlu0 %748  ;;  %v8018_v23 = vor.u32 %v8016_v32, %v8017_v57  ;;  %v8022_v57 = vld [vmem:[#allocation14_spill] sm:$0xff] }
 0x17d   : > { %v5489_v55 = vpack.i.b16 %v1763_v49, %v8012_v17  ;;  %8015 = vst [vmem:[#allocation4_spill] sm:$0xff] %v5499_v1  ;;  %v971_v49 = vrot.slane %v969_v42, 5  ;;  %v5506_v30 = vperm.slane %v5470_v38, %v5491_v36  ;;  %v1595_v6 = vrot.slane %v739_v25, 5 }
 0x17e   : > { %v967_v9 = vrot.slane %v8018_v23, 4  ;;  %v831_v24 = vrot.slane %v829_v41, 5  ;;  %v929_v53 = vshll.u32 %v749_v52, 16  ;;  %v1630_v31 = vrot.slane %v749_v52, 5  ;;  %v8023_v23 = vld [vmem:[#allocation45_spill] sm:$0xff] }
 0x17f   : > { %8013 = vst [vmem:[#allocation82_spill] sm:$0xff] %v5489_v55  ;;  %v8019_v55 = vld [vmem:[#allocation5_spill] sm:$0xff]  ;;  %v8024_v42 = vrot.slane %v8023_v23, 4  ;;  %v654_v47 = vsel %vm435_vm9, %v653_v43, %v5267_v60  ;;  %v8027_v60 = vld [vmem:[#allocation36_spill] sm:$0xff]  ;;  %v8028_v43 = vld [vmem:[#allocation27_spill] sm:$0xff] }
 0x180   : > { %v8021_v63 = vor.u32 %v8019_v55, %v8020_v16  ;;  %v1596_v16 = vsel %vm4557_vm5, %v8025_v22, %v1595_v6  ;;  %v5529_v25 = vperm.slane %v654_v47, %v5491_v36  ;;  %v8029_v23 = vor.u32 %v8027_v60, %v8028_v43 }
 0x181   : > { %v598_v32 = vsel %vm435_vm9, %v8024_v42, %v8022_v57  ;;  %v1784_v57 = vshrl.u32 %v1596_v16, 16  ;;  %v8030_v42 = vld [vmem:[#allocation43_spill] sm:$0xff]  ;;  %v8032_v47 = vshrl.u32 %v5309_v14, 16 }
 0x182   : > { %v827_v45 = vrot.slane %v8021_v63, 4  ;;  %v5526_v55 = vperm.slane %v598_v32, %v5491_v36  ;;  %8026 = vst [vmem:[#allocation60_spill] sm:$0xff] %v5529_v25  ;;  %v1782_v63 = vpack.i.b16 %v5239_v61, %v1596_v16  ;;  %v1631_v6 = vsel %vm4557_vm5, %v8030_v42, %v1630_v31 }
 0x183   : > { %v5541_v32 = vperm.slane %v5344_v0, %v5491_v36  ;;  %v1798_v16 = vpack.i.b16 %v1631_v6, %v5304_v46  ;;  %v1801_v19 = vshrl.u32 %v1631_v6, 16  ;;  %v2191_v31 = vunpack.c.l.b16 %v5529_v25  ;;  %v8036_v6 = vld [vmem:[#allocation35_spill] sm:$0xff] }
 0x184   : > { %v832_v17 = vsel %vm4584_vm8, %v827_v45, %v831_v24  ;;  %v927_v24 = vrot.slane %v8029_v23, 4  ;;  %v931_v45 = vrot.slane %v929_v53, 5  ;;  %v2190_v60 = vunpack.c.l.b16 %v5526_v55 }
 0x185   : > { %v1213_v41 = vpack.i.b16 %v5309_v14, %v832_v17  ;;  %v1215_v52 = vshrl.u32 %v832_v17, 16  ;;  %8031 = vst [vmem:[#allocation50_spill] sm:$0xff] %v5541_v32  ;;  %v8033_v17 = vshrl.u32 %v5239_v61, 16  ;;  %v2246_v43 = vunpack.c.l.b16 %v5541_v32 }
 0x186   : > { %v932_v53 = vsel %vm4584_vm8, %v927_v24, %v931_v45  ;;  %v8034_v14 = vshrl.u32 %v5304_v46, 16  ;;  %v1998_v61 = vrot.slane %v1798_v16, 4  ;;  %v5562_v24 = vperm.slane %v8036_v6, %v5491_v36 }
 0x187   : > { %v1217_v22 = vpack.i.b16 %v8032_v47, %v1215_v52  ;;  %v1786_v1 = vpack.i.b16 %v8033_v17, %v1784_v57  ;;  %v1229_v23 = vpack.i.b16 %v932_v53, %v5425_v3  ;;  %v1232_v42 = vshrl.u32 %v932_v53, 16 }
 0x188   : > { %v1802_v52 = vpack.i.b16 %v1801_v19, %v8034_v14  ;;  %v5556_v57 = vpack.c.b16 %v2191_v31, %v2190_v60  ;;  %v5558_v47 = vpack.c.b16 %v2246_v43, %v2246_v43  ;;  %v8037_v45 = vrot.slane %v5335_v11, 4 }
 0x189   : > { %v8038_v32 = vshrl.u32 %v5425_v3, 16  ;;  %v1429_v25 = vrot.slane %v1229_v23, 4  ;;  %v5571_v46 = vsel %vm435_vm9, %v1998_v61, %v1782_v63  ;;  %v5575_v16 = vsel %vm4584_vm8, %v967_v9, %v971_v49  ;;  %v745_v61 = vpop.permute.xlu1 %744 }
 0x18a   : > { %8035 = vst [vmem:[#allocation5_spill] sm:$0xff] %v5556_v57  ;;  %v504_v17 = vsel %vm435_vm9, %v8037_v45, %v5177_v5  ;;  %v2026_v19 = vrot.slane %v1802_v52, 4  ;;  %v2520_v60 = vrot.slane %v5556_v57, 1  ;;  %v2521_v31 = vrot.slane %v5558_v47, 1  ;;  %v759_v5 = vpop.permute.xlu2 %758  ;;  %v8047_v45 = vld [vmem:[#allocation16_spill] sm:$0xff] }
 0x18b   : > { %v1233_v53 = vpack.i.b16 %v1232_v42, %v8038_v32  ;;  %8039 = vst [vmem:[#allocation3_spill] sm:$0xff] %v5571_v46  ;;  %v5580_v11 = vperm.slane %v504_v17, %v5491_v36  ;;  %v5583_v3 = vsel %vm435_vm9, %v1429_v25, %v1213_v41  ;;  %v8042_v43 = vshrl.u32 %v8014_v2, 16 }
 0x18c   : > { %8040 = vst [vmem:[#allocation14_spill] sm:$0xff] %v5583_v3  ;;  %v5586_v63 = vsel %vm435_vm9, %v2026_v19, %v1786_v1  ;;  %v8043_v49 = vshrl.u32 %v5016_v4, 16  ;;  %v8044_v23 = vshrl.u32 %v5385_v44, 16  ;;  %v871_v14 = vrot.slane %v869_v51, 5  ;;  %v8046_v51 = vld [vmem:[#allocation18_spill] sm:$0xff] }
 0x18d   : > { %v1457_v32 = vrot.slane %v1233_v53, 4  ;;  %8041 = vst [vmem:[#allocation45_spill] sm:$0xff] %v5586_v63  ;;  %v5590_v9 = vpack.i.b16 %v1208_v26, %v8042_v43  ;;  %v2522_v52 = vsel %vm2495_vm10, %v2520_v60, %v2521_v31  ;;  %v2174_v1 = vunpack.c.l.b16 %v5562_v24 }
 0x18e   : > { %v363_v42 = vpack.i.b16 %v8044_v23, %v8043_v49  ;;  %2560 = vrot.lane.b32.xlu2 %v2522_v52, %s4384_s23  ;;  %v2175_v26 = vunpack.c.l.b16 %v5580_v11  ;;  %v2238_v41 = vunpack.c.l.b16 %v5506_v30  ;;  %v8048_v17 = vor.u32 %v8046_v51, %v8047_v45  ;;  %v8050_v45 = vld [vmem:[#allocation11_spill] sm:$0xff] }
 0x18f   : > { %v5598_v25 = vsel %vm435_vm9, %v1457_v32, %v1217_v22  ;;  %v1029_v19 = vshll.u32 %v759_v5, 16  ;;  %v552_v22 = vrot.slane %v5470_v38, 4  ;;  %v889_v32 = vshll.u32 %v745_v61, 16 }
 0x190   : > { %8045 = vst [vmem:[#allocation9_spill] sm:$0xff] %v5598_v25  ;;  %v867_v53 = vrot.slane %v8048_v17, 4  ;;  %v5610_v60 = vpack.c.b16 %v2175_v26, %v2174_v1  ;;  %v5612_v31 = vpack.c.b16 %v2238_v41, %v2238_v41  ;;  %v5615_v43 = vperm.slane %v363_v42, %v4631_v15  ;;  %v8051_v17 = vld [vmem:[#allocation10_spill] sm:$0xff] }
 0x191   : > { %v1665_v23 = vrot.slane %v759_v5, 5  ;;  %v1616_v52 = vrot.slane %v745_v61, 5  ;;  %v8052_v38 = vor.u32 %v8050_v45, %v8051_v17  ;;  %v891_v26 = vrot.slane %v889_v32, 5 }
 0x192   : > { %8049 = vst [vmem:[#allocation36_spill] sm:$0xff] %v5610_v60  ;;  %v872_v49 = vsel %vm4584_vm8, %v867_v53, %v871_v14  ;;  %v2496_v44 = vrot.slane %v5610_v60, 1  ;;  %v2497_v51 = vrot.slane %v5612_v31, 1  ;;  %v8053_v41 = vrot.slane %v5262_v35, 5  ;;  %v8056_v53 = vld [vmem:[#allocation12_spill] sm:$0xff] }
 0x193   : > { %v887_v1 = vrot.slane %v8052_v38, 4  ;;  %v8054_v6 = vrot.slane %v5016_v4, 9  ;;  %v8055_v5 = vor.u32 %v5274_v13, %v5168_v58  ;;  %v1031_v61 = vrot.slane %v1029_v19, 5  ;;  %v5644_v19 = vpop.permute.xlu0 %754 }
 0x194   : > { %v1617_v25 = vsel %vm4557_vm5, %v8056_v53, %v1616_v52  ;;  %v1792_v45 = vshrl.u32 %v5477_v40, 16  ;;  %v2498_v32 = vsel %vm2495_vm10, %v2496_v44, %v2497_v51  ;;  %v5649_v52 = vsel %vm4557_vm5, %v5280_v8, %v1665_v23  ;;  %v8057_v44 = vld [vmem:[#allocation33_spill] sm:$0xff]  ;;  %v5664_v23 = vpop.permute.xlu2 %764 }
 0x195   : > { %v5630_v42 = vsel %vm4557_vm5, %v8054_v6, %v8053_v41  ;;  %v1027_v14 = vrot.slane %v8055_v5, 4  ;;  %v892_v4 = vsel %vm4584_vm8, %v887_v1, %v891_v26  ;;  %v1790_v35 = vpack.i.b16 %v1617_v25, %v5477_v40  ;;  %2544 = vrot.lane.b32.xlu0 %v2498_v32, %s4384_s23  ;;  %v8059_v41 = vld [vmem:[#allocation28_spill] sm:$0xff] }
 0x196   : > { %v1223_v6 = vshrl.u32 %v872_v49, 16  ;;  %v1221_v17 = vpack.i.b16 %v892_v4, %v872_v49  ;;  %v1224_v58 = vshrl.u32 %v892_v4, 16  ;;  %v1793_v13 = vshrl.u32 %v1617_v25, 16 }
 0x197   : > { %v1992_v38 = vrot.slane %v1790_v35, 4  ;;  %v8058_v51 = vrot.slane %v8057_v44, 4  ;;  %v5657_v40 = vperm.slane %v5381_v18, %v5491_v36  ;;  %v5661_v25 = vsel %vm4584_vm8, %v1027_v14, %v1031_v61  ;;  %v8066_v44 = vld [vmem:[#allocation54_spill] sm:$0xff] }
 0x198   : > { %v1225_v49 = vpack.i.b16 %v1224_v58, %v1223_v6  ;;  %v1423_v26 = vrot.slane %v1221_v17, 4  ;;  %v1794_v5 = vpack.i.b16 %v1793_v13, %v1792_v45  ;;  %v571_v8 = vrot.slane %v5615_v43, 4 }
 0x199   : > { %v450_v1 = vsel %vm435_vm9, %v8059_v41, %v8058_v51  ;;  %v8060_v53 = vpack.i.b16 %v5409_v10, %v4594_v50  ;;  %v989_v18 = vshll.u32 %v5644_v19, 16  ;;  %v8062_v61 = vpack.i.b16 %v5466_v34, %v8014_v2  ;;  %v8067_v51 = vld [vmem:[#allocation52_spill] sm:$0xff]  ;;  %v8080_v50 = vld [vmem:[#allocation22_spill] sm:$0xff] }
 0x19a   : > { %v5674_v4 = vperm.slane %v450_v1, %v5491_v36  ;;  %v1451_v35 = vrot.slane %v1225_v49, 4  ;;  %v2020_v6 = vrot.slane %v1794_v5, 4  ;;  %v553_v10 = vsel %vm435_vm9, 0, %v552_v22  ;;  %v8070_v5 = vld [vmem:[#allocation38_spill] sm:$0xff]  ;;  %v751_v49 = vpop.permute.xlu1 %750 }
 0x19b   : > { %v5670_v32 = vsel %vm435_vm9, %v1992_v38, %v8060_v53  ;;  %v5681_v45 = vsel %vm435_vm9, %v1423_v26, %v8062_v61  ;;  %v2183_v58 = vunpack.c.l.b16 %v5657_v40  ;;  %v5697_v2 = vperm.slane %v553_v10, %v5491_v36  ;;  %v761_v3 = vpop.permute.xlu0 %760 }
 0x19c   : > { %8061 = vst [vmem:[#allocation27_spill] sm:$0xff] %v5670_v32  ;;  %v2182_v17 = vunpack.c.l.b16 %v5674_v4  ;;  %v5690_v38 = vsel %vm435_vm9, %v1451_v35, %v5590_v9  ;;  %v5694_v34 = vsel %vm435_vm9, %v2020_v6, %v5435_v37  ;;  %v8068_v22 = vor.u32 %v8066_v44, %v8067_v51  ;;  %v8072_v37 = vld [vmem:[#allocation30_spill] sm:$0xff] }
 0x19d   : > { %8063 = vst [vmem:[#allocation43_spill] sm:$0xff] %v5681_v45  ;;  %v5704_v1 = vrot.slane %v989_v18, 5  ;;  %v2242_v9 = vunpack.c.l.b16 %v5697_v2  ;;  %v8071_v53 = vrot.slane %v8070_v5, 4  ;;  %v8073_v35 = vrot.slane %v5185_v54, 4 }
 0x19e   : > { %8064 = vst [vmem:[#allocation35_spill] sm:$0xff] %v5690_v38  ;;  %v5702_v41 = vrot.slane %v8068_v22, 4  ;;  %v5707_v26 = vpack.c.b16 %v2183_v58, %v2182_v17  ;;  %v572_v10 = vsel %vm435_vm9, 0, %v571_v8  ;;  %v8078_v22 = vld [vmem:[#allocation48_spill] sm:$0xff]  ;;  %v5737_v8 = vperm.slane %v5482_v33, %v5491_v36 }
 0x19f   : > { %8065 = vst [vmem:[#allocation18_spill] sm:$0xff] %v5694_v34  ;;  %v478_v61 = vsel %vm435_vm9, %v8072_v37, %v8071_v53  ;;  %v534_v6 = vsel %vm435_vm9, %v5347_v59, %v8073_v35  ;;  %v5727_v58 = vperm.slane %v572_v10, %v5491_v36  ;;  %v5729_v51 = vpack.c.b16 %v2242_v9, %v2242_v9 }
 0x1a0   : > { %8069 = vst [vmem:[#allocation16_spill] sm:$0xff] %v5707_v26  ;;  %v2508_v18 = vrot.slane %v5707_v26, 1  ;;  %v5721_v44 = vperm.slane %v478_v61, %v5491_v36  ;;  %v5724_v17 = vperm.slane %v534_v6, %v5491_v36  ;;  %v5733_v53 = vperm.slane %v8078_v22, %v5491_v36 }
 0x1a1   : > { %8076 = vst [vmem:[#allocation12_spill] sm:$0xff] %v5727_v58  ;;  %v8079_v35 = vrot.slane %v5344_v0, 4  ;;  %v2243_v9 = vunpack.c.l.b16 %v5727_v58  ;;  %v2509_v22 = vrot.slane %v5729_v51, 1  ;;  %v2199_v33 = vunpack.c.l.b16 %v5737_v8  ;;  %v8081_v0 = vld [vmem:[#allocation23_spill] sm:$0xff] }
 0x1a2   : > { %8074 = vst [vmem:[#allocation11_spill] sm:$0xff] %v5721_v44  ;;  %v2184_v6 = vunpack.c.l.b16 %v5721_v44  ;;  %v2185_v10 = vunpack.c.l.b16 %v5724_v17  ;;  %v2198_v14 = vunpack.c.l.b16 %v5733_v53  ;;  %v8082_v34 = vor.u32 %v8080_v50, %v8081_v0  ;;  %v8087_v44 = vld [vmem:[#allocation61_spill] sm:$0xff]  ;;  %v8089_v0 = vld [vmem:[#allocation26_spill] sm:$0xff] }
 0x1a3   : > { %8075 = vst [vmem:[#allocation10_spill] sm:$0xff] %v5724_v17  ;;  %v703_v61 = vsel %vm435_vm9, 0, %v8079_v35  ;;  %v5756_v63 = vpack.c.b16 %v2243_v9, %v2243_v9  ;;  %v949_v45 = vshll.u32 %v751_v49, 16  ;;  %v1637_v58 = vrot.slane %v751_v49, 5  ;;  %v8086_v17 = vld [vmem:[#allocation67_spill] sm:$0xff] }
 0x1a4   : > { %8077 = vst [vmem:[#allocation33_spill] sm:$0xff] %v5729_v51  ;;  %v5746_v13 = vperm.slane %v703_v61, %v5491_v36  ;;  %v947_v35 = vrot.slane %v8082_v34, 4  ;;  %v5754_v38 = vpack.c.b16 %v2185_v10, %v2184_v6  ;;  %v2510_v61 = vsel %vm2495_vm10, %v2508_v18, %v2509_v22 }
 0x1a5   : > { %8084 = vst [vmem:[#allocation54_spill] sm:$0xff] %v5756_v63  ;;  %v5760_v46 = vpack.c.b16 %v2199_v33, %v2198_v14  ;;  %v8088_v51 = vor.u32 %v8086_v17, %v8087_v44  ;;  %2552 = vrot.lane.b32.xlu1 %v2510_v61, %s4384_s23  ;;  %v2512_v34 = vrot.slane %v5756_v63, 1  ;;  %v951_v10 = vrot.slane %v949_v45, 5  ;;  %v8092_v63 = vld [vmem:[#allocation24_spill] sm:$0xff] }
 0x1a6   : > { %8083 = vst [vmem:[#allocation28_spill] sm:$0xff] %v5754_v38  ;;  %v2250_v32 = vunpack.c.l.b16 %v5746_v13  ;;  %v2511_v50 = vrot.slane %v5754_v38, 1  ;;  %v1638_v14 = vsel %vm4557_vm5, %v8089_v0, %v1637_v58  ;;  %v1049_v49 = vshll.u32 %v761_v3, 16  ;;  %v8090_v0 = vld [vmem:[#allocation70_spill] sm:$0xff]  ;;  %v8095_v38 = vld [vmem:[#allocation49_spill] sm:$0xff] }
 0x1a7   : > { %8085 = vst [vmem:[#allocation52_spill] sm:$0xff] %v5760_v46  ;;  %v1047_v26 = vrot.slane %v8088_v51, 4  ;;  %v2532_v9 = vrot.slane %v5760_v46, 1  ;;  %v1672_v18 = vrot.slane %v761_v3, 5  ;;  %v952_v51 = vsel %vm4584_vm8, %v947_v35, %v951_v10  ;;  %v8093_v35 = vld [vmem:[#allocation6_spill] sm:$0xff] }
 0x1a8   : > { %v5768_v6 = vpack.c.b16 %v2250_v32, %v2250_v32  ;;  %v2513_v44 = vsel %vm2495_vm10, %v2511_v50, %v2512_v34  ;;  %v1806_v22 = vpack.i.b16 %v5419_v62, %v1638_v14  ;;  %v1237_v32 = vpack.i.b16 %v5575_v16, %v952_v51  ;;  %v8091_v50 = vld [vmem:[#allocation40_spill] sm:$0xff] }
 0x1a9   : > { %2554 = vrot.lane.b32.xlu2 %v2513_v44, %s4384_s23  ;;  %v1239_v45 = vshrl.u32 %v952_v51, 16  ;;  %v1808_v33 = vshrl.u32 %v1638_v14, 16  ;;  %v1051_v61 = vrot.slane %v1049_v49, 5  ;;  %v1673_v3 = vsel %vm4557_vm5, %v8090_v0, %v1672_v18 }
 0x1aa   : > { %v2533_v17 = vrot.slane %v5768_v6, 1  ;;  %v1847_v34 = vperm.slane %v8091_v50, %v4631_v15  ;;  %v8094_v10 = vpack.i.b16 %v8092_v63, %v8093_v35  ;;  %v8096_v14 = vshrl.u32 %v5575_v16, 16 }
 0x1ab   : > { %v1052_v18 = vsel %vm4584_vm8, %v1047_v26, %v1051_v61  ;;  %v1822_v51 = vpack.i.b16 %v1673_v3, %v5649_v52  ;;  %v1825_v63 = vshrl.u32 %v1673_v3, 16  ;;  %v1903_v16 = vperm.slane %v5320_v20, %v4631_v15 }
 0x1ac   : > { %v2534_v58 = vsel %vm2495_vm10, %v2532_v9, %v2533_v17  ;;  %v1849_v44 = vsel %vm435_vm9, %v8095_v38, %v8094_v10  ;;  %v1241_v49 = vpack.i.b16 %v8096_v14, %v1239_v45  ;;  %v8097_v9 = vshrl.u32 %v5419_v62, 16  ;;  %v8098_v45 = vld [vmem:[#allocation66_spill] sm:$0xff] }
 0x1ad   : > { %2568 = vrot.lane.b32.xlu0 %v2534_v58, %s4384_s23  ;;  %v1253_v0 = vpack.i.b16 %v1052_v18, %v5661_v25  ;;  %v1256_v50 = vshrl.u32 %v1052_v18, 16  ;;  %v1853_v35 = vperm.slane %v1849_v44, %v4631_v15  ;;  %v2048_v38 = vrot.slane %v1822_v51, 4  ;;  %v8099_v58 = vld [vmem:[#allocation51_spill] sm:$0xff] }
 0x1ae   : > { %v1810_v17 = vpack.i.b16 %v8097_v9, %v1808_v33  ;;  %v1856_v10 = vrot.slane %v1847_v34, 4  ;;  %v8100_v62 = vpack.i.b16 %v8098_v45, %v8099_v58  ;;  %v8101_v26 = vshrl.u32 %v5661_v25, 16 }
 0x1af   : > { %v1479_v14 = vrot.slane %v1253_v0, 4  ;;  %v8102_v9 = vshrl.u32 %v5649_v52, 16  ;;  %v5815_v18 = vsel %vm435_vm9, %v2048_v38, %v1806_v22  ;;  %v1912_v51 = vrot.slane %v1903_v16, 4 }
 0x1b0   : > { %v1905_v33 = vsel %vm435_vm9, %v5472_v56, %v8100_v62  ;;  %v1257_v61 = vpack.i.b16 %v1256_v50, %v8101_v26  ;;  %8103 = vst [vmem:[#allocation38_spill] sm:$0xff] %v5815_v18  ;;  %v1857_v20 = vsel %vm435_vm9, %v1853_v35, %v1856_v10  ;;  %v459_v45 = vrot.slane %v5562_v24, 4  ;;  %v8112_v26 = vld [vmem:[#allocation55_spill] sm:$0xff] }
 0x1b1   : > { %v1826_v3 = vpack.i.b16 %v1825_v63, %v8102_v9  ;;  %v1909_v44 = vperm.slane %v1905_v33, %v4631_v15  ;;  %v5823_v56 = vsel %vm4584_vm8, %v5702_v41, %v5704_v1  ;;  %v5826_v25 = vsel %vm435_vm9, %v1479_v14, %v1237_v32 }
 0x1b2   : > { %8104 = vst [vmem:[#allocation30_spill] sm:$0xff] %v5826_v25  ;;  %v1507_v52 = vrot.slane %v1257_v61, 4  ;;  %v8105_v22 = vor.u32 %v5440_v21, %v5331_v39  ;;  %v5832_v63 = vperm.slane %v1857_v20, %v5491_v36  ;;  %v460_v38 = vsel %vm435_vm9, 0, %v459_v45  ;;  %v757_v39 = vpop.permute.xlu1 %756  ;;  %v8114_v45 = vld [vmem:[#allocation41_spill] sm:$0xff] }
 0x1b3   : > { %v2076_v0 = vrot.slane %v1826_v3, 4  ;;  %v1913_v24 = vsel %vm435_vm9, %v1909_v44, %v1912_v51  ;;  %v1686_v10 = vrot.slane %v5664_v23, 5  ;;  %v8110_v21 = vshll.u32 %v5664_v23, 16  ;;  %v8113_v51 = vld [vmem:[#allocation42_spill] sm:$0xff] }
 0x1b4   : > { %v1087_v50 = vrot.slane %v8105_v22, 4  ;;  %8106 = vst [vmem:[#allocation48_spill] sm:$0xff] %v5832_v63  ;;  %v5838_v41 = vsel %vm435_vm9, %v1507_v52, %v1241_v49  ;;  %v5844_v32 = vperm.slane %v1913_v24, %v5491_v36  ;;  %v1247_v62 = vshrl.u32 %v5823_v56, 16 }
 0x1b5   : > { %8107 = vst [vmem:[#allocation22_spill] sm:$0xff] %v5838_v41  ;;  %v5841_v1 = vsel %vm435_vm9, %v2076_v0, %v1810_v17  ;;  %v1091_v58 = vrot.slane %v8110_v21, 5  ;;  %v8111_v33 = vrot.slane %v5644_v19, 5  ;;  %v3080_v49 = vunpack.c.l.b16 %v5832_v63  ;;  %v8131_v41 = vld [vmem:[#allocation56_spill] sm:$0xff] }
 0x1b6   : > { %8108 = vst [vmem:[#allocation23_spill] sm:$0xff] %v5841_v1  ;;  %v3081_v17 = vunpack.c.l.b16 %v5844_v32  ;;  %v515_v14 = vrot.slane %v5580_v11, 4  ;;  %v562_v9 = vrot.slane %v5506_v30, 4  ;;  %v2178_v3 = vunpack.c.l.b16 %v460_v38 }
 0x1b7   : > { %8109 = vst [vmem:[#allocation67_spill] sm:$0xff] %v5844_v32  ;;  %v5854_v61 = vsel %vm4557_vm5, %v8112_v26, %v8111_v33  ;;  %v1854_v23 = vrot.slane %v1853_v35, 4  ;;  %v1910_v20 = vrot.slane %v1909_v44, 4  ;;  %v8115_v52 = vor.u32 %v8113_v51, %v8114_v45 }
 0x1b8   : > { %v1009_v0 = vshll.u32 %v757_v39, 16  ;;  %v5863_v22 = vpack.c.b16 %v3081_v17, %v3080_v49  ;;  %v516_v24 = vsel %vm435_vm9, 0, %v515_v14  ;;  %v563_v21 = vsel %vm435_vm9, 0, %v562_v9  ;;  %v8118_v49 = vld [vmem:[#allocation44_spill] sm:$0xff] }
 0x1b9   : > { %v1007_v19 = vrot.slane %v8115_v52, 4  ;;  %v1658_v33 = vrot.slane %v757_v39, 5  ;;  %v2179_v26 = vunpack.c.l.b16 %v516_v24  ;;  %v2240_v63 = vunpack.c.l.b16 %v563_v21 }
 0x1ba   : > { %v1855_v11 = vsel %vm435_vm9, %v1854_v23, %v1847_v34  ;;  %v1911_v30 = vsel %vm435_vm9, %v1910_v20, %v1903_v16  ;;  %3128 = vrot.lane.b32.xlu1 %v5863_v22, %s4385_s24  ;;  %v1011_v38 = vrot.slane %v1009_v0, 5  ;;  %v1816_v9 = vshrl.u32 %v5854_v61, 16 }
 0x1bb   : > { %v5872_v35 = vperm.slane %v1855_v11, %v5491_v36  ;;  %v5875_v44 = vperm.slane %v1911_v30, %v5491_v36  ;;  %v5880_v39 = vsel %vm4557_vm5, %v8118_v49, %v1658_v33  ;;  %v5882_v17 = vpack.c.b16 %v2179_v26, %v2178_v3 }
 0x1bc   : > { %v5884_v34 = vpack.c.b16 %v2240_v63, %v2240_v63  ;;  %v1817_v14 = vshrl.u32 %v5880_v39, 16  ;;  %v5894_v51 = vsel %vm4584_vm8, %v1007_v19, %v1011_v38  ;;  %v5903_v0 = vsel %vm4584_vm8, %v1087_v50, %v1091_v58 }
 0x1bd   : > { %8116 = vst [vmem:[#allocation61_spill] sm:$0xff] %v5872_v35  ;;  %v3072_v23 = vunpack.c.l.b16 %v5872_v35  ;;  %v3073_v20 = vunpack.c.l.b16 %v5875_v44  ;;  %v2502_v3 = vrot.slane %v5882_v17, 1  ;;  %v1248_v52 = vshrl.u32 %v5894_v51, 16  ;;  %v8132_v35 = vld [vmem:[#allocation57_spill] sm:$0xff] }
 0x1be   : > { %8117 = vst [vmem:[#allocation26_spill] sm:$0xff] %v5875_v44  ;;  %v2503_v63 = vrot.slane %v5884_v34, 1  ;;  %v5908_v24 = vsel %vm4557_vm5, %v5451_v7, %v1686_v10  ;;  %v5912_v21 = vpack.i.b16 %v1817_v14, %v1816_v9  ;;  %v8121_v11 = vrot.slane %v8072_v37, 4  ;;  %v8125_v10 = vld [vmem:[#allocation46_spill] sm:$0xff] }
 0x1bf   : > { %8119 = vst [vmem:[#allocation70_spill] sm:$0xff] %v5882_v17  ;;  %v5910_v19 = vpack.c.b16 %v3073_v20, %v3072_v23  ;;  %v5915_v26 = vpack.i.b16 %v1248_v52, %v1247_v62  ;;  %v8122_v50 = vrot.slane %v5347_v59, 4  ;;  %v681_v7 = vrot.slane %v5485_v12, 4  ;;  %v5931_v62 = vpop.permute.xlu0 %766 }
 0x1c0   : > { %8120 = vst [vmem:[#allocation40_spill] sm:$0xff] %v5884_v34  ;;  %v2504_v33 = vsel %vm2495_vm10, %v2502_v3, %v2503_v63  ;;  %v476_v30 = vsel %vm435_vm9, %v8121_v11, %v8070_v5  ;;  %v5942_v59 = vperm.slane %v5615_v43, %v5491_v36  ;;  %v611_v38 = vrot.slane %v5733_v53, 4 }
 0x1c1   : > { %v532_v58 = vsel %vm435_vm9, %v8122_v50, %v5185_v54  ;;  %2548 = vrot.lane.b32.xlu2 %v2504_v33, %s4384_s23  ;;  %3120 = vrot.lane.b32.xlu0 %v5910_v19, %s4385_s24  ;;  %v5934_v37 = vperm.slane %v476_v30, %v5491_v36  ;;  %v1833_v54 = vshrl.u32 %v5908_v24, 16  ;;  %v667_v49 = vrot.slane %v5737_v8, 4 }
 0x1c2   : > { %v5937_v5 = vperm.slane %v532_v58, %v5491_v36  ;;  %v1264_v14 = vshrl.u32 %v5903_v0, 16  ;;  %v714_v20 = vrot.slane %v5746_v13, 4  ;;  %v1109_v3 = vshll.u32 %v5931_v62, 16  ;;  %v8124_v58 = vld [vmem:[#allocation20_spill] sm:$0xff] }
 0x1c3   : > { %v2176_v9 = vunpack.c.l.b16 %v5934_v37  ;;  %v2239_v63 = vunpack.c.l.b16 %v5942_v59  ;;  %v612_v52 = vsel %vm435_vm9, 0, %v611_v38  ;;  %v668_v43 = vsel %vm435_vm9, 0, %v667_v49  ;;  %v763_v38 = vpop.permute.xlu1 %762 }
 0x1c4   : > { %v2177_v23 = vunpack.c.l.b16 %v5937_v5  ;;  %v715_v53 = vsel %vm435_vm9, 0, %v714_v20  ;;  %v2202_v8 = vunpack.c.l.b16 %v612_v52  ;;  %v2203_v11 = vunpack.c.l.b16 %v668_v43 }
 0x1c5   : > { %v5957_v30 = vpack.c.b16 %v2239_v63, %v2239_v63  ;;  %v2252_v50 = vunpack.c.l.b16 %v715_v53  ;;  %v8126_v13 = vrot.slane %v8125_v10, 4  ;;  %v682_v16 = vsel %vm435_vm9, %v681_v7, %v5270_v28  ;;  %v8129_v53 = vld [vmem:[#allocation79_spill] sm:$0xff] }
 0x1c6   : > { %v5954_v33 = vpack.c.b16 %v2177_v23, %v2176_v9  ;;  %v1693_v49 = vrot.slane %v5931_v62, 5  ;;  %v5966_v9 = vpack.c.b16 %v2203_v11, %v2202_v8  ;;  %v5972_v20 = vperm.slane %v682_v16, %v5491_v36 }
 0x1c7   : > { %v626_v45 = vsel %vm435_vm9, %v8126_v13, %v8124_v58  ;;  %v2500_v52 = vrot.slane %v5957_v30, 1  ;;  %v5976_v43 = vpack.c.b16 %v2252_v50, %v2252_v50  ;;  %v5980_v7 = vperm.slane %v8129_v53, %v5491_v36 }
 0x1c8   : > { %8123 = vst [vmem:[#allocation24_spill] sm:$0xff] %v5954_v33  ;;  %v5969_v23 = vperm.slane %v626_v45, %v5491_v36  ;;  %v2499_v63 = vrot.slane %v5954_v33, 1  ;;  %v2538_v62 = vrot.slane %v5966_v9, 1  ;;  %v2193_v45 = vunpack.c.l.b16 %v5972_v20 }
 0x1c9   : > { %8127 = vst [vmem:[#allocation6_spill] sm:$0xff] %v5966_v9  ;;  %v1069_v11 = vshll.u32 %v763_v38, 16  ;;  %v2539_v13 = vrot.slane %v5976_v43, 1  ;;  %v2247_v32 = vunpack.c.l.b16 %v5980_v7  ;;  %v1679_v1 = vrot.slane %v763_v38, 5 }
 0x1ca   : > { %8128 = vst [vmem:[#allocation49_spill] sm:$0xff] %v5976_v43  ;;  %v2192_v8 = vunpack.c.l.b16 %v5969_v23  ;;  %v2501_v16 = vsel %vm2495_vm10, %v2499_v63, %v2500_v52  ;;  %v8133_v44 = vor.u32 %v8131_v41, %v8132_v35  ;;  %v8134_v34 = vrot.slane %v8124_v58, 4  ;;  %v8135_v43 = vld [vmem:[#allocation59_spill] sm:$0xff] }
 0x1cb   : > { %2546 = vrot.lane.b32.xlu1 %v2501_v16, %s4384_s23  ;;  %v1071_v9 = vrot.slane %v1069_v11, 5  ;;  %v2540_v63 = vsel %vm2495_vm10, %v2538_v62, %v2539_v13  ;;  %v5999_v52 = vpack.c.b16 %v2247_v32, %v2247_v32  ;;  %v1680_v38 = vsel %vm4557_vm5, %v8135_v43, %v1679_v1  ;;  %v8137_v11 = vld [vmem:[#allocation77_spill] sm:$0xff] }
 0x1cc   : > { %v5989_v50 = vpack.c.b16 %v2193_v45, %v2192_v8  ;;  %v1067_v18 = vrot.slane %v8133_v44, 4  ;;  %v628_v25 = vsel %vm435_vm9, %v8125_v10, %v8134_v34  ;;  %v8136_v8 = vrot.slane %v5270_v28, 4  ;;  %2572 = vrot.lane.b32.xlu2 %v2540_v63, %s4384_s23 }
 0x1cd   : > { %v1830_v34 = vpack.i.b16 %v5908_v24, %v1680_v38  ;;  %v1832_v32 = vshrl.u32 %v1680_v38, 16  ;;  %v2524_v10 = vrot.slane %v5999_v52, 1  ;;  %v6016_v28 = vperm.slane %v628_v25, %v5491_v36 }
 0x1ce   : > { %8130 = vst [vmem:[#allocation66_spill] sm:$0xff] %v5989_v50  ;;  %v684_v41 = vsel %vm435_vm9, %v5485_v12, %v8136_v8  ;;  %v2523_v35 = vrot.slane %v5989_v50, 1  ;;  %v1072_v44 = vsel %vm4584_vm8, %v1067_v18, %v1071_v9  ;;  %v721_v45 = vrot.slane %v8129_v53, 4  ;;  %v8138_v18 = vld [vmem:[#allocation76_spill] sm:$0xff]  ;;  %v8141_v8 = vld [vmem:[#allocation81_spill] sm:$0xff] }
 0x1cf   : > { %v1261_v58 = vpack.i.b16 %v5903_v0, %v1072_v44  ;;  %v1263_v1 = vshrl.u32 %v1072_v44, 16  ;;  %v1834_v43 = vpack.i.b16 %v1833_v54, %v1832_v32  ;;  %v2054_v12 = vrot.slane %v1830_v34, 4 }
 0x1d0   : > { %v6019_v62 = vperm.slane %v684_v41, %v5491_v36  ;;  %v8139_v9 = vor.u32 %v8137_v11, %v8138_v18  ;;  %v2525_v16 = vsel %vm2495_vm10, %v2523_v35, %v2524_v10  ;;  %v1111_v0 = vrot.slane %v1109_v3, 5  ;;  %v8147_v10 = vld [vmem:[#allocation82_spill] sm:$0xff]  ;;  %v769_v18 = vpop.permute.xlu1 %768 }
 0x1d1   : > { %v1265_v13 = vpack.i.b16 %v1264_v14, %v1263_v1  ;;  %v1485_v63 = vrot.slane %v1261_v58, 4  ;;  %2562 = vrot.lane.b32.xlu0 %v2525_v16, %s4384_s23  ;;  %v8140_v25 = vpack.i.b16 %v5880_v39, %v5854_v61  ;;  %v2082_v38 = vrot.slane %v1834_v43, 4  ;;  %v8152_v16 = vld [vmem:[#allocation17_spill] sm:$0xff] }
 0x1d2   : > { %v1107_v24 = vrot.slane %v8139_v9, 4  ;;  %v722_v53 = vsel %vm435_vm9, 0, %v721_v45  ;;  %v6037_v41 = vsel %vm4557_vm5, %v8141_v8, %v1693_v49  ;;  %v8143_v14 = vpack.i.b16 %v5894_v51, %v5823_v56  ;;  %v8146_v51 = vld [vmem:[#allocation73_spill] sm:$0xff] }
 0x1d3   : > { %v6031_v54 = vsel %vm435_vm9, %v2054_v12, %v8140_v25  ;;  %8142 = vst [vmem:[#allocation51_spill] sm:$0xff] %v6037_v41  ;;  %v1513_v35 = vrot.slane %v1265_v13, 4  ;;  %v6046_v61 = vperm.slane %v722_v53, %v5491_v36  ;;  %v6050_v39 = vsel %vm435_vm9, %v2082_v38, %v5912_v21  ;;  %v8153_v13 = vld [vmem:[#allocation39_spill] sm:$0xff] }
 0x1d4   : > { %v6043_v3 = vsel %vm435_vm9, %v1485_v63, %v8143_v14  ;;  %8144 = vst [vmem:[#allocation55_spill] sm:$0xff] %v6050_v39  ;;  %v2200_v44 = vunpack.c.l.b16 %v6016_v28  ;;  %v2201_v34 = vunpack.c.l.b16 %v6019_v62  ;;  %v8145_v49 = vpack.i.b16 %v5459_v27, %v5630_v42 }
 0x1d5   : > { %v1926_v32 = vrot.slane %v8146_v51, 4  ;;  %v1932_v58 = vrot.slane %v8147_v10, 4  ;;  %v6064_v1 = vsel %vm435_vm9, %v1513_v35, %v5915_v26  ;;  %v2251_v21 = vunpack.c.l.b16 %v6046_v61  ;;  %v8161_v10 = vld [vmem:[#allocation69_spill] sm:$0xff] }
 0x1d6   : > { %v6058_v56 = vperm.slane %v8145_v49, %v4631_v15  ;;  %8148 = vst [vmem:[#allocation42_spill] sm:$0xff] %v6064_v1  ;;  %v6069_v43 = vsel %vm4584_vm8, %v1107_v24, %v1111_v0  ;;  %v1839_v12 = vshrl.u32 %v6037_v41, 16  ;;  %v6072_v45 = vpack.c.b16 %v2201_v34, %v2200_v44  ;;  %v8155_v24 = vld [vmem:[#allocation31_spill] sm:$0xff]  ;;  %v8160_v49 = vld [vmem:[#allocation64_spill] sm:$0xff] }
 0x1d7   : > { %8149 = vst [vmem:[#allocation41_spill] sm:$0xff] %v6069_v43  ;;  %v6078_v9 = vpack.c.b16 %v2251_v21, %v2251_v21  ;;  %v3424_v26 = vrot.slane %v5910_v19, 1  ;;  %v8154_v63 = vrot.slane %v8153_v13, 4  ;;  %v8156_v0 = vld [vmem:[#allocation47_spill] sm:$0xff]  ;;  %v1927_v51 = vsel %vm435_vm9, %v1926_v32, %v8160_v49 }
 0x1d8   : > { %8150 = vst [vmem:[#allocation44_spill] sm:$0xff] %v6072_v45  ;;  %v6076_v11 = vperm.slane %v6058_v56, %v5491_v36  ;;  %v8157_v38 = vrot.slane %v8156_v0, 4  ;;  %v2535_v8 = vrot.slane %v6072_v45, 1  ;;  %v1933_v21 = vsel %vm435_vm9, %v1932_v58, %v8161_v10 }
 0x1d9   : > { %v1871_v25 = vsel %vm435_vm9, %v8154_v63, %v8152_v16  ;;  %v2536_v34 = vrot.slane %v6078_v9, 1  ;;  %v1129_v16 = vshll.u32 %v769_v18, 16  ;;  %v609_v32 = vrot.slane %v5526_v55, 4 }
 0x1da   : > { %8151 = vst [vmem:[#allocation20_spill] sm:$0xff] %v6076_v11  ;;  %v1877_v53 = vsel %vm435_vm9, %v8157_v38, %v8155_v24  ;;  %v3168_v14 = vunpack.c.l.b16 %v6076_v11  ;;  %v6092_v35 = vperm.slane %v1871_v25, %v4631_v15  ;;  %v6106_v24 = vperm.slane %v1927_v51, %v4631_v15  ;;  %v8164_v51 = vld [vmem:[#allocation60_spill] sm:$0xff] }
 0x1db   : > { %v6095_v44 = vperm.slane %v1877_v53, %v4631_v15  ;;  %v6109_v25 = vperm.slane %v1933_v21, %v4631_v15  ;;  %v2537_v0 = vsel %vm2495_vm10, %v2535_v8, %v2536_v34  ;;  %v1131_v38 = vrot.slane %v1129_v16, 5  ;;  %v8166_v8 = vld [vmem:[#allocation72_spill] sm:$0xff] }
 0x1dc   : > { %8158 = vst [vmem:[#allocation46_spill] sm:$0xff] %v6092_v35  ;;  %v6102_v13 = vpack.c.b16 %v3168_v14, %v3168_v14  ;;  %v1700_v53 = vrot.slane %v769_v18, 5  ;;  %2570 = vrot.lane.b32.xlu1 %v2537_v0, %s4384_s23  ;;  %v665_v10 = vrot.slane %v8164_v51, 4  ;;  %v1270_v21 = vshrl.u32 %v6069_v43, 16  ;;  %v8168_v18 = vld [vmem:[#allocation71_spill] sm:$0xff]  ;;  %v8180_v0 = vld [vmem:[#allocation29_spill] sm:$0xff] }
 0x1dd   : > { %8159 = vst [vmem:[#allocation79_spill] sm:$0xff] %v6095_v44  ;;  %v1882_v63 = vrot.slane %v6095_v44, 4  ;;  %v1938_v49 = vrot.slane %v6109_v25, 4  ;;  %v6126_v55 = vsel %vm4584_vm8, %v8166_v8, %v1131_v38  ;;  %v8173_v8 = vld [vmem:[#allocation50_spill] sm:$0xff]  ;;  %v8178_v44 = vld [vmem:[#allocation21_spill] sm:$0xff] }
 0x1de   : > { %8162 = vst [vmem:[#allocation56_spill] sm:$0xff] %v6106_v24  ;;  %v3425_v58 = vrot.slane %v6102_v13, 1  ;;  %v6131_v34 = vsel %vm4557_vm5, %v8168_v18, %v1700_v53  ;;  %v8171_v53 = vld [vmem:[#allocation7_spill] sm:$0xff]  ;;  %v666_v51 = vsel %vm435_vm9, 0, %v665_v10  ;;  %v712_v18 = vrot.slane %v8173_v8, 4  ;;  %v8177_v10 = vld [vmem:[#allocation25_spill] sm:$0xff] }
 0x1df   : > { %8163 = vst [vmem:[#allocation57_spill] sm:$0xff] %v6109_v25  ;;  %v1883_v14 = vsel %vm435_vm9, %v1882_v63, %v6092_v35  ;;  %v1939_v63 = vsel %vm435_vm9, %v1938_v49, %v6106_v24  ;;  %v1840_v38 = vshrl.u32 %v6131_v34, 16  ;;  %v8179_v8 = vpack.i.b16 %v8177_v10, %v8178_v44 }
 0x1e0   : > { %v6121_v39 = vperm.slane %v1883_v14, %v5491_v36  ;;  %8167 = vst [vmem:[#allocation77_spill] sm:$0xff] %v6126_v55  ;;  %v3426_v16 = vsel %vm2495_vm10, %v3424_v26, %v3425_v58  ;;  %v1271_v14 = vshrl.u32 %v6126_v55, 16  ;;  %v6141_v48 = vperm.slane %v1939_v63, %v5491_v36 }
 0x1e1   : > { %8169 = vst [vmem:[#allocation76_spill] sm:$0xff] %v6131_v34  ;;  %3472 = vrot.lane.b32.xlu2 %v3426_v16, %s4386_s26  ;;  %v610_v26 = vsel %vm435_vm9, 0, %v609_v32  ;;  %v1137_v58 = vshrl.u32 %v8171_v53, 16  ;;  %v8174_v16 = vld [vmem:[#allocation13_spill] sm:$0xff]  ;;  %v6156_v29 = vpack.i.b16 %v1840_v38, %v1839_v12  ;;  %v6166_v25 = vrot.slane %v8179_v8, 4  ;;  %v8181_v12 = vld [vmem:[#allocation32_spill] sm:$0xff] }
 0x1e2   : > { %8165 = vst [vmem:[#allocation59_spill] sm:$0xff] %v6121_v39  ;;  %v6148_v49 = vpack.i.b16 %v1271_v14, %v1270_v21  ;;  %v3074_v63 = vunpack.c.l.b16 %v6121_v39  ;;  %v3075_v1 = vunpack.c.l.b16 %v6141_v48  ;;  %v8176_v11 = vshrl.u32 %v8174_v16, 16  ;;  %v8182_v38 = vld [vmem:[#allocation34_spill] sm:$0xff] }
 0x1e3   : > { %8170 = vst [vmem:[#allocation81_spill] sm:$0xff] %v6141_v48  ;;  %v713_v21 = vsel %vm435_vm9, 0, %v712_v18  ;;  %v2194_v14 = vunpack.c.l.b16 %v610_v26  ;;  %v1959_v26 = vrot.slane %v6058_v56, 4  ;;  %vm3788_vm5 = vcmask 293888  }
 0x1e4   : > { %8172 = vst [vmem:[#allocation73_spill] sm:$0xff] %v6148_v49  ;;  %v6160_v32 = vpack.i.b16 %v8176_v11, %v1137_v58  ;;  %v2195_v49 = vunpack.c.l.b16 %v666_v51  ;;  %v6169_v39 = vpack.c.b16 %v3075_v1, %v3074_v63  ;;  %v2248_v48 = vunpack.c.l.b16 %v713_v21  ;;  %v8184_v11 = vld [vmem:[#allocation37_spill] sm:$0xff] }
 0x1e5   : > { %8175 = vst [vmem:[#allocation82_spill] sm:$0xff] %v6156_v29  ;;  %v8183_v29 = vpack.i.b16 %v8181_v12, %v8182_v38  ;;  %v8186_v51 = vld [vmem:[#allocation65_spill] sm:$0xff]  ;;  %v461_v1 = vrot.slane %v5674_v4, 4  ;;  %v517_v63 = vrot.slane %v5657_v40, 4  ;;  %v1769_v4 = vshrl.u32 %v5630_v42, 16 }
 0x1e6   : > { %v6177_v18 = vpack.c.b16 %v2195_v49, %v2194_v14  ;;  %3122 = vrot.lane.b32.xlu0 %v6169_v39, %s4385_s24  ;;  %v6183_v10 = vpack.c.b16 %v2248_v48, %v2248_v48  ;;  %v1960_v49 = vsel %vm435_vm9, 0, %v1959_v26  ;;  %v564_v14 = vrot.slane %v5697_v2, 4 }
 0x1e7   : > { %v6174_v24 = vrot.slane %v8183_v29, 4  ;;  %v1770_v29 = vshrl.u32 %v5459_v27, 16  ;;  %v6193_v8 = vperm.slane %v1960_v49, %v5491_v36  ;;  %v462_v48 = vsel %vm435_vm9, 0, %v461_v1 }
 0x1e8   : > { %8185 = vst [vmem:[#allocation17_spill] sm:$0xff] %v6177_v18  ;;  %v2526_v21 = vrot.slane %v6177_v18, 1  ;;  %v2527_v56 = vrot.slane %v6183_v10, 1  ;;  %v518_v12 = vsel %vm435_vm9, 0, %v517_v63  ;;  %v565_v40 = vsel %vm435_vm9, 0, %v564_v14 }
 0x1e9   : > { %8187 = vst [vmem:[#allocation39_spill] sm:$0xff] %v6193_v8  ;;  %v2186_v27 = vunpack.c.l.b16 %v462_v48  ;;  %v2187_v38 = vunpack.c.l.b16 %v518_v12  ;;  %v3172_v26 = vunpack.c.l.b16 %v6193_v8  ;;  %v2244_v2 = vunpack.c.l.b16 %v565_v40 }
 0x1ea   : > { %v2528_v44 = vsel %vm2495_vm10, %v2526_v21, %v2527_v56  ;;  %v2370_v58 = vshll.u32 %v5556_v57, 16  ;;  %v1771_v35 = vpack.i.b16 %v1770_v29, %v1769_v4  ;;  %v2368_v1 = vshrl.u32 %v5556_v57, 16 }
 0x1eb   : > { %2564 = vrot.lane.b32.xlu1 %v2528_v44, %s4384_s23  ;;  %v6203_v49 = vpack.c.b16 %v2187_v38, %v2186_v27  ;;  %v2274_v42 = vshll.u32 %v5610_v60, 16  ;;  %v6207_v63 = vpack.c.b16 %v3172_v26, %v3172_v26  ;;  %v6209_v14 = vpack.c.b16 %v2244_v2, %v2244_v2  ;;  %v8189_v26 = vld [vmem:[#allocation16_spill] sm:$0xff] }
 0x1ec   : > { %v2372_v48 = vrot.slane %v2370_v58, 1  ;;  %v2375_v21 = vshll.u32 %v5558_v47, 16  ;;  %v3436_v56 = vrot.slane %v5863_v22, 1  ;;  %v2279_v44 = vshll.u32 %v5612_v31, 16  ;;  %v8190_v58 = vld [vmem:[#allocation33_spill] sm:$0xff]  ;;  %v8191_v47 = vld [vmem:[#allocation11_spill] sm:$0xff] }
 0x1ed   : > { %8188 = vst [vmem:[#allocation31_spill] sm:$0xff] %v6203_v49  ;;  %v2514_v12 = vrot.slane %v6203_v49, 1  ;;  %v3437_v29 = vrot.slane %v6207_v63, 1  ;;  %v2515_v4 = vrot.slane %v6209_v14, 1  ;;  %v2276_v27 = vrot.slane %v2274_v42, 1  ;;  %v8192_v31 = vld [vmem:[#allocation10_spill] sm:$0xff] }
 0x1ee   : > { %v2373_v40 = vor.u32 %v2372_v48, %v2368_v1  ;;  %v2272_v38 = vshrl.u32 %v5610_v60, 16  ;;  %v2322_v2 = vshll.u32 %v8189_v26, 16  ;;  %v2327_v57 = vshll.u32 %v8190_v58, 16 }
 0x1ef   : > { %v489_v8 = vrot.slane %v8191_v47, 4  ;;  %v3438_v41 = vsel %vm2495_vm10, %v3436_v56, %v3437_v29  ;;  %v2516_v34 = vsel %vm2495_vm10, %v2514_v12, %v2515_v4  ;;  %v2377_v43 = vrot.slane %v2375_v21, 1  ;;  %v8193_v29 = vld [vmem:[#allocation12_spill] sm:$0xff] }
 0x1f0   : > { %v545_v55 = vrot.slane %v8192_v31, 4  ;;  %3480 = vrot.lane.b32.xlu2 %v3438_v41, %s4386_s26  ;;  %2556 = vrot.lane.b32.xlu0 %v2516_v34, %s4384_s23  ;;  %v2281_v1 = vrot.slane %v2279_v44, 1  ;;  %v2320_v42 = vshrl.u32 %v8189_v26, 16  ;;  %v2324_v48 = vrot.slane %v2322_v2, 1 }
 0x1f1   : > { %v490_v60 = vsel %vm435_vm9, 0, %v489_v8  ;;  %v2378_v58 = vsel %vm2270_vm11, %v2373_v40, %v2377_v43  ;;  %v2277_v47 = vor.u32 %v2276_v27, %v2272_v38  ;;  %v583_v12 = vrot.slane %v8193_v29, 4 }
 0x1f2   : > { %v546_v56 = vsel %vm435_vm9, 0, %v545_v55  ;;  %v2329_v21 = vrot.slane %v2327_v57, 1  ;;  %v2188_v4 = vunpack.c.l.b16 %v490_v60  ;;  %v2418_v34 = vshll.u32 %v5760_v46, 16 }
 0x1f3   : > { %2479 = vrot.lane.b32.xlu1 %v2378_v58, %s4364_s30  ;;  %v2189_v41 = vunpack.c.l.b16 %v546_v56  ;;  %v584_v44 = vsel %vm435_vm9, 0, %v583_v12  ;;  %v487_v2 = vrot.slane %v5934_v37, 4  ;;  %v543_v8 = vrot.slane %v5937_v5, 4 }
 0x1f4   : > { %v581_v43 = vrot.slane %v5942_v59, 4  ;;  %v2282_v40 = vsel %vm2270_vm11, %v2277_v47, %v2281_v1  ;;  %v2325_v55 = vor.u32 %v2324_v48, %v2320_v42  ;;  %v2245_v38 = vunpack.c.l.b16 %v584_v44 }
 0x1f5   : > { %v6238_v27 = vpack.c.b16 %v2189_v41, %v2188_v4  ;;  %v2416_v57 = vshrl.u32 %v5760_v46, 16  ;;  %v488_v60 = vsel %vm435_vm9, 0, %v487_v2  ;;  %v544_v31 = vsel %vm435_vm9, 0, %v543_v8 }
 0x1f6   : > { %v582_v58 = vsel %vm435_vm9, 0, %v581_v43  ;;  %v2330_v37 = vsel %vm2270_vm11, %v2325_v55, %v2329_v21  ;;  %v6245_v56 = vpack.c.b16 %v2245_v38, %v2245_v38  ;;  %v2420_v5 = vrot.slane %v2418_v34, 1 }
 0x1f7   : > { %8194 = vst [vmem:[#allocation47_spill] sm:$0xff] %v6238_v27  ;;  %v2423_v59 = vshll.u32 %v5768_v6, 16  ;;  %v2180_v1 = vunpack.c.l.b16 %v488_v60  ;;  %v2181_v42 = vunpack.c.l.b16 %v544_v31  ;;  %v2241_v48 = vunpack.c.l.b16 %v582_v58  ;;  %v8198_v58 = vld [vmem:[#allocation80_spill] sm:$0xff] }
 0x1f8   : > { %v6249_v47 = vperm.slane %v1771_v35, %v4631_v15  ;;  %2463 = vrot.lane.b32.xlu2 %v2282_v40, %s4364_s30  ;;  %2471 = vrot.lane.b32.xlu0 %v2330_v37, %s4364_s30  ;;  %v2517_v29 = vrot.slane %v6238_v27, 1  ;;  %v2518_v12 = vrot.slane %v6245_v56, 1  ;;  %v637_v21 = vrot.slane %v5969_v23, 4  ;;  %v8199_v37 = vld [vmem:[#allocation75_spill] sm:$0xff] }
 0x1f9   : > { %v693_v4 = vrot.slane %v5972_v20, 4  ;;  %v6257_v41 = vpack.c.b16 %v2181_v42, %v2180_v1  ;;  %v6259_v6 = vpack.c.b16 %v2241_v48, %v2241_v48  ;;  %v731_v34 = vrot.slane %v5980_v7, 4 }
 0x1fa   : > { %8195 = vst [vmem:[#allocation64_spill] sm:$0xff] %v6249_v47  ;;  %v6263_v35 = vperm.slane %v6249_v47, %v5491_v36  ;;  %v2519_v44 = vsel %vm2495_vm10, %v2517_v29, %v2518_v12  ;;  %v2421_v2 = vor.u32 %v2420_v5, %v2416_v57  ;;  %v638_v8 = vsel %vm435_vm9, 0, %v637_v21  ;;  %v8200_v5 = vld [vmem:[#allocation74_spill] sm:$0xff]  ;;  %v8202_v29 = vld [vmem:[#allocation3_spill] sm:$0xff] }
 0x1fb   : > { %8196 = vst [vmem:[#allocation69_spill] sm:$0xff] %v6257_v41  ;;  %v694_v43 = vsel %vm435_vm9, 0, %v693_v4  ;;  %2558 = vrot.lane.b32.xlu1 %v2519_v44, %s4384_s23  ;;  %v2425_v23 = vrot.slane %v2423_v59, 1  ;;  %v2506_v20 = vrot.slane %v6259_v6, 1  ;;  %v732_v55 = vsel %vm435_vm9, 0, %v731_v34 }
 0x1fc   : > { %8197 = vst [vmem:[#allocation60_spill] sm:$0xff] %v6263_v35  ;;  %v3169_v40 = vunpack.c.l.b16 %v6263_v35  ;;  %v2196_v38 = vunpack.c.l.b16 %v638_v8  ;;  %v2197_v60 = vunpack.c.l.b16 %v694_v43  ;;  %v2249_v31 = vunpack.c.l.b16 %v732_v55 }
 0x1fd   : > { %v2286_v7 = vshll.u32 %v5954_v33, 16  ;;  %v8201_v1 = vpack.i.b16 %v8199_v37, %v8200_v5  ;;  %v2505_v48 = vrot.slane %v6257_v41, 1  ;;  %v6283_v12 = vperm.slane %v8202_v29, %v4631_v15  ;;  %v8204_v37 = vld [vmem:[#allocation78_spill] sm:$0xff]  ;;  %v8205_v5 = vld [vmem:[#allocation4_spill] sm:$0xff] }
 0x1fe   : > { %v6279_v59 = vpack.c.b16 %v3169_v40, %v3169_v40  ;;  %v2426_v21 = vsel %vm2270_vm11, %v2421_v2, %v2425_v23  ;;  %v6286_v4 = vpack.c.b16 %v2197_v60, %v2196_v38  ;;  %v2291_v34 = vshll.u32 %v5957_v30, 16  ;;  %v8206_v23 = vld [vmem:[#allocation28_spill] sm:$0xff]  ;;  %v8207_v30 = vld [vmem:[#allocation14_spill] sm:$0xff] }
 0x1ff   : > { %v1335_v42 = vrot.slane %v8201_v1, 4  ;;  %v2507_v44 = vsel %vm2495_vm10, %v2505_v48, %v2506_v20  ;;  %v6291_v43 = vpack.c.b16 %v2249_v31, %v2249_v31  ;;  %v2288_v55 = vrot.slane %v2286_v7, 1  ;;  %v8208_v7 = vld [vmem:[#allocation54_spill] sm:$0xff] }
 0x200   : > { %8203 = vst [vmem:[#allocation72_spill] sm:$0xff] %v6286_v4  ;;  %v3428_v8 = vrot.slane %v6279_v59, 1  ;;  %2487 = vrot.lane.b32.xlu2 %v2426_v21, %s4364_s30  ;;  %2550 = vrot.lane.b32.xlu0 %v2507_v44, %s4384_s23  ;;  %v3427_v2 = vrot.slane %v6169_v39, 1  ;;  %v2334_v38 = vshll.u32 %v8206_v23, 16  ;;  %v6301_v20 = vperm.slane %v8207_v30, %v4631_v15 }
 0x201   : > { %v2529_v60 = vrot.slane %v6286_v4, 1  ;;  %v2284_v31 = vshrl.u32 %v5954_v33, 16  ;;  %v2339_v48 = vshll.u32 %v8208_v7, 16  ;;  %v2293_v1 = vrot.slane %v2291_v34, 1  ;;  %v8211_v34 = vld [vmem:[#allocation8_spill] sm:$0xff] }
 0x202   : > { %v3429_v21 = vsel %vm2495_vm10, %v3427_v2, %v3428_v8  ;;  %v2382_v44 = vshll.u32 %v5989_v50, 16  ;;  %v2530_v57 = vrot.slane %v6291_v43, 1  ;;  %v2332_v30 = vshrl.u32 %v8206_v23, 16  ;;  %v8210_v8 = vld [vmem:[#allocation15_spill] sm:$0xff]  ;;  %v8213_v33 = vld [vmem:[#allocation68_spill] sm:$0xff] }
 0x203   : > { %3474 = vrot.lane.b32.xlu1 %v3429_v21, %s4386_s26  ;;  %v2289_v40 = vor.u32 %v2288_v55, %v2284_v31  ;;  %v2430_v46 = vshll.u32 %v6072_v45, 16  ;;  %v2336_v35 = vrot.slane %v2334_v38, 1  ;;  %v8209_v7 = vpack.i.b16 %v8174_v16, %v8171_v53 }
 0x204   : > { %v8212_v2 = vpack.i.b16 %v8210_v8, %v8211_v34  ;;  %v1334_v55 = vperm.slane %v8213_v33, %v4631_v15  ;;  %v2531_v31 = vsel %vm2495_vm10, %v2529_v60, %v2530_v57  ;;  %v2341_v23 = vrot.slane %v2339_v48, 1  ;;  %v8215_v8 = vld [vmem:[#allocation58_spill] sm:$0xff] }
 0x205   : > { %v1274_v29 = vsel %vm435_vm9, %v6166_v25, %v8209_v7  ;;  %v2380_v38 = vshrl.u32 %v5989_v50, 16  ;;  %v2294_v53 = vsel %vm2270_vm11, %v2289_v40, %v2293_v1  ;;  %v2384_v16 = vrot.slane %v2382_v44, 1  ;;  %v8214_v7 = vld [vmem:[#allocation62_spill] sm:$0xff]  ;;  %v8238_v50 = vld [vmem:[#allocation77_spill] sm:$0xff] }
 0x206   : > { %v1280_v21 = vsel %vm435_vm9, %v6174_v24, %v8212_v2  ;;  %v1278_v26 = vperm.slane %v1274_v29, %v4631_v15  ;;  %v8216_v34 = vpack.i.b16 %v8214_v7, %v8215_v8  ;;  %v2432_v2 = vrot.slane %v2430_v46, 1 }
 0x207   : > { %v1284_v25 = vperm.slane %v1280_v21, %v4631_v15  ;;  %v1343_v57 = vrot.slane %v1334_v55, 4  ;;  %v2337_v60 = vor.u32 %v2336_v35, %v2332_v30  ;;  %v2387_v40 = vshll.u32 %v5999_v52, 16 }
 0x208   : > { %v1336_v24 = vsel %vm435_vm9, %v1335_v42, %v8216_v34  ;;  %v1287_v47 = vrot.slane %v1278_v26, 4  ;;  %2566 = vrot.lane.b32.xlu2 %v2531_v31, %s4384_s23  ;;  %2465 = vrot.lane.b32.xlu0 %v2294_v53, %s4364_s30  ;;  %v2428_v1 = vshrl.u32 %v6072_v45, 16  ;;  %v2435_v29 = vshll.u32 %v6078_v9, 16 }
 0x209   : > { %v1340_v33 = vperm.slane %v1336_v24, %v4631_v15  ;;  %v1285_v48 = vrot.slane %v1284_v25, 4  ;;  %v6344_v21 = vperm.slane %v6043_v3, %v4631_v15  ;;  %v2342_v31 = vsel %vm2270_vm11, %v2337_v60, %v2341_v23 }
 0x20a   : > { %v1288_v44 = vsel %vm435_vm9, %v1284_v25, %v1287_v47  ;;  %v2385_v53 = vor.u32 %v2384_v16, %v2380_v38  ;;  %v2433_v52 = vor.u32 %v2432_v2, %v2428_v1  ;;  %v639_v25 = vrot.slane %v6016_v28, 4 }
 0x20b   : > { %v1344_v46 = vsel %vm435_vm9, %v1340_v33, %v1343_v57  ;;  %v1341_v42 = vrot.slane %v1340_v33, 4  ;;  %2473 = vrot.lane.b32.xlu1 %v2342_v31, %s4364_s30  ;;  %v6352_v9 = vperm.slane %v1288_v44, %v5491_v36  ;;  %v1286_v47 = vsel %vm435_vm9, %v1285_v48, %v1278_v26 }
 0x20c   : > { %v6348_v35 = vperm.slane %v1344_v46, %v5491_v36  ;;  %v2389_v3 = vrot.slane %v2387_v40, 1  ;;  %v2346_v7 = vshll.u32 %v6203_v49, 16  ;;  %v6359_v23 = vperm.slane %v1286_v47, %v5491_v36  ;;  %v8217_v40 = vld [vmem:[#allocation43_spill] sm:$0xff] }
 0x20d   : > { %v1342_v30 = vsel %vm435_vm9, %v1341_v42, %v1334_v55  ;;  %v2437_v38 = vrot.slane %v2435_v29, 1  ;;  %v2351_v8 = vshll.u32 %v6209_v14, 16  ;;  %v1491_v26 = vrot.slane %v6344_v21, 4 }
 0x20e   : > { %v2617_v16 = vunpack.c.l.b16 %v6348_v35  ;;  %v6364_v34 = vperm.slane %v1342_v30, %v5491_v36  ;;  %v695_v55 = vrot.slane %v6019_v62, 4  ;;  %v2390_v28 = vsel %vm2270_vm11, %v2385_v53, %v2389_v3  ;;  %v8218_v62 = vld [vmem:[#allocation30_spill] sm:$0xff] }
 0x20f   : > { %v2298_v24 = vshll.u32 %v5882_v17, 16  ;;  %v2438_v2 = vsel %vm2270_vm11, %v2433_v52, %v2437_v38  ;;  %v2616_v33 = vunpack.c.l.b16 %v6352_v9  ;;  %v2608_v57 = vunpack.c.l.b16 %v6359_v23  ;;  %v8219_v52 = vld [vmem:[#allocation40_spill] sm:$0xff]  ;;  %v8220_v3 = vld [vmem:[#allocation6_spill] sm:$0xff] }
 0x210   : > { %v2609_v60 = vunpack.c.l.b16 %v6364_v34  ;;  %v1435_v14 = vrot.slane %v6301_v20, 4  ;;  %v6377_v1 = vperm.slane %v8217_v40, %v4631_v15  ;;  %v6381_v48 = vperm.slane %v8218_v62, %v4631_v15  ;;  %2481 = vrot.lane.b32.xlu2 %v2390_v28, %s4364_s30  ;;  %2489 = vrot.lane.b32.xlu0 %v2438_v2, %s4364_s30 }
 0x211   : > { %v2348_v29 = vrot.slane %v2346_v7, 1  ;;  %v6385_v44 = vpack.c.b16 %v2617_v16, %v2616_v33  ;;  %v2344_v46 = vshrl.u32 %v6203_v49, 16  ;;  %v2353_v42 = vrot.slane %v2351_v8, 1 }
 0x212   : > { %v6388_v31 = vpack.c.b16 %v2609_v60, %v2608_v57  ;;  %v2300_v53 = vrot.slane %v2298_v24, 1  ;;  %v2303_v47 = vshll.u32 %v8219_v52, 16  ;;  %v1492_v30 = vsel %vm435_vm9, %v1491_v26, %v6381_v48 }
 0x213   : > { %v2442_v38 = vshll.u32 %v8220_v3, 16  ;;  %2664 = vrot.lane.b32.xlu1 %v6385_v44, %s4387_s27  ;;  %v2310_v7 = vshll.u32 %v6257_v41, 16  ;;  %v640_v16 = vsel %vm435_vm9, 0, %v639_v25  ;;  %v696_v8 = vsel %vm435_vm9, 0, %v695_v55  ;;  %v8221_v25 = vld [vmem:[#allocation27_spill] sm:$0xff] }
 0x214   : > { %v733_v28 = vrot.slane %v6046_v61, 4  ;;  %v2349_v24 = vor.u32 %v2348_v29, %v2344_v46  ;;  %v2296_v2 = vshrl.u32 %v5882_v17, 16  ;;  %v2315_v33 = vshll.u32 %v6259_v6, 16 }
 0x215   : > { %v1436_v26 = vsel %vm435_vm9, %v1435_v14, %v6377_v1  ;;  %v6405_v57 = vperm.slane %v1492_v30, %v5491_v36  ;;  %v2204_v40 = vunpack.c.l.b16 %v640_v16  ;;  %v2205_v62 = vunpack.c.l.b16 %v696_v8  ;;  %v6421_v30 = vpop.permute.xlu2 %2560  ;;  %v8224_v8 = vld [vmem:[#allocation49_spill] sm:$0xff] }
 0x216   : > { %v734_v60 = vsel %vm435_vm9, 0, %v733_v28  ;;  %v6410_v55 = vperm.slane %v8221_v25, %v4631_v15  ;;  %v2354_v61 = vsel %vm2270_vm11, %v2349_v24, %v2353_v42  ;;  %v2305_v29 = vrot.slane %v2303_v47, 1  ;;  %8223 = vst [vmem:[#allocation7_spill] sm:$0xff] %v6421_v30 }
 0x217   : > { %v2444_v46 = vrot.slane %v2442_v38, 1  ;;  %v2301_v52 = vor.u32 %v2300_v53, %v2296_v2  ;;  %v2312_v6 = vrot.slane %v2310_v7, 1  ;;  %v6414_v45 = vperm.slane %v1436_v26, %v5491_v36 }
 0x218   : > { %v6416_v14 = vpack.c.b16 %v2205_v62, %v2204_v40  ;;  %2475 = vrot.lane.b32.xlu2 %v2354_v61, %s4364_s30  ;;  %2656 = vrot.lane.b32.xlu0 %v6388_v31, %s4387_s27  ;;  %v2440_v16 = vshrl.u32 %v8220_v3, 16  ;;  %v2447_v42 = vshll.u32 %v8224_v8, 16  ;;  %v2253_v47 = vunpack.c.l.b16 %v734_v60 }
 0x219   : > { %v2394_v53 = vshll.u32 %v6177_v18, 16  ;;  %v2308_v38 = vshrl.u32 %v6257_v41, 16  ;;  %v2317_v7 = vrot.slane %v2315_v33, 1  ;;  %v2625_v28 = vunpack.c.l.b16 %v6405_v57 }
 0x21a   : > { %8222 = vst [vmem:[#allocation71_spill] sm:$0xff] %v6416_v14  ;;  %v3203_v24 = vshll.u32 %v5910_v19, 16  ;;  %v2306_v2 = vsel %vm2270_vm11, %v2301_v52, %v2305_v29  ;;  %v2445_v26 = vor.u32 %v2444_v46, %v2440_v16  ;;  %v2399_v40 = vshll.u32 %v6183_v10, 16 }
 0x21b   : > { %v8225_v62 = vpack.i.b16 %v8205_v5, %v8198_v58  ;;  %2467 = vrot.lane.b32.xlu1 %v2306_v2, %s4364_s30  ;;  %v2313_v60 = vor.u32 %v2312_v6, %v2308_v38  ;;  %v2624_v61 = vunpack.c.l.b16 %v6414_v45  ;;  %v2454_v33 = vshll.u32 %v6416_v14, 16 }
 0x21c   : > { %v3208_v8 = vshll.u32 %v6102_v13, 16  ;;  %v2449_v3 = vrot.slane %v2447_v42, 1  ;;  %v6439_v41 = vpack.c.b16 %v2253_v47, %v2253_v47  ;;  %v2396_v29 = vrot.slane %v2394_v53, 1 }
 0x21d   : > { %v1389_v25 = vperm.slane %v8225_v62, %v4631_v15  ;;  %v2318_v46 = vsel %vm2270_vm11, %v2313_v60, %v2317_v7  ;;  %v6445_v52 = vpack.c.b16 %v2625_v28, %v2624_v61  ;;  %v2392_v16 = vshrl.u32 %v6177_v18, 16  ;;  %v8228_v60 = vld [vmem:[#allocation19_spill] sm:$0xff] }
 0x21e   : > { %8226 = vst [vmem:[#allocation50_spill] sm:$0xff] %v6439_v41  ;;  %v3205_v6 = vrot.slane %v3203_v24, 1  ;;  %v2450_v38 = vsel %vm2270_vm11, %v2445_v26, %v2449_v3  ;;  %v2401_v2 = vrot.slane %v2399_v40, 1  ;;  %v3201_v62 = vshrl.u32 %v5910_v19, 16 }
 0x21f   : > { %v6442_v10 = vperm.slane %v1389_v25, %v5491_v36  ;;  %v2452_v42 = vshrl.u32 %v6416_v14, 16  ;;  %v2456_v47 = vrot.slane %v2454_v33, 1  ;;  %v3210_v53 = vrot.slane %v3208_v8, 1  ;;  %v6468_v8 = vpop.permute.xlu2 %2554 }
 0x220   : > { %v1390_v49 = vrot.slane %v1389_v25, 4  ;;  %2469 = vrot.lane.b32.xlu2 %v2318_v46, %s4364_s30  ;;  %2672 = vrot.lane.b32.xlu0 %v6445_v52, %s4387_s27  ;;  %v2459_v7 = vshll.u32 %v6439_v41, 16  ;;  %v2397_v28 = vor.u32 %v2396_v29, %v2392_v16  ;;  %v8227_v19 = vrot.slane %v8180_v0, 4  ;;  %8230 = vst [vmem:[#allocation13_spill] sm:$0xff] %v6468_v8  ;;  %v8231_v16 = vld [vmem:[#allocation53_spill] sm:$0xff] }
 0x221   : > { %v2704_v13 = vunpack.c.l.b16 %v6442_v10  ;;  %v3206_v26 = vor.u32 %v3205_v6, %v3201_v62  ;;  %v2960_v40 = vrot.slane %v6388_v31, 1  ;;  %v8229_v61 = vrot.slane %v8184_v11, 4  ;;  %v8233_v62 = vld [vmem:[#allocation63_spill] sm:$0xff]  ;;  %v8239_v8 = vld [vmem:[#allocation41_spill] sm:$0xff] }
 0x222   : > { %v1302_v3 = vsel %vm435_vm9, %v8227_v19, %v6160_v32  ;;  %v1391_v25 = vsel %vm435_vm9, 0, %v1390_v49  ;;  %v3251_v46 = vshll.u32 %v5863_v22, 16  ;;  %v2457_v49 = vor.u32 %v2456_v47, %v2452_v42 }
 0x223   : > { %v6456_v24 = vpack.c.b16 %v2704_v13, %v2704_v13  ;;  %v1308_v33 = vsel %vm435_vm9, %v8229_v61, %v8228_v60  ;;  %v6473_v0 = vperm.slane %v1391_v25, %v5491_v36  ;;  %2491 = vrot.lane.b32.xlu1 %v2450_v38, %s4364_s30  ;;  %v8232_v11 = vrot.slane %v8186_v51, 4 }
 0x224   : > { %v6476_v32 = vperm.slane %v1308_v33, %v4631_v15  ;;  %v8234_v13 = vrot.slane %v8204_v37, 4  ;;  %v8235_v60 = vshrl.u32 %v8198_v58, 16  ;;  %v8236_v25 = vshrl.u32 %v8205_v5, 16 }
 0x225   : > { %v2961_v29 = vrot.slane %v6456_v24, 1  ;;  %v1358_v6 = vsel %vm435_vm9, %v8232_v11, %v8231_v16  ;;  %v2708_v38 = vunpack.c.l.b16 %v6473_v0  ;;  %v6494_v42 = vperm.slane %v1302_v3, %v4631_v15 }
 0x226   : > { %v1364_v19 = vsel %vm435_vm9, %v8234_v13, %v8233_v62  ;;  %v1202_v61 = vpack.i.b16 %v8236_v25, %v8235_v60  ;;  %v1313_v51 = vrot.slane %v6476_v32, 4  ;;  %v2461_v47 = vrot.slane %v2459_v7, 1 }
 0x227   : > { %v2962_v33 = vsel %vm2495_vm10, %v2960_v40, %v2961_v29  ;;  %v2402_v16 = vsel %vm2270_vm11, %v2397_v28, %v2401_v2  ;;  %v6499_v37 = vperm.slane %v1364_v19, %v4631_v15  ;;  %v3256_v5 = vshll.u32 %v6207_v63, 16 }
 0x228   : > { %v6502_v58 = vperm.slane %v1202_v61, %v4631_v15  ;;  %v2406_v40 = vshll.u32 %v6286_v4, 16  ;;  %v2724_v29 = vpack.c.b16 %v2708_v38, %v2708_v38  ;;  %v1314_v3 = vsel %vm435_vm9, %v1313_v51, %v6494_v42  ;;  %2483 = vrot.lane.b32.xlu0 %v2402_v16, %s4364_s30 }
 0x229   : > { %v2462_v11 = vsel %vm2270_vm11, %v2457_v49, %v2461_v47  ;;  %v6510_v7 = vperm.slane %v1358_v6, %v4631_v15  ;;  %v1369_v2 = vrot.slane %v6499_v37, 4  ;;  %v6519_v63 = vperm.slane %v6031_v54, %v4631_v15 }
 0x22a   : > { %v6515_v28 = vperm.slane %v6502_v58, %v5491_v36  ;;  %2493 = vrot.lane.b32.xlu2 %v2462_v11, %s4364_s30  ;;  %v2972_v62 = vrot.slane %v6385_v44, 1  ;;  %v2973_v49 = vrot.slane %v2724_v29, 1  ;;  %v6525_v6 = vperm.slane %v1314_v3, %v5491_v36  ;;  %v6539_v3 = vpop.permute.xlu2 %2548 }
 0x22b   : > { %v3249_v13 = vshrl.u32 %v5863_v22, 16  ;;  %v3253_v19 = vrot.slane %v3251_v46, 1  ;;  %v1370_v60 = vsel %vm435_vm9, %v1369_v2, %v6510_v7  ;;  %v3211_v54 = vsel %vm2270_vm11, %v3206_v26, %v3210_v53  ;;  %8237 = vst [vmem:[#allocation25_spill] sm:$0xff] %v6539_v3 }
 0x22c   : > { %v2705_v25 = vunpack.c.l.b16 %v6515_v28  ;;  %v2408_v61 = vrot.slane %v2406_v40, 1  ;;  %v2974_v38 = vsel %vm2495_vm10, %v2972_v62, %v2973_v49  ;;  %v6534_v51 = vperm.slane %v1370_v60, %v5491_v36  ;;  %3392 = vrot.lane.b32.xlu1 %v3211_v54, %s4388_s28 }
 0x22d   : > { %v3258_v47 = vrot.slane %v3256_v5, 1  ;;  %v2404_v22 = vshrl.u32 %v6286_v4, 16  ;;  %v2739_v16 = vshll.u32 %v6388_v31, 16  ;;  %v2411_v11 = vshll.u32 %v6291_v43, 16 }
 0x22e   : > { %v2721_v46 = vpack.c.b16 %v2705_v25, %v2705_v25  ;;  %v2610_v53 = vunpack.c.l.b16 %v6525_v6  ;;  %v2611_v26 = vunpack.c.l.b16 %v6534_v51  ;;  %v2744_v40 = vshll.u32 %v6456_v24, 16 }
 0x22f   : > { %v2060_v2 = vrot.slane %v6519_v63, 4  ;;  %v3254_v62 = vor.u32 %v3253_v19, %v3249_v13  ;;  %v2737_v5 = vshrl.u32 %v6388_v31, 16  ;;  %v2741_v49 = vrot.slane %v2739_v16, 1  ;;  %v6557_v13 = vpop.permute.xlu0 %2544 }
 0x230   : > { %v2409_v60 = vor.u32 %v2408_v61, %v2404_v22  ;;  %v2641_v25 = vpack.c.b16 %v2611_v26, %v2610_v53  ;;  %v2964_v54 = vrot.slane %v2721_v46, 1  ;;  %v2746_v4 = vrot.slane %v2744_v40, 1 }
 0x231   : > { %v3259_v18 = vsel %vm2270_vm11, %v3254_v62, %v3258_v47  ;;  %v2742_v41 = vor.u32 %v2741_v49, %v2737_v5  ;;  %v2787_v43 = vshll.u32 %v6385_v44, 16  ;;  %v2792_v14 = vshll.u32 %v2724_v29, 16 }
 0x232   : > { %v8240_v24 = vpack.i.b16 %v8238_v50, %v8239_v8  ;;  %3008 = vrot.lane.b32.xlu2 %v2962_v33, %s4389_s29  ;;  %3400 = vrot.lane.b32.xlu0 %v3259_v18, %s4388_s28  ;;  %v2413_v31 = vrot.slane %v2411_v11, 1  ;;  %v2963_v19 = vrot.slane %v2641_v25, 1  ;;  %v2785_v61 = vshrl.u32 %v6385_v44, 16 }
 0x233   : > { %v6561_v47 = vsel %vm2270_vm11, %v2742_v41, %v2746_v4  ;;  %v2789_v29 = vrot.slane %v2787_v43, 1  ;;  %v2794_v22 = vrot.slane %v2792_v14, 1  ;;  %v2751_v16 = vshll.u32 %v2641_v25, 16  ;;  %v8241_v41 = vld [vmem:[#allocation38_spill] sm:$0xff]  ;;  %v6572_v14 = vpop.permute.xlu1 %2552 }
 0x234   : > { %v6553_v3 = vperm.slane %v8240_v24, %v4631_v15  ;;  %v2414_v50 = vsel %vm2270_vm11, %v2409_v60, %v2413_v31  ;;  %v2965_v8 = vsel %vm2495_vm10, %v2963_v19, %v2964_v54  ;;  %v3215_v33 = vshll.u32 %v6169_v39, 16  ;;  %v6585_v54 = vpop.permute.xlu2 %2572 }
 0x235   : > { %v2358_v18 = vshll.u32 %v6238_v27, 16  ;;  %2485 = vrot.lane.b32.xlu1 %v2414_v50, %s4364_s30  ;;  %v2790_v11 = vor.u32 %v2789_v29, %v2785_v61  ;;  %v2749_v53 = vshrl.u32 %v2641_v25, 16  ;;  %v2753_v26 = vrot.slane %v2751_v16, 1  ;;  %8243 = vst [vmem:[#allocation21_spill] sm:$0xff] %v6585_v54 }
 0x236   : > { %v2756_v44 = vshll.u32 %v2721_v46, 16  ;;  %v6570_v4 = vperm.slane %v8241_v41, %v4631_v15  ;;  %v6576_v40 = vperm.slane %v6553_v3, %v5491_v36  ;;  %v8242_v62 = vrot.slane %v6283_v12, 4 }
 0x237   : > { %v6583_v49 = vsel %vm2270_vm11, %v2790_v11, %v2794_v22  ;;  %v2754_v60 = vor.u32 %v2753_v26, %v2749_v53  ;;  %v3217_v43 = vrot.slane %v3215_v33, 1  ;;  %v3220_v24 = vshll.u32 %v6279_v59, 16  ;;  %v8245_v33 = vld [vmem:[#allocation51_spill] sm:$0xff] }
 0x238   : > { %v2005_v5 = vsel %vm435_vm9, %v8242_v62, %v6410_v55  ;;  %v2758_v46 = vrot.slane %v2756_v44, 1  ;;  %v2363_v31 = vshll.u32 %v6245_v56, 16  ;;  %v2061_v19 = vsel %vm435_vm9, %v2060_v2, %v6570_v4  ;;  %v8244_v56 = vld [vmem:[#allocation76_spill] sm:$0xff] }
 0x239   : > { %v2360_v61 = vrot.slane %v2358_v18, 1  ;;  %v1297_v16 = vrot.slane %v6359_v23, 4  ;;  %v1315_v22 = vrot.slane %v6494_v42, 4  ;;  %v3213_v50 = vshrl.u32 %v6169_v39, 16  ;;  %v6614_v39 = vpop.permute.xlu0 %2568 }
 0x23a   : > { %v6592_v29 = vsel %vm2270_vm11, %v2754_v60, %v2758_v46  ;;  %3016 = vrot.lane.b32.xlu2 %v2974_v38, %s4389_s29  ;;  %2658 = vrot.lane.b32.xlu0 %v2641_v25, %s4387_s27  ;;  %v2712_v59 = vunpack.c.l.b16 %v6576_v40  ;;  %v8246_v2 = vpack.i.b16 %v8244_v56, %v8245_v33  ;;  %v2356_v11 = vshrl.u32 %v6238_v27, 16  ;;  %8247 = vst [vmem:[#allocation29_spill] sm:$0xff] %v6614_v39  ;;  %v8265_v27 = vld [vmem:[#allocation35_spill] sm:$0xff] }
 0x23b   : > { %v6608_v23 = vperm.slane %v2061_v19, %v5491_v36  ;;  %v6612_v42 = vsel %vm435_vm9, %v6476_v32, %v1315_v22  ;;  %v3218_v38 = vor.u32 %v3217_v43, %v3213_v50  ;;  %v3222_v25 = vrot.slane %v3220_v24, 1  ;;  %v6631_v19 = vpop.permute.xlu1 %3128 }
 0x23c   : > { %v6604_v18 = vperm.slane %v8246_v2, %v4631_v15  ;;  %v2361_v53 = vor.u32 %v2360_v61, %v2356_v11  ;;  %v2365_v26 = vrot.slane %v2363_v31, 1  ;;  %v1298_v44 = vsel %vm435_vm9, 0, %v1297_v16  ;;  %8248 = vst [vmem:[#allocation32_spill] sm:$0xff] %v6631_v19  ;;  %v6639_v50 = vpop.permute.xlu2 %3472 }
 0x23d   : > { %3010 = vrot.lane.b32.xlu1 %v2965_v8, %s4389_s29  ;;  %v1353_v41 = vrot.slane %v6364_v34, 4  ;;  %v2728_v62 = vpack.c.b16 %v2712_v59, %v2712_v59  ;;  %v6620_v60 = vperm.slane %v2005_v5, %v5491_v36  ;;  %v1371_v46 = vrot.slane %v6510_v7, 4  ;;  %8249 = vst [vmem:[#allocation34_spill] sm:$0xff] %v6639_v50 }
 0x23e   : > { %v1400_v32 = vrot.slane %v6442_v10, 4  ;;  %v2835_v43 = vshll.u32 %v6445_v52, 16  ;;  %v3089_v24 = vunpack.c.l.b16 %v6608_v23  ;;  %v6628_v8 = vperm.slane %v6604_v18, %v5491_v36 }
 0x23f   : > { %v1354_v31 = vsel %vm435_vm9, 0, %v1353_v41  ;;  %v2612_v34 = vunpack.c.l.b16 %v1298_v44  ;;  %v1372_v5 = vsel %vm435_vm9, %v6499_v37, %v1371_v46  ;;  %v3223_v10 = vsel %vm2270_vm11, %v3218_v38, %v3222_v25 }
 0x240   : > { %v2613_v61 = vunpack.c.l.b16 %v1354_v31  ;;  %v1401_v7 = vsel %vm435_vm9, 0, %v1400_v32  ;;  %v2366_v16 = vsel %vm2270_vm11, %v2361_v53, %v2365_v26  ;;  %v3088_v59 = vunpack.c.l.b16 %v6620_v60 }
 0x241   : > { %v2706_v22 = vunpack.c.l.b16 %v1401_v7  ;;  %v2837_v33 = vrot.slane %v2835_v43, 1  ;;  %v2840_v2 = vshll.u32 %v2728_v62, 16  ;;  %v3176_v38 = vunpack.c.l.b16 %v6628_v8  ;;  %v6652_v46 = vpop.permute.xlu0 %3120 }
 0x242   : > { %3394 = vrot.lane.b32.xlu2 %v3223_v10, %s4388_s28  ;;  %2477 = vrot.lane.b32.xlu0 %v2366_v16, %s4364_s30  ;;  %v6643_v56 = vpack.c.b16 %v2613_v61, %v2612_v34  ;;  %v6645_v11 = vpack.c.b16 %v3089_v24, %v3088_v59  ;;  %v2985_v53 = vrot.slane %v2728_v62, 1  ;;  %v2833_v26 = vshrl.u32 %v6445_v52, 16  ;;  %8250 = vst [vmem:[#allocation37_spill] sm:$0xff] %v6652_v46 }
 0x243   : > { %v2722_v37 = vpack.c.b16 %v2706_v22, %v2706_v22  ;;  %v1409_v24 = vrot.slane %v6502_v58, 4  ;;  %v2984_v34 = vrot.slane %v6445_v52, 1  ;;  %v2842_v7 = vrot.slane %v2840_v2, 1  ;;  %v6668_v58 = vpop.permute.xlu1 %2546 }
 0x244   : > { %v2763_v25 = vshll.u32 %v6643_v56, 16  ;;  %v2761_v32 = vshrl.u32 %v6643_v56, 16  ;;  %v2966_v31 = vrot.slane %v6643_v56, 1  ;;  %v2838_v61 = vor.u32 %v2837_v33, %v2833_v26 }
 0x245   : > { %2928 = vrot.lane.b32.xlu1 %v6561_v47, %s4390_s5  ;;  %v2768_v44 = vshll.u32 %v2722_v37, 16  ;;  %v2967_v41 = vrot.slane %v2722_v37, 1  ;;  %v6658_v47 = vpack.c.b16 %v3176_v38, %v3176_v38  ;;  %v3299_v62 = vshll.u32 %v6645_v11, 16 }
 0x246   : > { %v2765_v43 = vrot.slane %v2763_v25, 1  ;;  %v2986_v59 = vsel %vm2495_vm10, %v2984_v34, %v2985_v53  ;;  %v6671_v52 = vperm.slane %v1372_v5, %v5491_v36  ;;  %v1410_v2 = vsel %vm435_vm9, 0, %v1409_v24 }
 0x247   : > { %v2770_v10 = vrot.slane %v2768_v44, 1  ;;  %v6662_v22 = vsel %vm2495_vm10, %v2966_v31, %v2967_v41  ;;  %v2843_v38 = vsel %vm2270_vm11, %v2838_v61, %v2842_v7  ;;  %v3301_v25 = vrot.slane %v3299_v62, 1  ;;  %v8255_v41 = vld [vmem:[#allocation56_spill] sm:$0xff]  ;;  %v8257_v31 = vld [vmem:[#allocation46_spill] sm:$0xff]  ;;  %v8259_v62 = vld [vmem:[#allocation57_spill] sm:$0xff] }
 0x248   : > { %v2766_v16 = vor.u32 %v2765_v43, %v2761_v32  ;;  %8251 = vst [vmem:[#allocation65_spill] sm:$0xff] %v6671_v52  ;;  %v3304_v53 = vshll.u32 %v6658_v47, 16  ;;  %v6687_v5 = vperm.slane %v1410_v2, %v5491_v36  ;;  %v3297_v26 = vshrl.u32 %v6645_v11, 16  ;;  %v8256_v43 = vld [vmem:[#allocation26_spill] sm:$0xff] }
 0x249   : > { %v2619_v44 = vunpack.c.l.b16 %v6671_v52  ;;  %v1940_v32 = vrot.slane %v8255_v41, 4  ;;  %v1922_v24 = vrot.slane %v8256_v43, 4  ;;  %v1884_v34 = vrot.slane %v8257_v31, 4  ;;  %v6694_v61 = vpop.permute.xlu0 %2562  ;;  %v8261_v41 = vld [vmem:[#allocation61_spill] sm:$0xff] }
 0x24a   : > { %3024 = vrot.lane.b32.xlu2 %v2986_v59, %s4389_s29  ;;  %2936 = vrot.lane.b32.xlu0 %v6583_v49, %s4390_s5  ;;  %v6674_v33 = vsel %vm2270_vm11, %v2766_v16, %v2770_v10  ;;  %v6677_v37 = vpop.permute.xlu2 %3480  ;;  %v6683_v49 = vperm.slane %v6612_v42, %v5491_v36  ;;  %8254 = vst [vmem:[#allocation10_spill] sm:$0xff] %v6687_v5  ;;  %v3306_v42 = vrot.slane %v3304_v53, 1  ;;  %v8260_v59 = vld [vmem:[#allocation45_spill] sm:$0xff]  ;;  %v1866_v54 = vrot.slane %v8261_v41, 4 }
 0x24b   : > { %8252 = vst [vmem:[#allocation33_spill] sm:$0xff] %v6677_v37  ;;  %v3302_v7 = vor.u32 %v3301_v25, %v3297_v26  ;;  %v1941_v16 = vsel %vm435_vm9, %v8259_v62, %v1940_v32  ;;  %v6701_v2 = vperm.slane %v8260_v59, %v4631_v15  ;;  %v8262_v43 = vld [vmem:[#allocation9_spill] sm:$0xff]  ;;  %v8263_v26 = vld [vmem:[#allocation79_spill] sm:$0xff]  ;;  %v1923_v59 = vsel %vm435_vm9, 0, %v1922_v24 }
 0x24c   : > { %8253 = vst [vmem:[#allocation11_spill] sm:$0xff] %v6683_v49  ;;  %v2618_v10 = vunpack.c.l.b16 %v6683_v49  ;;  %v6707_v31 = vperm.slane %v8262_v43, %v4631_v15  ;;  %v1885_v32 = vsel %vm435_vm9, %v8263_v26, %v1884_v34  ;;  %v6721_v41 = vperm.slane %v1941_v16, %v5491_v36  ;;  %v8264_v43 = vld [vmem:[#allocation20_spill] sm:$0xff] }
 0x24d   : > { %2944 = vrot.lane.b32.xlu1 %v2843_v38, %s4390_s5  ;;  %8258 = vst [vmem:[#allocation12_spill] sm:$0xff] %v6694_v61  ;;  %v2709_v38 = vunpack.c.l.b16 %v6687_v5  ;;  %v1969_v25 = vrot.slane %v8264_v43, 4  ;;  %v3449_v34 = vrot.slane %v6658_v47, 1  ;;  %v1325_v26 = vrot.slane %v6525_v6, 4  ;;  %v8268_v61 = vld [vmem:[#allocation18_spill] sm:$0xff] }
 0x24e   : > { %v6714_v53 = vpack.c.b16 %v2619_v44, %v2618_v10  ;;  %v3307_v44 = vsel %vm2270_vm11, %v3302_v7, %v3306_v42  ;;  %v6731_v10 = vpop.permute.xlu1 %2570  ;;  %v1867_v16 = vsel %vm435_vm9, 0, %v1866_v54  ;;  %v6740_v43 = vperm.slane %v1885_v32, %v5491_v36 }
 0x24f   : > { %8266 = vst [vmem:[#allocation80_spill] sm:$0xff] %v6731_v10  ;;  %v6736_v24 = vpack.c.b16 %v2709_v38, %v2709_v38  ;;  %v6745_v7 = vperm.slane %v8268_v61, %v4631_v15  ;;  %v3448_v42 = vrot.slane %v6645_v11, 1  ;;  %v3077_v6 = vunpack.c.l.b16 %v1923_v59  ;;  %v8269_v10 = vld [vmem:[#allocation42_spill] sm:$0xff] }
 0x250   : > { %v2799_v47 = vshll.u32 %v6714_v53, 16  ;;  %v3083_v54 = vunpack.c.l.b16 %v6721_v41  ;;  %v1970_v32 = vsel %vm435_vm9, 0, %v1969_v25  ;;  %v3076_v17 = vunpack.c.l.b16 %v1867_v16 }
 0x251   : > { %v3450_v61 = vsel %vm2495_vm10, %v3448_v42, %v3449_v34  ;;  %v2804_v37 = vshll.u32 %v6736_v24, 16  ;;  %v3082_v59 = vunpack.c.l.b16 %v6740_v43  ;;  %v1299_v38 = vrot.slane %v6352_v9, 4  ;;  %v8270_v42 = vld [vmem:[#allocation22_spill] sm:$0xff] }
 0x252   : > { %2930 = vrot.lane.b32.xlu2 %v6592_v29, %s4390_s5  ;;  %3136 = vrot.lane.b32.xlu0 %v6645_v11, %s4385_s24  ;;  %v6726_v29 = vperm.slane %v8265_v27, %v4631_v15  ;;  %v6728_v39 = vpop.permute.xlu2 %2463  ;;  %v8267_v27 = vld [vmem:[#allocation64_spill] sm:$0xff]  ;;  %v1326_v11 = vsel %vm435_vm9, 0, %v1325_v26  ;;  %v6768_v34 = vpack.c.b16 %v3077_v6, %v3076_v17  ;;  %v3170_v16 = vunpack.c.l.b16 %v1970_v32 }
 0x253   : > { %v1978_v62 = vrot.slane %v8267_v27, 4  ;;  %v6755_v27 = vperm.slane %v8269_v10, %v4631_v15  ;;  %v2801_v10 = vrot.slane %v2799_v47, 1  ;;  %v1381_v26 = vrot.slane %v6534_v51, 4 }
 0x254   : > { %v6773_v5 = vperm.slane %v8270_v42, %v4631_v15  ;;  %v2797_v17 = vshrl.u32 %v6714_v53, 16  ;;  %v2614_v32 = vunpack.c.l.b16 %v1326_v11  ;;  %v2806_v42 = vrot.slane %v2804_v37, 1 }
 0x255   : > { %3408 = vrot.lane.b32.xlu1 %v3307_v44, %s4388_s28  ;;  %v1493_v44 = vrot.slane %v6381_v48, 4  ;;  %v1979_v48 = vsel %vm435_vm9, 0, %v1978_v62  ;;  %v8271_v62 = vld [vmem:[#allocation23_spill] sm:$0xff]  ;;  %v1382_v6 = vsel %vm435_vm9, 0, %v1381_v26  ;;  %v6802_v30 = vpack.c.b16 %v3170_v16, %v3170_v16 }
 0x256   : > { %v6777_v9 = vperm.slane %v8271_v62, %v4631_v15  ;;  %v6789_v51 = vperm.slane %v1979_v48, %v5491_v36  ;;  %v1463_v62 = vrot.slane %v6707_v31, 4  ;;  %v2976_v48 = vrot.slane %v6736_v24, 1 }
 0x257   : > { %v3227_v11 = vshll.u32 %v6768_v34, 16  ;;  %v2615_v49 = vunpack.c.l.b16 %v1382_v6  ;;  %v2975_v24 = vrot.slane %v6714_v53, 1  ;;  %v8277_v6 = vld [vmem:[#allocation82_spill] sm:$0xff] }
 0x258   : > { %v6766_v25 = vpop.permute.xlu0 %3122  ;;  %8274 = vst [vmem:[#allocation74_spill] sm:$0xff] %v6789_v51  ;;  %v1464_v37 = vsel %vm435_vm9, %v1463_v62, %v6726_v29  ;;  %v3173_v16 = vunpack.c.l.b16 %v6789_v51  ;;  %v1494_v62 = vsel %vm435_vm9, %v6344_v21, %v1493_v44 }
 0x259   : > { %v6821_v52 = vpack.c.b16 %v2615_v49, %v2614_v32  ;;  %v3225_v49 = vshrl.u32 %v6768_v34, 16  ;;  %v3229_v44 = vrot.slane %v3227_v11, 1 }
 0x25a   : > { %3488 = vrot.lane.b32.xlu2 %v3450_v61, %s4386_s26  ;;  %2660 = vrot.lane.b32.xlu0 %v6643_v56, %s4387_s27  ;;  %v8272_v61 = vld [vmem:[#allocation55_spill] sm:$0xff]  ;;  %v6783_v56 = vpack.c.b16 %v3083_v54, %v3082_v59  ;;  %v6785_v47 = vpop.permute.xlu2 %2487  ;;  %v6797_v54 = vsel %vm435_vm9, 0, %v1299_v38  ;;  %v1540_v38 = vrot.slane %v6553_v3, 4  ;;  %v6825_v3 = vperm.slane %v8277_v6, %v4631_v15 }
 0x25b   : > { %v6781_v19 = vperm.slane %v8272_v61, %v4631_v15  ;;  %8273 = vst [vmem:[#allocation75_spill] sm:$0xff] %v6785_v47  ;;  %v1519_v61 = vrot.slane %v6755_v27, 4  ;;  %v2802_v47 = vor.u32 %v2801_v10, %v2797_v17  ;;  %v3230_v6 = vor.u32 %v3229_v44, %v3225_v49 }
 0x25c   : > { %v3263_v26 = vshll.u32 %v6783_v56, 16  ;;  %v1541_v17 = vsel %vm435_vm9, 0, %v1540_v38 }
 0x25d   : > { %2666 = vrot.lane.b32.xlu1 %v6714_v53, %s4387_s27  ;;  %v6799_v59 = vpop.permute.xlu1 %2564  ;;  %v1520_v50 = vsel %vm435_vm9, %v1519_v61, %v6773_v5  ;;  %v2807_v46 = vsel %vm2270_vm11, %v2802_v47, %v2806_v42  ;;  %v2977_v53 = vsel %vm2495_vm10, %v2975_v24, %v2976_v48  ;;  %v8278_v61 = vrot.slane %v6377_v1, 4 }
 0x25e   : > { %8275 = vst [vmem:[#allocation3_spill] sm:$0xff] %v6799_v59  ;;  %v8276_v59 = vld [vmem:[#allocation73_spill] sm:$0xff]  ;;  %v3265_v32 = vrot.slane %v3263_v26, 1  ;;  %v6845_v1 = vperm.slane %v1520_v50, %v5491_v36  ;;  %v3261_v48 = vshrl.u32 %v6783_v56, 16  ;;  %v1355_v50 = vrot.slane %v6348_v35, 4 }
 0x25f   : > { %v6813_v10 = vperm.slane %v8276_v59, %v4631_v15  ;;  %v1438_v47 = vsel %vm435_vm9, %v6301_v20, %v8278_v61  ;;  %v3232_v15 = vshll.u32 %v6802_v30, 16  ;;  %v6848_v20 = vperm.slane %v1494_v62, %v5491_v36 }
 0x260   : > { %8281 = vst [vmem:[#allocation14_spill] sm:$0xff] %v6845_v1  ;;  %v1419_v59 = vrot.slane %v6515_v28, 4  ;;  %v6855_v11 = vperm.slane %v1438_v47, %v5491_v36  ;;  %v3431_v28 = vrot.slane %v6802_v30, 1  ;;  %v3266_v47 = vor.u32 %v3265_v32, %v3261_v48 }
 0x261   : > { %8282 = vst [vmem:[#allocation54_spill] sm:$0xff] %v6848_v20  ;;  %v6859_v26 = vperm.slane %v6813_v10, %v5491_v36  ;;  %v3234_v61 = vrot.slane %v3232_v15, 1  ;;  %v2627_v35 = vunpack.c.l.b16 %v6845_v1  ;;  %v1356_v49 = vsel %vm435_vm9, 0, %v1355_v50 }
 0x262   : > { %2932 = vrot.lane.b32.xlu2 %v6674_v33, %s4390_s5  ;;  %2938 = vrot.lane.b32.xlu0 %v2807_v46, %s4390_s5  ;;  %v6838_v42 = vpop.permute.xlu2 %2566  ;;  %v6840_v33 = vpop.permute.xlu0 %2556  ;;  %v6842_v46 = vpack.c.b16 %v3173_v16, %v3173_v16  ;;  %8283 = vst [vmem:[#allocation15_spill] sm:$0xff] %v6855_v11  ;;  %v3430_v16 = vrot.slane %v6768_v34, 1  ;;  %v2632_v30 = vunpack.c.l.b16 %v6855_v11  ;;  %v6884_v44 = vperm.slane %v1541_v17, %v5491_v36 }
 0x263   : > { %8279 = vst [vmem:[#allocation78_spill] sm:$0xff] %v6838_v42  ;;  %v2633_v42 = vunpack.c.l.b16 %v6848_v20  ;;  %v2713_v62 = vunpack.c.l.b16 %v6859_v26  ;;  %v2775_v15 = vshll.u32 %v6821_v52, 16  ;;  %v1402_v32 = vrot.slane %v6473_v0, 4 }
 0x264   : > { %8280 = vst [vmem:[#allocation4_spill] sm:$0xff] %v6840_v33  ;;  %v3268_v21 = vshll.u32 %v6842_v46, 16  ;;  %v1420_v33 = vsel %vm435_vm9, 0, %v1419_v59  ;;  %v3235_v59 = vsel %vm2270_vm11, %v3230_v6, %v3234_v61  ;;  %v2621_v0 = vunpack.c.l.b16 %v1356_v49  ;;  %v8289_v6 = vld [vmem:[#allocation16_spill] sm:$0xff] }
 0x265   : > { %3012 = vrot.lane.b32.xlu1 %v6662_v22, %s4389_s29  ;;  %8284 = vst [vmem:[#allocation8_spill] sm:$0xff] %v6859_v26  ;;  %v6862_v24 = vpop.permute.xlu1 %2479  ;;  %v6868_v22 = vperm.slane %v1464_v37, %v5491_v36  ;;  %v2032_v37 = vrot.slane %v6701_v2, 4  ;;  %v2707_v50 = vunpack.c.l.b16 %v1420_v33  ;;  %v2716_v33 = vunpack.c.l.b16 %v6884_v44 }
 0x266   : > { %8286 = vst [vmem:[#allocation62_spill] sm:$0xff] %v6884_v44  ;;  %v3270_v11 = vrot.slane %v3268_v21, 1  ;;  %v8292_v49 = vrot.slane %v6570_v4, 4 }
 0x267   : > { %8285 = vst [vmem:[#allocation68_spill] sm:$0xff] %v6868_v22  ;;  %v2626_v38 = vunpack.c.l.b16 %v6868_v22  ;;  %v6891_v48 = vsel %vm435_vm9, %v2032_v37, %v6745_v7  ;;  %v6901_v22 = vpack.c.b16 %v2633_v42, %v2632_v30  ;;  %v2777_v42 = vrot.slane %v2775_v15, 1 }
 0x269   : > { %v6899_v20 = vpack.c.b16 %v2627_v35, %v2626_v38  ;;  %v1403_v35 = vsel %vm435_vm9, 0, %v1402_v32  ;;  %v2063_v38 = vsel %vm435_vm9, %v6519_v63, %v8292_v49  ;;  %v3432_v63 = vsel %vm2495_vm10, %v3430_v16, %v3431_v28 }
 0x26a   : > { %3018 = vrot.lane.b32.xlu2 %v2977_v53, %s4389_s29  ;;  %3124 = vrot.lane.b32.xlu0 %v6768_v34, %s4385_s24  ;;  %v8287_v53 = vrot.slane %v6410_v55, 4  ;;  %v6897_v26 = vpop.permute.xlu2 %2481  ;;  %v2472_v17 = vpop.permute.xlu0 %2471  ;;  %v6907_v55 = vpack.c.b16 %v2713_v62, %v2713_v62  ;;  %v6930_v32 = vperm.slane %v2063_v38, %v5491_v36  ;;  %v8296_v16 = vrot.slane %v6604_v18, 4 }
 0x26b   : > { %8288 = vst [vmem:[#allocation58_spill] sm:$0xff] %v6897_v26  ;;  %v3514_v61 = vsel %vm3504_vm12, %v8289_v6, %v2472_v17  ;;  %v2847_v15 = vshll.u32 %v6899_v20, 16  ;;  %v8293_v17 = vunpack.c.l.b16 %v6797_v54  ;;  %v2881_v18 = vshrl.u32 %v6901_v22, 16 }
 0x26c   : > { %v2007_v34 = vsel %vm435_vm9, %v6283_v12, %v8287_v53  ;;  %v2088_v12 = vrot.slane %v6781_v19, 4  ;;  %v6913_v21 = vsel %vm3537_vm13, %v3514_v61, %v6572_v14  ;;  %v2723_v53 = vpack.c.b16 %v2707_v50, %v2707_v50 }
 0x26d   : > { %3130 = vrot.lane.b32.xlu1 %v6783_v56, %s4385_s24  ;;  %8290 = vst [vmem:[#allocation43_spill] sm:$0xff] %v6913_v21  ;;  %v6916_v30 = vpop.permute.xlu1 %2558  ;;  %v6921_v62 = vperm.slane %v2007_v34, %v5491_v36  ;;  %v3440_v14 = vrot.slane %v6842_v46, 1  ;;  %v6934_v6 = vpack.c.b16 %v2621_v0, %v8293_v17  ;;  %v3271_v34 = vsel %vm2270_vm11, %v3266_v47, %v3270_v11 }
 0x26e   : > { %8291 = vst [vmem:[#allocation30_spill] sm:$0xff] %v6916_v30  ;;  %v2089_v37 = vsel %vm435_vm9, %v2088_v12, %v6777_v9  ;;  %v2773_v61 = vshrl.u32 %v6821_v52, 16  ;;  %v2780_v4 = vshll.u32 %v2723_v53, 16  ;;  %v2710_v12 = vunpack.c.l.b16 %v1403_v35 }
 0x26f   : > { %v6941_v46 = vpack.c.b16 %v2716_v33, %v2716_v33  ;;  %v3096_v50 = vunpack.c.l.b16 %v6921_v62  ;;  %v3097_v54 = vunpack.c.l.b16 %v6930_v32  ;;  %v2852_v0 = vshll.u32 %v6907_v55, 16 }
 0x270   : > { %v2883_v11 = vshll.u32 %v6901_v22, 16  ;;  %v2778_v47 = vor.u32 %v2777_v42, %v2773_v61  ;;  %v2782_v49 = vrot.slane %v2780_v4, 1  ;;  %v2110_v28 = vsel %vm435_vm9, 0, %v8296_v16 }
 0x271   : > { %v6951_v17 = vpack.c.b16 %v3097_v54, %v3096_v50  ;;  %v2811_v33 = vshll.u32 %v6934_v6, 16  ;;  %v6962_v61 = vperm.slane %v2110_v28, %v5491_v36  ;;  %v2845_v50 = vshrl.u32 %v6899_v20, 16 }
 0x272   : > { %3396 = vrot.lane.b32.xlu2 %v3235_v59, %s4388_s28  ;;  %3402 = vrot.lane.b32.xlu0 %v3271_v34, %s4388_s28  ;;  %v6947_v38 = vpop.permute.xlu2 %2475  ;;  %v6949_v35 = vpop.permute.xlu0 %2550  ;;  %v2849_v59 = vrot.slane %v2847_v15, 1  ;;  %v8297_v34 = vrot.slane %v6783_v56, 1  ;;  %v6965_v4 = vsel %vm2270_vm11, %v2778_v47, %v2782_v49  ;;  %v2726_v15 = vpack.c.b16 %v2710_v12, %v2710_v12 }
 0x273   : > { %8294 = vst [vmem:[#allocation40_spill] sm:$0xff] %v6947_v38  ;;  %v2888_v54 = vshll.u32 %v6941_v46, 16  ;;  %v2970_v16 = vrot.slane %v2723_v53, 1  ;;  %v2885_v56 = vrot.slane %v2883_v11, 1  ;;  %v3347_v28 = vshll.u32 %v6951_v17, 16 }
 0x274   : > { %8295 = vst [vmem:[#allocation27_spill] sm:$0xff] %v6949_v35  ;;  %v3441_v42 = vsel %vm2495_vm10, %v8297_v34, %v3440_v14  ;;  %v3180_v14 = vunpack.c.l.b16 %v6962_v61  ;;  %v2850_v34 = vor.u32 %v2849_v59, %v2845_v50  ;;  %v2809_v47 = vshrl.u32 %v6934_v6, 16 }
 0x275   : > { %3476 = vrot.lane.b32.xlu1 %v3432_v63, %s4386_s26  ;;  %8298 = vst [vmem:[#allocation49_spill] sm:$0xff] %v6962_v61  ;;  %v6970_v30 = vpop.permute.xlu1 %3474  ;;  %v2854_v63 = vrot.slane %v2852_v0, 1  ;;  %v2813_v49 = vrot.slane %v2811_v33, 1  ;;  %v2969_v12 = vrot.slane %v6821_v52, 1  ;;  %v6977_v35 = vperm.slane %v2089_v37, %v5491_v36 }
 0x276   : > { %v3196_v38 = vpack.c.b16 %v3180_v14, %v3180_v14  ;;  %v3349_v26 = vrot.slane %v3347_v28, 1  ;;  %v2816_v53 = vshll.u32 %v2726_v15, 16  ;;  %v2890_v0 = vrot.slane %v2888_v54, 1 }
 0x277   : > { %8299 = vst [vmem:[#allocation19_spill] sm:$0xff] %v6977_v35  ;;  %v6984_v11 = vperm.slane %v6891_v48, %v5491_v36  ;;  %v3345_v59 = vshrl.u32 %v6951_v17, 16  ;;  %v6988_v33 = vsel %vm2495_vm10, %v2969_v12, %v2970_v16  ;;  %v3460_v50 = vrot.slane %v6951_v17, 1 }
 0x278   : > { %v3352_v37 = vshll.u32 %v3196_v38, 16  ;;  %v3461_v14 = vrot.slane %v3196_v38, 1  ;;  %v2818_v28 = vrot.slane %v2816_v53, 1  ;;  %v6995_v54 = vperm.slane %v6825_v3, %v5491_v36 }
 0x279   : > { %v2814_v1 = vor.u32 %v2813_v49, %v2809_v47  ;;  %v2978_v48 = vrot.slane %v6934_v6, 1  ;;  %v2979_v51 = vrot.slane %v2726_v15, 1  ;;  %v3091_v16 = vunpack.c.l.b16 %v6977_v35 }
 0x27a   : > { %3482 = vrot.lane.b32.xlu2 %v3441_v42, %s4386_s26  ;;  %2674 = vrot.lane.b32.xlu0 %v6899_v20, %s4387_s27  ;;  %v6991_v44 = vpop.permute.xlu2 %2469  ;;  %v2466_v42 = vpop.permute.xlu0 %2465  ;;  %v3350_v12 = vor.u32 %v3349_v26, %v3345_v59  ;;  %v3354_v61 = vrot.slane %v3352_v37, 1  ;;  %v7002_v38 = vsel %vm2495_vm10, %v3460_v50, %v3461_v14  ;;  %v2886_v49 = vor.u32 %v2885_v56, %v2881_v18 }
 0x27b   : > { %8300 = vst [vmem:[#allocation53_spill] sm:$0xff] %v6991_v44  ;;  %v7005_v53 = vsel %vm2270_vm11, %v2814_v1, %v2818_v28  ;;  %v7008_v44 = vsel %vm2495_vm10, %v2978_v48, %v2979_v51  ;;  %v3090_v15 = vunpack.c.l.b16 %v6984_v11  ;;  %v2988_v35 = vrot.slane %v6907_v55, 1  ;;  %v8302_v48 = vld [vmem:[#allocation24_spill] sm:$0xff] }
 0x27c   : > { %v3355_v21 = vsel %vm2270_vm11, %v3350_v12, %v3354_v61  ;;  %v2855_v26 = vsel %vm2270_vm11, %v2850_v34, %v2854_v63  ;;  %v2891_v59 = vsel %vm2270_vm11, %v2886_v49, %v2890_v0  ;;  %v3177_v1 = vunpack.c.l.b16 %v6995_v54 }
 0x27d   : > { %2680 = vrot.lane.b32.xlu1 %v6901_v22, %s4387_s27  ;;  %v7010_v47 = vpop.permute.xlu1 %2473  ;;  %v3113_v37 = vpack.c.b16 %v3091_v16, %v3090_v15  ;;  %v2987_v51 = vrot.slane %v6899_v20, 1  ;;  %v1465_v18 = vrot.slane %v6726_v29, 4  ;;  %v2997_v63 = vrot.slane %v6941_v46, 1 }
 0x27e   : > { %v3193_v34 = vpack.c.b16 %v3177_v1, %v3177_v1  ;;  %v2996_v50 = vrot.slane %v6901_v22, 1  ;;  %v2034_v28 = vrot.slane %v6745_v7, 4  ;;  %v2090_v12 = vrot.slane %v6777_v9, 4 }
 0x27f   : > { %v2989_v55 = vsel %vm2495_vm10, %v2987_v51, %v2988_v35  ;;  %v3311_v0 = vshll.u32 %v3113_v37, 16  ;;  %v1466_v14 = vsel %vm435_vm9, %v6707_v31, %v1465_v18  ;;  %v3508_v35 = vsel %vm3504_vm12, %v8302_v48, %v2466_v42 }
 0x280   : > { %v2998_v29 = vsel %vm2495_vm10, %v2996_v50, %v2997_v63  ;;  %v3316_v46 = vshll.u32 %v3193_v34, 16  ;;  %v1521_v22 = vrot.slane %v6773_v5, 4  ;;  %v2035_v31 = vsel %vm435_vm9, %v6701_v2, %v2034_v28  ;;  %v8303_v28 = vld [vmem:[#allocation59_spill] sm:$0xff] }
 0x281   : > { %v3313_v16 = vrot.slane %v3311_v0, 1  ;;  %v3309_v49 = vshrl.u32 %v3113_v37, 16  ;;  %v7045_v15 = vperm.slane %v2035_v31, %v5491_v36  ;;  %v2091_v7 = vsel %vm435_vm9, %v6781_v19, %v2090_v12 }
 0x282   : > { %2946 = vrot.lane.b32.xlu2 %v2855_v26, %s4390_s5  ;;  %2952 = vrot.lane.b32.xlu0 %v2891_v59, %s4390_s5  ;;  %v7024_v61 = vpop.permute.xlu0 %2489  ;;  %v7055_v9 = vsel %vm3537_vm13, %v3508_v35, %v6668_v58  ;;  %v7058_v5 = vperm.slane %v1466_v14, %v5491_v36  ;;  %v1522_v2 = vsel %vm435_vm9, %v6755_v27, %v1521_v22  ;;  %v3318_v1 = vrot.slane %v3316_v46, 1  ;;  %v8304_v35 = vld [vmem:[#allocation81_spill] sm:$0xff] }
 0x283   : > { %v7063_v59 = vperm.slane %v2091_v7, %v5491_v36  ;;  %v3314_v19 = vor.u32 %v3313_v16, %v3309_v49  ;;  %v7068_v51 = vperm.slane %v1522_v2, %v5491_v36  ;;  %v3098_v58 = vunpack.c.l.b16 %v7045_v15  ;;  %v8306_v2 = vld [vmem:[#allocation48_spill] sm:$0xff] }
 0x284   : > { %v7022_v56 = vpop.permute.xlu2 %2493  ;;  %v3452_v27 = vrot.slane %v3193_v34, 1  ;;  %v2634_v0 = vunpack.c.l.b16 %v7058_v5  ;;  %v1894_v48 = vrot.slane %v8303_v28, 4  ;;  %v3772_v34 = vld [vmem:[%s7737_s1 + $0x10] sm:$0x3] }
 0x285   : > { %8301 = vst [vmem:[#allocation63_spill] sm:$0xff] %v7022_v56  ;;  %3026 = vrot.lane.b32.xlu1 %v2989_v55, %s4389_s29  ;;  %v7032_v20 = vpop.permute.xlu1 %2664  ;;  %v3099_v18 = vunpack.c.l.b16 %v7063_v59  ;;  %v1559_v55 = vrot.slane %v6813_v10, 4  ;;  %v2635_v50 = vunpack.c.l.b16 %v7068_v51  ;;  %v1950_v10 = vrot.slane %v8304_v35, 4  ;;  %v8309_v35 = vld [vmem:[#allocation39_spill] sm:$0xff] }
 0x286   : > { %v3782_v46 = vunpack.c.l.b16 %v3772_v34  ;;  %v1971_v34 = vrot.slane %v8309_v35, 4 }
 0x287   : > { %v7077_v14 = vpack.c.b16 %v3099_v18, %v3098_v58  ;;  %v7087_v16 = vpack.c.b16 %v2635_v50, %v2634_v0  ;;  %v1560_v12 = vsel %vm435_vm9, 0, %v1559_v55  ;;  %v1895_v18 = vsel %vm435_vm9, 0, %v1894_v48  ;;  %v4214_v48 = vld [vmem:[%s7737_s1 + $0x8] sm:$0xff] }
 0x288   : > { %v7097_v7 = vperm.slane %v1560_v12, %v5491_v36  ;;  %v1951_v55 = vsel %vm435_vm9, 0, %v1950_v10 }
 0x289   : > { %v2895_v58 = vshll.u32 %v7087_v16, 16 }
 0x28a   : > { %3032 = vrot.lane.b32.xlu2 %v2998_v29, %s4389_s29  ;;  %3138 = vrot.lane.b32.xlu0 %v3113_v37, %s4385_s24  ;;  %v7051_v26 = vpop.permute.xlu0 %2656  ;;  %v3451_v29 = vrot.slane %v3113_v37, 1  ;;  %v8305_v37 = vld [vmem:[#allocation67_spill] sm:$0xff]  ;;  %v2717_v0 = vunpack.c.l.b16 %v7097_v7 }
 0x28b   : > { %v1924_v49 = vrot.slane %v8305_v37, 4  ;;  %v3079_v37 = vunpack.c.l.b16 %v1951_v55 }
 0x28c   : > { %v7049_v42 = vpop.permute.xlu2 %3008  ;;  %v2733_v10 = vpack.c.b16 %v2717_v0, %v2717_v0 }
 0x28d   : > { %3144 = vrot.lane.b32.xlu1 %v6951_v17, %s4385_s24  ;;  %v7073_v63 = vpop.permute.xlu1 %2467  ;;  %v3319_v17 = vsel %vm2270_vm11, %v3314_v19, %v3318_v1  ;;  %v1868_v19 = vrot.slane %v8306_v2, 4  ;;  %v3785_v1 = vpack.c.b16 %v3782_v46, %v3782_v46  ;;  %v1925_v12 = vsel %vm435_vm9, 0, %v1924_v49 }
 0x28e   : > { %v2897_v46 = vrot.slane %v2895_v58, 1  ;;  %v2893_v49 = vshrl.u32 %v7087_v16, 16  ;;  %v2900_v2 = vshll.u32 %v2733_v10, 16  ;;  %v3085_v0 = vunpack.c.l.b16 %v1925_v12 }
 0x28f   : > { %v3823_v28 = vsel %vm3821_vm14, %v3785_v1, 0  ;;  %v2999_v1 = vrot.slane %v7087_v16, 1 }
 0x290   : > { %3830 = vmatpush.bf16.msra.mxu0 %v3823_v28  ;;  %4310 = vmatpush.bf16.msra.mxu1 %v3823_v28  ;;  %v2902_v35 = vrot.slane %v2900_v2, 1 }
 0x291   : > { %4311 = vmatpush.bf16.msra.mxu2 %v3823_v28  ;;  %4312 = vmatpush.bf16.msra.mxu3 %v3823_v28 }
 0x292   : > { %3410 = vrot.lane.b32.xlu2 %v3319_v17, %s4388_s28  ;;  %3416 = vrot.lane.b32.xlu0 %v3355_v21, %s4388_s28  ;;  %v7092_v31 = vpop.permute.xlu0 %2672  ;;  %v3453_v21 = vsel %vm2495_vm10, %v3451_v29, %v3452_v27  ;;  %v2128_v27 = vrot.slane %v6825_v3, 4  ;;  %v8308_v17 = vld [vmem:[#allocation60_spill] sm:$0xff]  ;;  %v1869_v3 = vsel %vm435_vm9, 0, %v1868_v19 }
 0x293   : > { %v1988_v29 = vrot.slane %v8308_v17, 4  ;;  %v3000_v17 = vrot.slane %v2733_v10, 1  ;;  %v1952_v10 = vrot.slane %v6721_v41, 4 }
 0x294   : > { %v7090_v22 = vpop.permute.xlu2 %3016  ;;  %v2129_v19 = vsel %vm435_vm9, 0, %v2128_v27  ;;  %3831 = vmatpush.bf16.msra.mxu0 %v4214_v48  ;;  %4313 = vmatpush.bf16.msra.mxu1 %v4214_v48  ;;  %v3084_v27 = vunpack.c.l.b16 %v1869_v3 }
 0x295   : > { %3490 = vrot.lane.b32.xlu1 %v3453_v21, %s4386_s26  ;;  %v7106_v50 = vpop.permute.xlu1 %2491  ;;  %v3078_v21 = vunpack.c.l.b16 %v1895_v18  ;;  %v1989_v58 = vsel %vm435_vm9, 0, %v1988_v29  ;;  %v1972_v18 = vsel %vm435_vm9, 0, %v1971_v34  ;;  %v7132_v12 = vsel %vm2495_vm10, %v2999_v1, %v3000_v17  ;;  %4314 = vmatpush.bf16.msra.mxu2 %v4214_v48 }
 0x296   : > { %8307 = vst [vmem:[#allocation77_spill] sm:$0xff] %v7106_v50  ;;  %v7135_v29 = vperm.slane %v2129_v19, %v5491_v36  ;;  %v1896_v34 = vrot.slane %v6740_v43, 4  ;;  %v3171_v50 = vunpack.c.l.b16 %v1989_v58  ;;  %4315 = vmatpush.bf16.msra.mxu3 %v4214_v48  ;;  %v7150_v3 = vpack.c.b16 %v3085_v0, %v3084_v27 }
 0x297   : > { %v7141_v56 = vpack.c.b16 %v3079_v37, %v3078_v21  ;;  %v1953_v37 = vsel %vm435_vm9, 0, %v1952_v10  ;;  %v3357_v0 = vshrl.u32 %v7077_v14, 16  ;;  %v1447_v27 = vrot.slane %v6414_v45, 4 }
 0x298   : > { %v3181_v36 = vunpack.c.l.b16 %v7135_v29  ;;  %v1897_v21 = vsel %vm435_vm9, 0, %v1896_v34  ;;  %v7158_v48 = vpack.c.b16 %v3171_v50, %v3171_v50  ;;  %v3087_v50 = vunpack.c.l.b16 %v1953_v37 }
 0x299   : > { %v3239_v1 = vshll.u32 %v7141_v56, 16 }
 0x29a   : > { %3496 = vrot.lane.b32.xlu2 %v7002_v38, %s4386_s26  ;;  %2662 = vrot.lane.b32.xlu0 %v6821_v52, %s4387_s27  ;;  %v7126_v28 = vpop.permute.xlu0 %2483  ;;  %v4213_v52 = vld [vmem:[%s7737_s1] sm:$0xff]  ;;  %v2898_v38 = vor.u32 %v2897_v46, %v2893_v49  ;;  %v3174_v46 = vunpack.c.l.b16 %v1972_v18  ;;  %v3197_v41 = vpack.c.b16 %v3181_v36, %v3181_v36  ;;  %v3463_v18 = vrot.slane %v7077_v14, 1 }
 0x29b   : > { %3832 = vmatpush.bf16.msra.mxu0 %v4213_v52  ;;  %4316 = vmatpush.bf16.msra.mxu1 %v4213_v52 }
 0x29c   : > { %v7124_v55 = vpop.permute.xlu2 %3394  ;;  %v7144_v49 = vsel %vm2270_vm11, %v2898_v38, %v2902_v35  ;;  %4317 = vmatpush.bf16.msra.mxu2 %v4213_v52  ;;  %v7161_v17 = vpack.c.b16 %v3174_v46, %v3174_v46  ;;  %v3364_v58 = vshll.u32 %v3197_v41, 16  ;;  %v3464_v19 = vrot.slane %v3197_v41, 1  ;;  %4318 = vmatpush.bf16.msra.mxu3 %v4213_v52 }
 0x29d   : > { %2668 = vrot.lane.b32.xlu1 %v6934_v6, %s4387_s27  ;;  %v3359_v6 = vshll.u32 %v7077_v14, 16  ;;  %v1503_v52 = vrot.slane %v6405_v57, 4  ;;  %v3241_v41 = vrot.slane %v3239_v1, 1  ;;  %v3273_v57 = vshrl.u32 %v7150_v3, 16 }
 0x29e   : > { %v7146_v2 = vpop.permute.xlu1 %3392  ;;  %v3366_v10 = vrot.slane %v3364_v58, 1  ;;  %v7174_v46 = vsel %vm2495_vm10, %v3463_v18, %v3464_v19  ;;  %v3280_v37 = vshll.u32 %v7161_v17, 16  ;;  %v1550_v58 = vrot.slane %v6576_v40, 4 }
 0x29f   : > { %v3361_v43 = vrot.slane %v3359_v6, 1  ;;  %v1504_v1 = vsel %vm435_vm9, 0, %v1503_v52  ;;  %v2072_v52 = vrot.slane %v6608_v23, 4 }
 0x2a0   : > { %v2629_v40 = vunpack.c.l.b16 %v1504_v1 }
 0x2a1   : > { %v3362_v34 = vor.u32 %v3361_v43, %v3357_v0  ;;  %v3237_v43 = vshrl.u32 %v7141_v56, 16  ;;  %v1448_v0 = vsel %vm435_vm9, 0, %v1447_v27  ;;  %v2073_v1 = vsel %vm435_vm9, 0, %v2072_v52 }
 0x2a2   : > { %2934 = vrot.lane.b32.xlu2 %v6965_v4, %s4390_s5  ;;  %2940 = vrot.lane.b32.xlu0 %v7005_v53, %s4390_s5  ;;  %v3275_v4 = vshll.u32 %v7150_v3, 16  ;;  %v3086_v53 = vunpack.c.l.b16 %v1897_v21  ;;  %v3244_v21 = vshll.u32 %v7158_v48, 16 }
 0x2a3   : > { %v3242_v18 = vor.u32 %v3241_v41, %v3237_v43 }
 0x2a4   : > { %v7165_v38 = vpop.permute.xlu2 %3024  ;;  %v7167_v35 = vpop.permute.xlu0 %3400  ;;  %v7177_v36 = vpack.c.b16 %v3087_v50, %v3086_v53  ;;  %v3277_v45 = vrot.slane %v3275_v4, 1  ;;  %v3246_v19 = vrot.slane %v3244_v21, 1  ;;  %v3282_v4 = vrot.slane %v3280_v37, 1 }
 0x2a5   : > { %3014 = vrot.lane.b32.xlu1 %v6988_v33, %s4389_s29  ;;  %v7184_v33 = vsel %vm2270_vm11, %v3362_v34, %v3366_v10  ;;  %v3434_v34 = vrot.slane %v7158_v48, 1  ;;  %v2628_v10 = vunpack.c.l.b16 %v1448_v0  ;;  %v1551_v21 = vsel %vm435_vm9, 0, %v1550_v58  ;;  %v8311_v58 = vld [vmem:[#allocation36_spill] sm:$0xff] }
 0x2a6   : > { %v3278_v27 = vor.u32 %v3277_v45, %v3273_v57  ;;  %v2016_v48 = vrot.slane %v6620_v60, 4  ;;  %v2074_v0 = vrot.slane %v6930_v32, 4  ;;  %v2714_v60 = vunpack.c.l.b16 %v1551_v21 }
 0x2a7   : > { %v7179_v6 = vpop.permute.xlu1 %2485  ;;  %v7213_v57 = vpack.c.b16 %v2629_v40, %v2628_v10  ;;  %v3442_v21 = vrot.slane %v7150_v3, 1 }
 0x2a8   : > { %8310 = vst [vmem:[#allocation41_spill] sm:$0xff] %v7179_v6  ;;  %v3283_v45 = vsel %vm2270_vm11, %v3278_v27, %v3282_v4 }
 0x2a9   : > { %v2859_v40 = vshll.u32 %v7213_v57, 16 }
 0x2aa   : > { %3020 = vrot.lane.b32.xlu2 %v7008_v44, %s4389_s29  ;;  %3126 = vrot.lane.b32.xlu0 %v7141_v56, %s4385_s24  ;;  %v2018_v44 = vrot.slane %v6921_v62, 4  ;;  %v3247_v62 = vsel %vm2270_vm11, %v3242_v18, %v3246_v19  ;;  %v3506_v18 = vsel %vm3504_vm12, %v8311_v58, %v6728_v39  ;;  %v2017_v19 = vsel %vm435_vm9, 0, %v2016_v48  ;;  %v8315_v58 = vld [vmem:[#allocation5_spill] sm:$0xff] }
 0x2ab   : > { %v3092_v48 = vunpack.c.l.b16 %v2017_v19 }
 0x2ac   : > { %v2931_v53 = vpop.permute.xlu2 %2930  ;;  %v2659_v50 = vpop.permute.xlu0 %2658  ;;  %v2019_v23 = vsel %vm435_vm9, 0, %v2018_v44  ;;  %v3093_v44 = vunpack.c.l.b16 %v2073_v1 }
 0x2ad   : > { %v3574_v6 = vsel %vm3570_vm15, %v7055_v9, %v2659_v50  ;;  %3132 = vrot.lane.b32.xlu1 %v7150_v3, %s4385_s24  ;;  %v2119_v9 = vrot.slane %v6628_v8, 4  ;;  %v3433_v8 = vrot.slane %v7141_v56, 1  ;;  %v3443_v56 = vrot.slane %v7161_v17, 1 }
 0x2ae   : > { %v3607_v41 = vsel %vm3603_vm0, %v3574_v6, %v2931_v53  ;;  %v3100_v53 = vunpack.c.l.b16 %v2019_v23  ;;  %v2861_v23 = vrot.slane %v2859_v40, 1 }
 0x2af   : > { %v3011_v37 = vpop.permute.xlu1 %3010  ;;  %v3435_v10 = vsel %vm2495_vm10, %v3433_v8, %v3434_v34  ;;  %v2857_v8 = vshrl.u32 %v7213_v57, 16 }
 0x2b0   : > { %v3640_v43 = vsel %vm3636_vm1, %v3607_v41, %v3011_v37  ;;  %v3539_v41 = vsel %vm3537_vm13, %v3506_v18, %v6557_v13 }
 0x2b1   : > { %v3673_v6 = vsel %vm3669_vm2, %v3640_v43, %v6766_v25  ;;  %v2075_v25 = vsel %vm435_vm9, 0, %v2074_v0  ;;  %v3572_v17 = vsel %vm3570_vm15, %v3539_v41, %v7051_v26  ;;  %v8312_v0 = vld [vmem:[#allocation65_spill] sm:$0xff] }
 0x2b2   : > { %3398 = vrot.lane.b32.xlu2 %v3247_v62, %s4388_s28  ;;  %3404 = vrot.lane.b32.xlu0 %v3283_v45, %s4388_s28  ;;  %v3706_v32 = vsel %vm3702_vm3, %v3673_v6, %v7124_v55  ;;  %v3101_v50 = vunpack.c.l.b16 %v2075_v25  ;;  %v7237_v55 = vpack.c.b16 %v2714_v60, %v2714_v60  ;;  %v3444_v62 = vsel %vm2495_vm10, %v3442_v21, %v3443_v56  ;;  %v8313_v26 = vld [vmem:[#allocation37_spill] sm:$0xff]  ;;  %v8314_v60 = vld [vmem:[#allocation11_spill] sm:$0xff] }
 0x2b3   : > { %v7228_v4 = vsel %vm3735_vm4, %v3706_v32, %v6970_v30  ;;  %v2120_v30 = vsel %vm435_vm9, 0, %v2119_v9  ;;  %v7250_v45 = vpack.c.b16 %v3093_v44, %v3092_v48  ;;  %v1383_v3 = vrot.slane %v8312_v0, 4  ;;  %v8316_v32 = vld [vmem:[#allocation43_spill] sm:$0xff] }
 0x2b4   : > { %v7230_v39 = vpop.permute.xlu2 %3488  ;;  %v7232_v27 = vpop.permute.xlu0 %2477  ;;  %v7241_v52 = vpack.c.b16 %v3101_v50, %v3100_v53  ;;  %v3178_v43 = vunpack.c.l.b16 %v2120_v30  ;;  %v2864_v13 = vshll.u32 %v7237_v55, 16  ;;  %v1327_v1 = vrot.slane %v8314_v60, 4  ;;  %v8317_v50 = vld [vmem:[#allocation34_spill] sm:$0xff]  ;;  %v8318_v30 = vld [vmem:[#allocation7_spill] sm:$0xff] }
 0x2b5   : > { %3478 = vrot.lane.b32.xlu1 %v3435_v10, %s4386_s26  ;;  %v3580_v25 = vsel %vm3570_vm15, %v8316_v32, %v7032_v20  ;;  %v3323_v44 = vshll.u32 %v7250_v45, 16  ;;  %v1384_v20 = vsel %vm435_vm9, 0, %v1383_v3 }
 0x2b6   : > { %v7275_v56 = vpack.c.b16 %v3178_v43, %v3178_v43  ;;  %v2866_v40 = vrot.slane %v2864_v13, 1  ;;  %v1328_v48 = vsel %vm435_vm9, 0, %v1327_v1  ;;  %v2990_v1 = vrot.slane %v7213_v57, 1 }
 0x2b7   : > { %v2929_v34 = vpop.permute.xlu1 %2928  ;;  %v3325_v0 = vrot.slane %v3323_v44, 1 }
 0x2b8   : > { %v3605_v37 = vsel %vm3603_vm0, %v3572_v17, %v2929_v34  ;;  %v8319_v34 = vld [vmem:[#allocation32_spill] sm:$0xff]  ;;  %v3328_v3 = vshll.u32 %v7275_v56, 16  ;;  %v3455_v44 = vrot.slane %v7275_v56, 1  ;;  %v2140_v56 = vrot.slane %v7135_v29, 4 }
 0x2b9   : > { %v3638_v9 = vsel %vm3636_vm1, %v3605_v37, %v7049_v42  ;;  %v3522_v42 = vsel %vm3504_vm12, %v8315_v58, %v6862_v24 }
 0x2ba   : > { %3484 = vrot.lane.b32.xlu2 %v3444_v62, %s4386_s26  ;;  %2676 = vrot.lane.b32.xlu0 %v7213_v57, %s4387_s27  ;;  %v3671_v6 = vsel %vm3669_vm2, %v3638_v9, %v8313_v26  ;;  %v3555_v41 = vsel %vm3537_vm13, %v3522_v42, %v8318_v30  ;;  %v8320_v62 = vld [vmem:[#allocation10_spill] sm:$0xff]  ;;  %v8321_v9 = vld [vmem:[#allocation49_spill] sm:$0xff]  ;;  %v2623_v26 = vunpack.c.l.b16 %v1384_v20  ;;  %v2622_v42 = vunpack.c.l.b16 %v1328_v48 }
 0x2bb   : > { %v3704_v18 = vsel %vm3702_vm3, %v3671_v6, %v7146_v2  ;;  %v2862_v2 = vor.u32 %v2861_v23, %v2857_v8  ;;  %v1421_v43 = vrot.slane %v8320_v62, 4  ;;  %v2121_v23 = vrot.slane %v8321_v9, 4  ;;  %v8322_v6 = vld [vmem:[#allocation33_spill] sm:$0xff] }
 0x2bc   : > { %v7271_v19 = vpop.permute.xlu2 %2932  ;;  %v2937_v53 = vpop.permute.xlu0 %2936  ;;  %v3737_v10 = vsel %vm3735_vm4, %v3704_v18, %v8317_v50  ;;  %v3588_v58 = vsel %vm3570_vm15, %v3555_v41, %v7092_v31  ;;  %v2046_v18 = vrot.slane %v7045_v15, 4  ;;  %v3454_v15 = vrot.slane %v7250_v45, 1 }
 0x2bd   : > { %v3613_v24 = vsel %vm3603_vm0, %v3580_v25, %v2937_v53  ;;  %2682 = vrot.lane.b32.xlu1 %v7087_v16, %s4387_s27  ;;  %4193 = vmatmul.msk.bf16.vlgmr.msra.gmra.mxu0 %vm3788_vm5, %v3737_v10  ;;  %v2991_v16 = vrot.slane %v7237_v55, 1  ;;  %v1477_v55 = vrot.slane %v7058_v5, 4  ;;  %v1422_v5 = vsel %vm435_vm9, 0, %v1421_v43 }
 0x2be   : > { %v3646_v21 = vsel %vm3636_vm1, %v3613_v24, %v7090_v22  ;;  %v2867_v22 = vsel %vm2270_vm11, %v2862_v2, %v2866_v40  ;;  %v2122_v31 = vsel %vm435_vm9, 0, %v2121_v23  ;;  %v3371_v10 = vshll.u32 %v7241_v52, 16 }
 0x2bf   : > { %v2945_v17 = vpop.permute.xlu1 %2944  ;;  %v3679_v37 = vsel %vm3669_vm2, %v3646_v21, %v8319_v34  ;;  %v2992_v57 = vsel %vm2495_vm10, %v2990_v1, %v2991_v16  ;;  %v3182_v50 = vunpack.c.l.b16 %v2122_v31  ;;  %v7319_v24 = vpack.c.b16 %v2623_v26, %v2622_v42 }
 0x2c0   : > { %v3712_v13 = vsel %vm3702_vm3, %v3679_v37, %v7167_v35  ;;  %v3321_v35 = vshrl.u32 %v7250_v45, 16  ;;  %v3621_v8 = vsel %vm3603_vm0, %v3588_v58, %v2945_v17  ;;  %v1478_v2 = vsel %vm435_vm9, 0, %v1477_v55 }
 0x2c1   : > { %v3745_v60 = vsel %vm3735_vm4, %v3712_v13, %v8322_v6  ;;  %v3654_v40 = vsel %vm3636_vm1, %v3621_v8, %v7165_v38  ;;  %v3198_v20 = vpack.c.b16 %v3182_v50, %v3182_v50  ;;  %v3373_v30 = vrot.slane %v3371_v10, 1 }
 0x2c2   : > { %2948 = vrot.lane.b32.xlu2 %v2867_v22, %s4390_s5  ;;  %2954 = vrot.lane.b32.xlu0 %v7144_v49, %s4390_s5  ;;  %v3326_v53 = vor.u32 %v3325_v0, %v3321_v35  ;;  %v3330_v49 = vrot.slane %v3328_v3, 1  ;;  %v2047_v41 = vsel %vm435_vm9, 0, %v2046_v18  ;;  %v1533_v17 = vrot.slane %v7068_v51, 4 }
 0x2c3   : > { %4197 = vmatmul.msk.bf16.vlgmr.msra.gmra.mxu1 %vm3788_vm5, %v3745_v60  ;;  %v2102_v34 = vrot.slane %v7063_v59, 4  ;;  %v3369_v16 = vshrl.u32 %v7241_v52, 16  ;;  %v3376_v62 = vshll.u32 %v3198_v20, 16  ;;  %v2638_v43 = vunpack.c.l.b16 %v1478_v2 }
 0x2c4   : > { %v7313_v32 = vpop.permute.xlu2 %3018  ;;  %v3137_v25 = vpop.permute.xlu0 %3136  ;;  %v3466_v9 = vrot.slane %v7241_v52, 1  ;;  %v3467_v23 = vrot.slane %v3198_v20, 1  ;;  %v1534_v13 = vsel %vm435_vm9, 0, %v1533_v17  ;;  %v1571_v0 = vrot.slane %v7097_v7, 4 }
 0x2c5   : > { %3028 = vrot.lane.b32.xlu1 %v2992_v57, %s4389_s29  ;;  %v3687_v21 = vsel %vm3669_vm2, %v3654_v40, %v3137_v25  ;;  %v3374_v59 = vor.u32 %v3373_v30, %v3369_v16  ;;  %v3378_v51 = vrot.slane %v3376_v62, 1  ;;  %v2639_v29 = vunpack.c.l.b16 %v1534_v13 }
 0x2c6   : > { %v2711_v3 = vunpack.c.l.b16 %v1422_v5  ;;  %v2103_v26 = vsel %vm435_vm9, 0, %v2102_v34  ;;  %v2141_v22 = vsel %vm435_vm9, 0, %v2140_v56  ;;  %v1572_v55 = vsel %vm435_vm9, 0, %v1571_v0 }
 0x2c7   : > { %v3409_v48 = vpop.permute.xlu1 %3408  ;;  %v7352_v1 = vsel %vm2270_vm11, %v3374_v59, %v3378_v51  ;;  %v7354_v7 = vpack.c.b16 %v2639_v29, %v2638_v43  ;;  %v2719_v58 = vunpack.c.l.b16 %v1572_v55  ;;  %v3102_v35 = vunpack.c.l.b16 %v2047_v41  ;;  %v8324_v51 = vld [vmem:[#allocation14_spill] sm:$0xff] }
 0x2c8   : > { %v3720_v37 = vsel %vm3702_vm3, %v3687_v21, %v3409_v48  ;;  %v3103_v42 = vunpack.c.l.b16 %v2103_v26  ;;  %v3183_v18 = vunpack.c.l.b16 %v2141_v22  ;;  %v3331_v8 = vsel %vm2270_vm11, %v3326_v53, %v3330_v49 }
 0x2c9   : > { %v3753_v38 = vsel %vm3735_vm4, %v3720_v37, %v7230_v39  ;;  %v7342_v39 = vsel %vm2495_vm10, %v3466_v9, %v3467_v23  ;;  %v3456_v57 = vsel %vm2495_vm10, %v3454_v15, %v3455_v44  ;;  %v2919_v5 = vshll.u32 %v7354_v7, 16 }
 0x2ca   : > { %3034 = vrot.lane.b32.xlu2 %v7132_v12, %s4389_s29  ;;  %3140 = vrot.lane.b32.xlu0 %v7250_v45, %s4385_s24  ;;  %v8323_v45 = vld [vmem:[#allocation74_spill] sm:$0xff]  ;;  %v7366_v25 = vpack.c.b16 %v2711_v3, %v2711_v3  ;;  %v2735_v50 = vpack.c.b16 %v2719_v58, %v2719_v58  ;;  %v7368_v10 = vpack.c.b16 %v3103_v42, %v3102_v35  ;;  %v2917_v40 = vshrl.u32 %v7354_v7, 16 }
 0x2cb   : > { %4201 = vmatmul.msk.bf16.vlgmr.msra.gmra.mxu2 %vm3788_vm5, %v3753_v38  ;;  %v1990_v60 = vrot.slane %v8323_v45, 4  ;;  %v2921_v20 = vrot.slane %v2919_v5, 1  ;;  %v3005_v49 = vrot.slane %v7354_v7, 1  ;;  %v1531_v29 = vrot.slane %v8324_v51, 4  ;;  %v8326_v58 = vld [vmem:[#allocation54_spill] sm:$0xff] }
 0x2cc   : > { %v7346_v6 = vpop.permute.xlu2 %3396  ;;  %v7348_v12 = vpop.permute.xlu0 %2660  ;;  %v2924_v53 = vshll.u32 %v2735_v50, 16  ;;  %v3006_v15 = vrot.slane %v2735_v50, 1  ;;  %v3383_v44 = vshll.u32 %v7368_v10, 16  ;;  %v3381_v30 = vshrl.u32 %v7368_v10, 16  ;;  %v8328_v50 = vld [vmem:[#allocation8_spill] sm:$0xff] }
 0x2cd   : > { %3146 = vrot.lane.b32.xlu1 %v7077_v14, %s4385_s24  ;;  %4194 = vmatmul.msk.bf16.gmra.mxu0 %vm3788_vm5, %v7228_v4  ;;  %v3199_v14 = vpack.c.b16 %v3183_v18, %v3183_v18  ;;  %v2823_v4 = vshll.u32 %v7319_v24, 16  ;;  %v1991_v2 = vsel %vm435_vm9, 0, %v1990_v60  ;;  %v3469_v21 = vrot.slane %v7368_v10, 1  ;;  %v8325_v60 = vld [vmem:[#allocation68_spill] sm:$0xff]  ;;  %v8327_v18 = vld [vmem:[#allocation15_spill] sm:$0xff] }
 0x2ce   : > { %v2922_v17 = vor.u32 %v2921_v20, %v2917_v40  ;;  %v2926_v34 = vrot.slane %v2924_v53, 1  ;;  %v7381_v56 = vsel %vm2495_vm10, %v3005_v49, %v3006_v15  ;;  %v3385_v37 = vrot.slane %v3383_v44, 1  ;;  %v8330_v40 = vld [vmem:[#allocation28_spill] sm:$0xff]  ;;  %v8331_v53 = vld [vmem:[#allocation70_spill] sm:$0xff] }
 0x2cf   : > { %v7364_v31 = vpop.permute.xlu1 %2666  ;;  %v3388_v41 = vshll.u32 %v3199_v14, 16  ;;  %v3470_v48 = vrot.slane %v3199_v14, 1  ;;  %v2828_v43 = vshll.u32 %v7366_v25, 16  ;;  %v3175_v38 = vunpack.c.l.b16 %v1991_v2 }
 0x2d0   : > { %v7391_v23 = vsel %vm2270_vm11, %v2922_v17, %v2926_v34  ;;  %v3386_v13 = vor.u32 %v3385_v37, %v3381_v30  ;;  %v2825_v59 = vrot.slane %v2823_v4, 1  ;;  %v2821_v3 = vshrl.u32 %v7319_v24, 16  ;;  %v8329_v4 = vld [vmem:[#allocation62_spill] sm:$0xff] }
 0x2d1   : > { %v3390_v9 = vrot.slane %v3388_v41, 1  ;;  %v2830_v22 = vrot.slane %v2828_v43, 1  ;;  %v7398_v45 = vpack.c.b16 %v3175_v38, %v3175_v38  ;;  %v1475_v55 = vrot.slane %v8325_v60, 4  ;;  %v8333_v43 = vld [vmem:[#allocation13_spill] sm:$0xff] }
 0x2d2   : > { %3412 = vrot.lane.b32.xlu2 %v3331_v8, %s4388_s28  ;;  %3418 = vrot.lane.b32.xlu0 %v7184_v33, %s4388_s28  ;;  %v7387_v33 = vsel %vm2495_vm10, %v3469_v21, %v3470_v48  ;;  %v1505_v35 = vrot.slane %v8326_v58, 4  ;;  %v3287_v42 = vshll.u32 %v7177_v36, 16  ;;  %v1449_v8 = vrot.slane %v8327_v18, 4 }
 0x2d3   : > { %v7396_v26 = vsel %vm2270_vm11, %v3386_v13, %v3390_v9  ;;  %v1532_v5 = vsel %vm435_vm9, 0, %v1531_v29  ;;  %v1569_v14 = vrot.slane %v8328_v50, 4  ;;  %v1552_v2 = vrot.slane %v8329_v4, 4 }
 0x2d4   : > { %v7383_v16 = vpop.permute.xlu2 %3482  ;;  %v2939_v62 = vpop.permute.xlu0 %2938  ;;  %v3516_v20 = vsel %vm3504_vm12, %v8330_v40, %v7010_v47  ;;  %v3510_v49 = vsel %vm3504_vm12, %v8331_v53, %v7073_v63  ;;  %v3292_v41 = vshll.u32 %v7398_v45, 16  ;;  %v1476_v21 = vsel %vm435_vm9, 0, %v1475_v55 }
 0x2d5   : > { %3492 = vrot.lane.b32.xlu1 %v3456_v57, %s4386_s26  ;;  %v2826_v57 = vor.u32 %v2825_v59, %v2821_v3  ;;  %v1506_v48 = vsel %vm435_vm9, 0, %v1505_v35  ;;  %v2981_v47 = vrot.slane %v7319_v24, 1  ;;  %v3289_v17 = vrot.slane %v3287_v42, 1 }
 0x2d6   : > { %v2631_v34 = vunpack.c.l.b16 %v1532_v5  ;;  %v1450_v63 = vsel %vm435_vm9, 0, %v1449_v8  ;;  %v3549_v38 = vsel %vm3537_vm13, %v3516_v20, %v8333_v43  ;;  %v1570_v9 = vsel %vm435_vm9, 0, %v1569_v14  ;;  %v8334_v20 = vld [vmem:[#allocation19_spill] sm:$0xff] }
 0x2d7   : > { %v3013_v0 = vpop.permute.xlu1 %3012  ;;  %v2831_v30 = vsel %vm2270_vm11, %v2826_v57, %v2830_v22  ;;  %v1553_v13 = vsel %vm435_vm9, 0, %v1552_v2  ;;  %v2630_v29 = vunpack.c.l.b16 %v1476_v21  ;;  %v2637_v3 = vunpack.c.l.b16 %v1506_v48 }
 0x2d8   : > { %v3285_v55 = vshrl.u32 %v7177_v36, 16  ;;  %v3294_v58 = vrot.slane %v3292_v41, 1  ;;  %v2636_v42 = vunpack.c.l.b16 %v1450_v63  ;;  %v2715_v18 = vunpack.c.l.b16 %v1570_v9 }
 0x2d9   : > { %v7440_v35 = vpack.c.b16 %v2631_v34, %v2630_v29  ;;  %v2718_v8 = vunpack.c.l.b16 %v1553_v13  ;;  %v3446_v5 = vrot.slane %v7398_v45, 1  ;;  %v2100_v53 = vrot.slane %v8334_v20, 4 }
 0x2da   : > { %3498 = vrot.lane.b32.xlu2 %v7174_v46, %s4386_s26  ;;  %2670 = vrot.lane.b32.xlu0 %v7319_v24, %s4387_s27  ;;  %v2982_v46 = vrot.slane %v7366_v25, 1  ;;  %v8332_v25 = vld [vmem:[#allocation25_spill] sm:$0xff]  ;;  %v3582_v24 = vsel %vm3570_vm15, %v3549_v38, %v7364_v31  ;;  %v3290_v31 = vor.u32 %v3289_v17, %v3285_v55  ;;  %v7451_v50 = vpack.c.b16 %v2637_v3, %v2636_v42 }
 0x2db   : > { %v3543_v37 = vsel %vm3537_vm13, %v3510_v49, %v8332_v25  ;;  %v3615_v22 = vsel %vm3603_vm0, %v3582_v24, %v2939_v62  ;;  %v2871_v45 = vshll.u32 %v7440_v35, 16  ;;  %v2734_v49 = vpack.c.b16 %v2718_v8, %v2718_v8 }
 0x2dc   : > { %v7418_v15 = vpop.permute.xlu2 %2946  ;;  %v3125_v44 = vpop.permute.xlu0 %3124  ;;  %v3576_v59 = vsel %vm3570_vm15, %v3543_v37, %v7348_v12  ;;  %v2983_v60 = vsel %vm2495_vm10, %v2981_v47, %v2982_v46  ;;  %v3648_v57 = vsel %vm3636_vm1, %v3615_v22, %v7313_v32  ;;  %v3295_v40 = vsel %vm2270_vm11, %v3290_v31, %v3294_v58 }
 0x2dd   : > { %2942 = vrot.lane.b32.xlu1 %v2831_v30, %s4390_s5  ;;  %v3609_v12 = vsel %vm3603_vm0, %v3576_v59, %v7271_v19  ;;  %v2731_v32 = vpack.c.b16 %v2715_v18, %v2715_v18  ;;  %v2907_v21 = vshll.u32 %v7451_v50, 16  ;;  %v2044_v17 = vrot.slane %v6984_v11, 4 }
 0x2de   : > { %v3642_v62 = vsel %vm3636_vm1, %v3609_v12, %v3013_v0  ;;  %v2873_v34 = vrot.slane %v2871_v45, 1  ;;  %v2912_v63 = vshll.u32 %v2734_v49, 16  ;;  %v2869_v25 = vshrl.u32 %v7440_v35, 16  ;;  %v8337_v45 = vld [vmem:[#allocation58_spill] sm:$0xff] }
 0x2df   : > { %v3131_v51 = vpop.permute.xlu1 %3130  ;;  %v3675_v14 = vsel %vm3669_vm2, %v3642_v62, %v3125_v44  ;;  %v3445_v44 = vrot.slane %v7177_v36, 1  ;;  %v2909_v37 = vrot.slane %v2907_v21, 1  ;;  %v2045_v38 = vsel %vm435_vm9, 0, %v2044_v17  ;;  %v8340_v17 = vld [vmem:[#allocation29_spill] sm:$0xff] }
 0x2e0   : > { %v3681_v4 = vsel %vm3669_vm2, %v3648_v57, %v3131_v51  ;;  %v3708_v41 = vsel %vm3702_vm3, %v3675_v14, %v7346_v6  ;;  %v2138_v6 = vrot.slane %v6995_v54, 4  ;;  %v2874_v13 = vor.u32 %v2873_v34, %v2869_v25 }
 0x2e1   : > { %v3447_v48 = vsel %vm2495_vm10, %v3445_v44, %v3446_v5  ;;  %v2905_v24 = vshrl.u32 %v7451_v50, 16  ;;  %v2914_v51 = vrot.slane %v2912_v63, 1  ;;  %v3094_v22 = vunpack.c.l.b16 %v2045_v38 }
 0x2e2   : > { %3022 = vrot.lane.b32.xlu2 %v2983_v60, %s4389_s29  ;;  %3134 = vrot.lane.b32.xlu0 %v7177_v36, %s4385_s24  ;;  %v2101_v36 = vsel %vm435_vm9, 0, %v2100_v53  ;;  %v2139_v29 = vsel %vm435_vm9, 0, %v2138_v6  ;;  %v2994_v60 = vrot.slane %v2731_v32, 1  ;;  %v2993_v8 = vrot.slane %v7440_v35, 1 }
 0x2e3   : > { %v3095_v9 = vunpack.c.l.b16 %v2101_v36  ;;  %v2910_v3 = vor.u32 %v2909_v37, %v2905_v24  ;;  %v3179_v18 = vunpack.c.l.b16 %v2139_v29  ;;  %v3003_v57 = vrot.slane %v2734_v49, 1 }
 0x2e4   : > { %v7455_v19 = vpop.permute.xlu2 %3032  ;;  %v3403_v2 = vpop.permute.xlu0 %3402  ;;  %v2995_v62 = vsel %vm2495_vm10, %v2993_v8, %v2994_v60  ;;  %v8342_v60 = vld [vmem:[#allocation50_spill] sm:$0xff] }
 0x2e5   : > { %v3714_v0 = vsel %vm3702_vm3, %v3681_v4, %v3403_v2  ;;  %3406 = vrot.lane.b32.xlu1 %v3295_v40, %s4388_s28  ;;  %v2915_v58 = vsel %vm2270_vm11, %v2910_v3, %v2914_v51  ;;  %v3115_v42 = vpack.c.b16 %v3095_v9, %v3094_v22  ;;  %v3195_v5 = vpack.c.b16 %v3179_v18, %v3179_v18 }
 0x2e6   : > { %v3747_v46 = vsel %vm3735_vm4, %v3714_v0, %v7383_v16  ;;  %v2876_v16 = vshll.u32 %v2731_v32, 16  ;;  %v3002_v2 = vrot.slane %v7451_v50, 1  ;;  %v8336_v0 = vld [vmem:[#allocation52_spill] sm:$0xff] }
 0x2e7   : > { %v3477_v30 = vpop.permute.xlu1 %3476  ;;  %4198 = vmatmul.msk.bf16.gmra.mxu1 %vm3788_vm5, %v3747_v46  ;;  %v3335_v14 = vshll.u32 %v3115_v42, 16  ;;  %v3340_v53 = vshll.u32 %v3195_v5, 16  ;;  %v8338_v46 = vld [vmem:[#allocation66_spill] sm:$0xff]  ;;  %v3333_v44 = vshrl.u32 %v3115_v42, 16  ;;  %v3458_v25 = vrot.slane %v3195_v5, 1  ;;  %v8346_v5 = vld [vmem:[#allocation69_spill] sm:$0xff] }
 0x2e8   : > { %v3741_v47 = vsel %vm3735_vm4, %v3708_v41, %v3477_v30  ;;  %v2878_v59 = vrot.slane %v2876_v16, 1  ;;  %v3004_v40 = vsel %vm2495_vm10, %v3002_v2, %v3003_v57  ;;  %v3524_v49 = vsel %vm3504_vm12, %v8338_v46, %v8337_v45  ;;  %v8347_v2 = vld [vmem:[#allocation27_spill] sm:$0xff] }
 0x2e9   : > { %4195 = vmatmul.msk.bf16.gmra.mxu0 %vm3788_vm5, %v3741_v47  ;;  %v3337_v20 = vrot.slane %v3335_v14, 1  ;;  %v3342_v21 = vrot.slane %v3340_v53, 1  ;;  %v3457_v38 = vrot.slane %v3115_v42, 1 }
 0x2ea   : > { %3486 = vrot.lane.b32.xlu2 %v3447_v48, %s4386_s26  ;;  %2678 = vrot.lane.b32.xlu0 %v7440_v35, %s4387_s27  ;;  %v2879_v55 = vsel %vm2270_vm11, %v2874_v13, %v2878_v59  ;;  %v8335_v35 = vld [vmem:[#allocation75_spill] sm:$0xff]  ;;  %v8339_v48 = vld [vmem:[#allocation12_spill] sm:$0xff] }
 0x2eb   : > { %v3530_v32 = vsel %vm3504_vm12, %v8336_v0, %v8335_v35  ;;  %v3557_v47 = vsel %vm3537_vm13, %v3524_v49, %v8339_v48  ;;  %v3459_v29 = vsel %vm2495_vm10, %v3457_v38, %v3458_v25 }
 0x2ec   : > { %v7479_v43 = vpop.permute.xlu2 %3410  ;;  %v2675_v11 = vpop.permute.xlu0 %2674  ;;  %v3563_v34 = vsel %vm3537_vm13, %v3530_v32, %v8340_v17 }
 0x2ed   : > { %2684 = vrot.lane.b32.xlu1 %v7451_v50, %s4387_s27  ;;  %v3338_v50 = vor.u32 %v3337_v20, %v3333_v44  ;;  %v3590_v16 = vsel %vm3570_vm15, %v3557_v47, %v2675_v11 }
 0x2ef   : > { %v2681_v54 = vpop.permute.xlu1 %2680  ;;  %v3343_v37 = vsel %vm2270_vm11, %v3338_v50, %v3342_v21 }
 0x2f0   : > { %v3596_v63 = vsel %vm3570_vm15, %v3563_v34, %v2681_v54  ;;  %v8341_v54 = vld [vmem:[#allocation71_spill] sm:$0xff] }
 0x2f2   : > { %2950 = vrot.lane.b32.xlu2 %v2879_v55, %s4390_s5  ;;  %2956 = vrot.lane.b32.xlu0 %v2915_v58, %s4390_s5  ;;  %v2542_v55 = vrot.slane %v8342_v60, 1 }
 0x2f4   : > { %v3497_v12 = vpop.permute.xlu2 %3496  ;;  %v2953_v31 = vpop.permute.xlu0 %2952 }
 0x2f5   : > { %3030 = vrot.lane.b32.xlu1 %v2995_v62, %s4389_s29  ;;  %v3629_v6 = vsel %vm3603_vm0, %v3596_v63, %v2953_v31  ;;  %v8344_v62 = vld [vmem:[#allocation31_spill] sm:$0xff] }
 0x2f6   : > { %v3662_v11 = vsel %vm3636_vm1, %v3629_v6, %v7455_v19  ;;  %v8349_v6 = vld [vmem:[#allocation44_spill] sm:$0xff] }
 0x2f7   : > { %v3027_v4 = vpop.permute.xlu1 %3026  ;;  %v3532_v25 = vsel %vm3504_vm12, %v8349_v6, %v7024_v61 }
 0x2fa   : > { %3036 = vrot.lane.b32.xlu2 %v3004_v40, %s4389_s29  ;;  %3142 = vrot.lane.b32.xlu0 %v3115_v42, %s4385_s24  ;;  %v8348_v40 = vld [vmem:[#allocation4_spill] sm:$0xff] }
 0x2fc   : > { %v2935_v30 = vpop.permute.xlu2 %2934  ;;  %v3139_v41 = vpop.permute.xlu0 %3138 }
 0x2fd   : > { %3148 = vrot.lane.b32.xlu1 %v7241_v52, %s4385_s24  ;;  %v3623_v52 = vsel %vm3603_vm0, %v3590_v16, %v7418_v15 }
 0x2fe   : > { %v3656_v9 = vsel %vm3636_vm1, %v3623_v52, %v3027_v4 }
 0x2ff   : > { %v3145_v36 = vpop.permute.xlu1 %3144  ;;  %v3689_v13 = vsel %vm3669_vm2, %v3656_v9, %v3139_v41 }
 0x300   : > { %v3695_v59 = vsel %vm3669_vm2, %v3662_v11, %v3145_v36  ;;  %v3722_v19 = vsel %vm3702_vm3, %v3689_v13, %v7479_v43  ;;  %v8351_v13 = vld [vmem:[#allocation3_spill] sm:$0xff] }
 0x302   : > { %3414 = vrot.lane.b32.xlu2 %v3343_v37, %s4388_s28  ;;  %3420 = vrot.lane.b32.xlu0 %v7352_v1, %s4388_s28  ;;  %v2541_v1 = vrot.slane %v8341_v54, 1  ;;  %v8350_v37 = vld [vmem:[#allocation17_spill] sm:$0xff] }
 0x303   : > { %v3526_v52 = vsel %vm3504_vm12, %v8350_v37, %v7126_v28 }
 0x304   : > { %v3021_v24 = vpop.permute.xlu2 %3020  ;;  %v3417_v51 = vpop.permute.xlu0 %3416  ;;  %v2543_v42 = vsel %vm2495_vm10, %v2541_v1, %v2542_v55 }
 0x305   : > { %v3728_v15 = vsel %vm3702_vm3, %v3695_v59, %v3417_v51  ;;  %3494 = vrot.lane.b32.xlu1 %v3459_v29, %s4386_s26  ;;  %v3559_v59 = vsel %vm3537_vm13, %v3526_v52, %v8351_v13 }
 0x306   : > { %v3761_v3 = vsel %vm3735_vm4, %v3728_v15, %v3497_v12 }
 0x307   : > { %v3491_v22 = vpop.permute.xlu1 %3490  ;;  %4205 = vmatmul.msk.bf16.vlgmr.msra.gmra.mxu3 %vm3788_vm5, %v3761_v3 }
 0x308   : > { %v3755_v58 = vsel %vm3735_vm4, %v3722_v19, %v3491_v22 }
 0x309   : > { %4202 = vmatmul.msk.bf16.gmra.mxu2 %vm3788_vm5, %v3755_v58 }
 0x30a   : > { %3500 = vrot.lane.b32.xlu2 %v7342_v39, %s4386_s26  ;;  %2574 = vrot.lane.b32.xlu0 %v2543_v42, %s4384_s23 }
 0x30c   : > { %v3399_v18 = vpop.permute.xlu2 %3398  ;;  %v2663_v8 = vpop.permute.xlu0 %2662 }
 0x30d   : > { %2686 = vrot.lane.b32.xlu1 %v7354_v7, %s4387_s27  ;;  %v8343_v7 = vld [vmem:[#allocation40_spill] sm:$0xff] }
 0x30e   : > { %v3518_v57 = vsel %vm3504_vm12, %v8344_v62, %v8343_v7 }
 0x30f   : > { %v2669_v12 = vpop.permute.xlu1 %2668  ;;  %v3551_v20 = vsel %vm3537_vm13, %v3518_v57, %v8348_v40 }
 0x312   : > { %2958 = vrot.lane.b32.xlu2 %v7391_v23, %s4390_s5  ;;  %3038 = vrot.lane.b32.xlu0 %v7381_v56, %s4389_s29  ;;  %v8345_v23 = vld [vmem:[#allocation53_spill] sm:$0xff] }
 0x313   : > { %v3512_v56 = vsel %vm3504_vm12, %v8346_v5, %v8345_v23 }
 0x314   : > { %v3485_v43 = vpop.permute.xlu2 %3484  ;;  %v2941_v31 = vpop.permute.xlu0 %2940 }
 0x315   : > { %3150 = vrot.lane.b32.xlu1 %v7368_v10, %s4385_s24  ;;  %v3545_v10 = vsel %vm3537_vm13, %v3512_v56, %v8347_v2 }
 0x317   : > { %v3015_v39 = vpop.permute.xlu1 %3014 }
 0x31a   : > { %3422 = vrot.lane.b32.xlu2 %v7396_v26, %s4388_s28  ;;  %3502 = vrot.lane.b32.xlu0 %v7387_v33, %s4386_s26  ;;  %v3578_v26 = vsel %vm3570_vm15, %v3545_v10, %v2663_v8  ;;  %v3584_v33 = vsel %vm3570_vm15, %v3551_v20, %v2669_v12 }
 0x31b   : > { %v3617_v35 = vsel %vm3603_vm0, %v3584_v33, %v2941_v31  ;;  %v3611_v0 = vsel %vm3603_vm0, %v3578_v26, %v2935_v30  ;;  %v8353_v26 = vld [vmem:[#allocation47_spill] sm:$0xff] }
 0x31c   : > { %v2949_v14 = vpop.permute.xlu2 %2948  ;;  %v3127_v4 = vpop.permute.xlu0 %3126  ;;  %v3644_v32 = vsel %vm3636_vm1, %v3611_v0, %v3015_v39  ;;  %v3650_v45 = vsel %vm3636_vm1, %v3617_v35, %v3021_v24  ;;  %v8352_v24 = vld [vmem:[#allocation80_spill] sm:$0xff]  ;;  %v3520_v33 = vsel %vm3504_vm12, %v8353_v26, %v7232_v27 }
 0x31d   : > { %v3677_v46 = vsel %vm3669_vm2, %v3644_v32, %v3127_v4  ;;  %v3565_v51 = vsel %vm3537_vm13, %v3532_v25, %v8352_v24  ;;  %v8354_v32 = vld [vmem:[#allocation30_spill] sm:$0xff] }
 0x31e   : > { %v3710_v47 = vsel %vm3702_vm3, %v3677_v46, %v3399_v18 }
 0x31f   : > { %v3133_v53 = vpop.permute.xlu1 %3132 }
 0x320   : > { %v3683_v49 = vsel %vm3669_vm2, %v3650_v45, %v3133_v53  ;;  %v3553_v45 = vsel %vm3537_vm13, %v3520_v33, %v8354_v32 }
 0x324   : > { %v3405_v44 = vpop.permute.xlu0 %3404  ;;  %v3035_v50 = vpop.permute.xlu2 %3034 }
 0x325   : > { %v3716_v41 = vsel %vm3702_vm3, %v3683_v49, %v3405_v44 }
 0x326   : > { %v3749_v21 = vsel %vm3735_vm4, %v3716_v41, %v3485_v43 }
 0x327   : > { %v3479_v48 = vpop.permute.xlu1 %3478  ;;  %4199 = vmatmul.msk.bf16.gmra.mxu1 %vm3788_vm5, %v3749_v21 }
 0x328   : > { %v3743_v30 = vsel %vm3735_vm4, %v3710_v47, %v3479_v48 }
 0x329   : > { %4196 = vmatmul.msk.bf16.gmra.mxu0 %vm3788_vm5, %v3743_v30 }
 0x32c   : > { %v2677_v17 = vpop.permute.xlu0 %2676  ;;  %v3413_v16 = vpop.permute.xlu2 %3412 }
 0x32d   : > { %v3592_v29 = vsel %vm3570_vm15, %v3559_v59, %v2677_v17 }
 0x32e   : > { %v3625_v28 = vsel %vm3603_vm0, %v3592_v29, %v2949_v14  ;;  %v8355_v29 = vld [vmem:[#allocation77_spill] sm:$0xff] }
 0x32f   : > { %v2683_v34 = vpop.permute.xlu1 %2682 }
 0x330   : > { %v3598_v15 = vsel %vm3570_vm15, %v3565_v51, %v2683_v34 }
 0x334   : > { %v2955_v63 = vpop.permute.xlu0 %2954  ;;  %v3499_v38 = vpop.permute.xlu2 %3498 }
 0x335   : > { %v3631_v61 = vsel %vm3603_vm0, %v3598_v15, %v2955_v63  ;;  %v8356_v15 = vld [vmem:[#allocation6_spill] sm:$0xff] }
 0x336   : > { %v3664_v19 = vsel %vm3636_vm1, %v3631_v61, %v3035_v50  ;;  %v3534_v61 = vsel %vm3504_vm12, %v8356_v15, %v8355_v29 }
 0x337   : > { %v3029_v36 = vpop.permute.xlu1 %3028 }
 0x338   : > { %v3658_v22 = vsel %vm3636_vm1, %v3625_v28, %v3029_v36  ;;  %v8358_v28 = vld [vmem:[#allocation72_spill] sm:$0xff] }
 0x33a   : > { %v3834_v9 = vpop.f32.mrf.mxu0 }
 0x33b   : > { %v4019_v55 = vmul.f32 %v3834_v9, %v3834_v9 }
 0x33c   : > { %v3141_v11 = vpop.permute.xlu0 %3140  ;;  %v3023_v8 = vpop.permute.xlu2 %3022 }
 0x33d   : > { %v3691_v12 = vsel %vm3669_vm2, %v3658_v22, %v3141_v11 }
 0x33e   : > { %v3724_v23 = vsel %vm3702_vm3, %v3691_v12, %v3413_v16 }
 0x33f   : > { %v3147_v1 = vpop.permute.xlu1 %3146 }
 0x340   : > { %v7587_v3 = vpop.f32.mrf.mxu1  ;;  %v3697_v43 = vsel %vm3669_vm2, %v3664_v19, %v3147_v1  ;;  %v8357_v1 = vld [vmem:[#allocation41_spill] sm:$0xff] }
 0x341   : > { %v3528_v22 = vsel %vm3504_vm12, %v8358_v28, %v8357_v1 }
 0x342   : > { %v3836_v60 = vpop.f32.mrf.mxu0 }
 0x343   : > { %v4218_v58 = vpack.c.bf16 %v3836_v60, %v3834_v9  ;;  %v3979_v42 = vadd.f32 %v3836_v60, %v3834_v9  ;;  %v4020_v18 = vmul.f32 %v3836_v60, %v3836_v60 }
 0x344   : > { %v3419_v31 = vpop.permute.xlu0 %3418  ;;  %v3487_v53 = vpop.permute.xlu2 %3486 }
 0x345   : > { %4219 = vst [vmem:[%s4430_s25] sm:$0xff] %v4218_v58   ;;  %v4051_v39 = vadd.f32 %v4020_v18, %v4019_v55  ;;  %v3730_v7 = vsel %vm3702_vm3, %v3697_v43, %v3419_v31 }
 0x346   : > { %v3763_v62 = vsel %vm3735_vm4, %v3730_v7, %v3499_v38 }
 0x347   : > { %v3493_v57 = vpop.permute.xlu1 %3492  ;;  %4206 = vmatmul.msk.bf16.gmra.mxu3 %vm3788_vm5, %v3763_v62 }
 0x348   : > { %v7599_v5 = vpop.f32.mrf.mxu1  ;;  %v3757_v56 = vsel %vm3735_vm4, %v3724_v23, %v3493_v57 }
 0x349   : > { %v4238_v14 = vpack.c.bf16 %v7599_v5, %v7587_v3  ;;  %4203 = vmatmul.msk.bf16.gmra.mxu2 %vm3788_vm5, %v3757_v56 }
 0x34a   : > { %v3839_v4 = vpop.f32.mrf.mxu0 }
 0x34b   : > { %4298 = vst [vmem:[%s4430_s25 + $0x20] sm:$0xff] %v4238_v14   ;;  %v3980_v2 = vadd.f32 %v3979_v42, %v3839_v4  ;;  %v4021_v10 = vmul.f32 %v3839_v4, %v3839_v4  ;;  %v8359_v42 = vld [vmem:[#allocation78_spill] sm:$0xff] }
 0x34c   : > { %v2671_v40 = vpop.permute.xlu0 %2670  ;;  %v2951_v63 = vpop.permute.xlu2 %2950  ;;  %v3561_v18 = vsel %vm3537_vm13, %v3528_v22, %v8359_v42  ;;  %v4027_v42 = vmul.f32 %v7587_v3, %v7587_v3 }
 0x34d   : > { %v4052_v20 = vadd.f32 %v4051_v39, %v4021_v10  ;;  %v3586_v46 = vsel %vm3570_vm15, %v3553_v45, %v2671_v40 }
 0x34e   : > { %v7609_v35 = vpop.f32.mrf.mxu2 }
 0x34f   : > { %v2943_v0 = vpop.permute.xlu1 %2942 }
 0x350   : > { %v3619_v44 = vsel %vm3603_vm0, %v3586_v46, %v2943_v0 }
 0x351   : > { %v3652_v27 = vsel %vm3636_vm1, %v3619_v44, %v3023_v8  ;;  %v8360_v8 = vld [vmem:[#allocation21_spill] sm:$0xff] }
 0x352   : > { %v3841_v49 = vpop.f32.mrf.mxu0  ;;  %v3567_v12 = vsel %vm3537_vm13, %v3534_v61, %v8360_v8 }
 0x353   : > { %v4223_v41 = vpack.c.bf16 %v3841_v49, %v3839_v4  ;;  %v3981_v50 = vadd.f32 %v3980_v2, %v3841_v49  ;;  %v4022_v21 = vmul.f32 %v3841_v49, %v3841_v49 }
 0x354   : > { %v3135_v48 = vpop.permute.xlu0 %3134  ;;  %v3037_v52 = vpop.permute.xlu2 %3036 }
 0x355   : > { %4295 = vst [vmem:[%s4430_s25 + $0x8] sm:$0xff] %v4223_v41   ;;  %v4053_v47 = vadd.f32 %v4052_v20, %v4022_v21  ;;  %v3685_v17 = vsel %vm3669_vm2, %v3652_v27, %v3135_v48 }
 0x356   : > { %v7617_v30 = vpop.f32.mrf.mxu2 }
 0x357   : > { %v4258_v34 = vpack.c.bf16 %v7617_v30, %v7609_v35  ;;  %v3407_v16 = vpop.permute.xlu1 %3406 }
 0x358   : > { %v3718_v36 = vsel %vm3702_vm3, %v3685_v17, %v3407_v16 }
 0x359   : > { %4302 = vst [vmem:[%s4430_s25 + $0x40] sm:$0xff] %v4258_v34   ;;  %v3751_v6 = vsel %vm3735_vm4, %v3718_v36, %v3487_v53 }
 0x35a   : > { %4200 = vmatmul.msk.bf16.gmra.mxu1 %vm3788_vm5, %v3751_v6 }
 0x35c   : > { %v2679_v25 = vpop.permute.xlu0 %2678  ;;  %v3415_v19 = vpop.permute.xlu2 %3414 }
 0x35d   : > { %v3594_v31 = vsel %vm3570_vm15, %v3561_v18, %v2679_v25 }
 0x35e   : > { %v3627_v4 = vsel %vm3603_vm0, %v3594_v31, %v2951_v63 }
 0x35f   : > { %v2685_v37 = vpop.permute.xlu1 %2684 }
 0x360   : > { %v3600_v23 = vsel %vm3570_vm15, %v3567_v12, %v2685_v37  ;;  %v4028_v12 = vmul.f32 %v7599_v5, %v7599_v5 }
 0x364   : > { %v7626_v38 = vpop.f32.mrf.mxu1  ;;  %v2957_v9 = vpop.permute.xlu0 %2956 }
 0x365   : > { %v3633_v56 = vsel %vm3603_vm0, %v3600_v23, %v2957_v9  ;;  %v3501_v33 = vpop.permute.xlu2 %3500 }
 0x366   : > { %v3844_v11 = vpop.f32.mrf.mxu0  ;;  %v3666_v40 = vsel %vm3636_vm1, %v3633_v56, %v3037_v52 }
 0x367   : > { %v3982_v13 = vadd.f32 %v3981_v50, %v3844_v11  ;;  %v4023_v59 = vmul.f32 %v3844_v11, %v3844_v11  ;;  %v3031_v24 = vpop.permute.xlu1 %3030  ;;  %v8361_v50 = vld [vmem:[#allocation63_spill] sm:$0xff] }
 0x368   : > { %v3660_v2 = vsel %vm3636_vm1, %v3627_v4, %v3031_v24  ;;  %v3536_v21 = vsel %vm3504_vm12, %v8341_v54, %v8361_v50 }
 0x369   : > { %v4054_v51 = vadd.f32 %v4053_v47, %v4023_v59 }
 0x36c   : > { %v7634_v60 = vpop.f32.mrf.mxu1  ;;  %v3143_v58 = vpop.permute.xlu0 %3142 }
 0x36d   : > { %v4243_v55 = vpack.c.bf16 %v7634_v60, %v7626_v38  ;;  %v3693_v10 = vsel %vm3669_vm2, %v3660_v2, %v3143_v58  ;;  %v2959_v41 = vpop.permute.xlu2 %2958 }
 0x36e   : > { %v3846_v43 = vpop.f32.mrf.mxu0  ;;  %v3726_v45 = vsel %vm3702_vm3, %v3693_v10, %v3415_v19 }
 0x36f   : > { %4299 = vst [vmem:[%s4430_s25 + $0x28] sm:$0xff] %v4243_v55   ;;  %v4228_v39 = vpack.c.bf16 %v3846_v43, %v3844_v11  ;;  %v3983_v7 = vadd.f32 %v3982_v13, %v3846_v43  ;;  %v4024_v62 = vmul.f32 %v3846_v43, %v3846_v43  ;;  %v3149_v57 = vpop.permute.xlu1 %3148 }
 0x370   : > { %v3699_v20 = vsel %vm3669_vm2, %v3666_v40, %v3149_v57  ;;  %v4030_v57 = vmul.f32 %v7634_v60, %v7634_v60 }
 0x371   : > { %4296 = vst [vmem:[%s4430_s25 + $0x10] sm:$0xff] %v4228_v39   ;;  %v4055_v14 = vadd.f32 %v4054_v51, %v4024_v62  ;;  %v4029_v39 = vmul.f32 %v7626_v38, %v7626_v38 }
 0x374   : > { %v3421_v26 = vpop.permute.xlu0 %3420 }
 0x375   : > { %v3732_v53 = vsel %vm3702_vm3, %v3699_v20, %v3421_v26  ;;  %v3423_v6 = vpop.permute.xlu2 %3422 }
 0x376   : > { %v3765_v32 = vsel %vm3735_vm4, %v3732_v53, %v3501_v33 }
 0x377   : > { %v3495_v0 = vpop.permute.xlu1 %3494  ;;  %4207 = vmatmul.msk.bf16.gmra.mxu3 %vm3788_vm5, %v3765_v32 }
 0x378   : > { %v3759_v46 = vsel %vm3735_vm4, %v3726_v45, %v3495_v0 }
 0x379   : > { %4204 = vmatmul.msk.bf16.gmra.mxu2 %vm3788_vm5, %v3759_v46 }
 0x37c   : > { %v2575_v49 = vpop.permute.xlu0 %2574 }
 0x37d   : > { %v3569_v48 = vsel %vm3537_vm13, %v3536_v21, %v2575_v49 }
 0x37f   : > { %v2687_v44 = vpop.permute.xlu1 %2686 }
 0x380   : > { %v3602_v47 = vsel %vm3570_vm15, %v3569_v48, %v2687_v44  ;;  %v4035_v48 = vmul.f32 %v7609_v35, %v7609_v35 }
 0x381   : > { %v3635_v34 = vsel %vm3603_vm0, %v3602_v47, %v2959_v41 }
 0x384   : > { %v3039_v27 = vpop.permute.xlu0 %3038 }
 0x385   : > { %v3668_v16 = vsel %vm3636_vm1, %v3635_v34, %v3039_v27 }
 0x387   : > { %v3151_v17 = vpop.permute.xlu1 %3150 }
 0x388   : > { %v3701_v63 = vsel %vm3669_vm2, %v3668_v16, %v3151_v17  ;;  %v4036_v17 = vmul.f32 %v7617_v30, %v7617_v30 }
 0x389   : > { %v3734_v37 = vsel %vm3702_vm3, %v3701_v63, %v3423_v6 }
 0x38a   : > { %v7666_v36 = vpop.f32.mrf.mxu3 }
 0x38c   : > { %v7668_v25 = vpop.f32.mrf.mxu2  ;;  %v3503_v54 = vpop.permute.xlu0 %3502 }
 0x38d   : > { %v3767_v52 = vsel %vm3735_vm4, %v3734_v37, %v3503_v54  ;;  %v4037_v63 = vmul.f32 %v7668_v25, %v7668_v25 }
 0x38e   : > { %4208 = vmatmul.msk.bf16.gmra.mxu3 %vm3788_vm5, %v3767_v52 }
 0x392   : > { %v7673_v9 = vpop.f32.mrf.mxu3 }
 0x393   : > { %v4278_v11 = vpack.c.bf16 %v7673_v9, %v7666_v36 }
 0x394   : > { %v7677_v13 = vpop.f32.mrf.mxu2 }
 0x395   : > { %4306 = vst [vmem:[%s4430_s25 + $0x60] sm:$0xff] %v4278_v11   ;;  %v4263_v59 = vpack.c.bf16 %v7677_v13, %v7668_v25  ;;  %v4038_v37 = vmul.f32 %v7677_v13, %v7677_v13 }
 0x397   : > { %4303 = vst [vmem:[%s4430_s25 + $0x48] sm:$0xff] %v4263_v59  }
 0x3a4   : > { %v3864_v24 = vpop.f32.mrf.mxu1 }
 0x3a5   : > { %v4031_v56 = vmul.f32 %v3864_v24, %v3864_v24 }
 0x3a6   : > { %v3849_v51 = vpop.f32.mrf.mxu0 }
 0x3a7   : > { %v3984_v29 = vadd.f32 %v3983_v7, %v3849_v51  ;;  %v4025_v15 = vmul.f32 %v3849_v51, %v3849_v51 }
 0x3a9   : > { %v4056_v61 = vadd.f32 %v4055_v14, %v4025_v15 }
 0x3ac   : > { %v3866_v1 = vpop.f32.mrf.mxu1 }
 0x3ad   : > { %v4248_v28 = vpack.c.bf16 %v3866_v1, %v3864_v24 }
 0x3ae   : > { %v3851_v22 = vpop.f32.mrf.mxu0 }
 0x3af   : > { %4300 = vst [vmem:[%s4430_s25 + $0x30] sm:$0xff] %v4248_v28   ;;  %v4233_v19 = vpack.c.bf16 %v3851_v22, %v3849_v51  ;;  %v3985_v55 = vadd.f32 %v3984_v29, %v3851_v22  ;;  %v4026_v58 = vmul.f32 %v3851_v22, %v3851_v22 }
 0x3b1   : > { %4297 = vst [vmem:[%s4430_s25 + $0x18] sm:$0xff] %v4233_v19   ;;  %v3986_v18 = vadd.f32 %v3985_v55, %v7587_v3  ;;  %v4057_v8 = vadd.f32 %v4056_v61, %v4026_v58 }
 0x3b3   : > { %v3987_v43 = vadd.f32 %v3986_v18, %v7599_v5  ;;  %v4058_v31 = vadd.f32 %v4057_v8, %v4027_v42  ;;  %v4032_v5 = vmul.f32 %v3866_v1, %v3866_v1  ;;  %v4043_v18 = vmul.f32 %v7666_v36, %v7666_v36 }
 0x3b5   : > { %v3988_v7 = vadd.f32 %v3987_v43, %v7626_v38  ;;  %v4059_v62 = vadd.f32 %v4058_v31, %v4028_v12  ;;  %v4044_v43 = vmul.f32 %v7673_v9, %v7673_v9 }
 0x3b7   : > { %v4060_v23 = vadd.f32 %v4059_v62, %v4029_v39  ;;  %v3989_v3 = vadd.f32 %v3988_v7, %v7634_v60 }
 0x3b9   : > { %v3990_v14 = vadd.f32 %v3989_v3, %v3864_v24  ;;  %v4061_v4 = vadd.f32 %v4060_v23, %v4030_v57 }
 0x3bb   : > { %v3991_v2 = vadd.f32 %v3990_v14, %v3866_v1  ;;  %v4062_v10 = vadd.f32 %v4061_v4, %v4031_v56 }
 0x3bd   : > { %v4063_v40 = vadd.f32 %v4062_v10, %v4032_v5 }
 0x3ca   : > { %v3899_v20 = vpop.f32.mrf.mxu3 }
 0x3cb   : > { %v4045_v7 = vmul.f32 %v3899_v20, %v3899_v20 }
 0x3cc   : > { %v3884_v26 = vpop.f32.mrf.mxu2 }
 0x3cd   : > { %v4039_v24 = vmul.f32 %v3884_v26, %v3884_v26 }
 0x3d2   : > { %v3901_v38 = vpop.f32.mrf.mxu3 }
 0x3d3   : > { %v4283_v33 = vpack.c.bf16 %v3901_v38, %v3899_v20  ;;  %v4046_v23 = vmul.f32 %v3901_v38, %v3901_v38 }
 0x3d4   : > { %v3886_v53 = vpop.f32.mrf.mxu2 }
 0x3d5   : > { %4307 = vst [vmem:[%s4430_s25 + $0x68] sm:$0xff] %v4283_v33   ;;  %v4268_v0 = vpack.c.bf16 %v3886_v53, %v3884_v26  ;;  %v4040_v29 = vmul.f32 %v3886_v53, %v3886_v53 }
 0x3d7   : > { %4304 = vst [vmem:[%s4430_s25 + $0x50] sm:$0xff] %v4268_v0   ;;  %v3869_v32 = vpop.f32.mrf.mxu1 }
 0x3d8   : > { %v4033_v60 = vmul.f32 %v3869_v32, %v3869_v32  ;;  %v3992_v49 = vadd.f32 %v3991_v2, %v3869_v32 }
 0x3da   : > { %v4064_v41 = vadd.f32 %v4063_v40, %v4033_v60 }
 0x3df   : > { %v3871_v45 = vpop.f32.mrf.mxu1 }
 0x3e0   : > { %v4253_v46 = vpack.c.bf16 %v3871_v45, %v3869_v32  ;;  %v4034_v44 = vmul.f32 %v3871_v45, %v3871_v45  ;;  %v3993_v50 = vadd.f32 %v3992_v49, %v3871_v45 }
 0x3e2   : > { %4301 = vst [vmem:[%s4430_s25 + $0x38] sm:$0xff] %v4253_v46   ;;  %v4065_v21 = vadd.f32 %v4064_v41, %v4034_v44  ;;  %v3994_v47 = vadd.f32 %v3993_v50, %v7609_v35 }
 0x3e4   : > { %v4066_v27 = vadd.f32 %v4065_v21, %v4035_v48  ;;  %v3995_v34 = vadd.f32 %v3994_v47, %v7617_v30 }
 0x3e6   : > { %v4067_v16 = vadd.f32 %v4066_v27, %v4036_v17  ;;  %v3996_v6 = vadd.f32 %v3995_v34, %v7668_v25  ;;  %v3978_v27 = vld [vmem:[%s7739_s3] sm:$0x1] }
 0x3e8   : > { %v4068_v54 = vadd.f32 %v4067_v16, %v4037_v63  ;;  %v3997_v52 = vadd.f32 %v3996_v6, %v7677_v13  ;;  %v4018_v16 = vld [vmem:[%s7740_s4] sm:$0x1] }
 0x3ea   : > { %v4069_v35 = vadd.f32 %v4068_v54, %v4038_v37  ;;  %v3998_v51 = vadd.f32 %v3997_v52, %v3884_v26 }
 0x3ec   : > { %v4070_v30 = vadd.f32 %v4069_v35, %v4039_v24  ;;  %v3999_v15 = vadd.f32 %v3998_v51, %v3886_v53 }
 0x3ee   : > { %v4071_v28 = vadd.f32 %v4070_v30, %v4040_v29 }
 0x3fa   : > { %v3904_v11 = vpop.f32.mrf.mxu3 }
 0x3fb   : > { %v4047_v4 = vmul.f32 %v3904_v11, %v3904_v11 }
 0x3fc   : > { %v3889_v59 = vpop.f32.mrf.mxu2 }
 0x3fd   : > { %v4041_v61 = vmul.f32 %v3889_v59, %v3889_v59  ;;  %v4000_v1 = vadd.f32 %v3999_v15, %v3889_v59 }
 0x3ff   : > { %v4072_v55 = vadd.f32 %v4071_v28, %v4041_v61 }
 0x402   : > { %v3906_v25 = vpop.f32.mrf.mxu3 }
 0x403   : > { %v4288_v22 = vpack.c.bf16 %v3906_v25, %v3904_v11 }
 0x404   : > { %v3891_v19 = vpop.f32.mrf.mxu2 }
 0x405   : > { %v4273_v58 = vpack.c.bf16 %v3891_v19, %v3889_v59  ;;  %v4001_v42 = vadd.f32 %v4000_v1, %v3891_v19  ;;  %v4042_v13 = vmul.f32 %v3891_v19, %v3891_v19  ;;  %4308 = vst [vmem:[%s4430_s25 + $0x70] sm:$0xff] %v4288_v22  }
 0x407   : > { %4305 = vst [vmem:[%s4430_s25 + $0x58] sm:$0xff] %v4273_v58   ;;  %v4002_v8 = vadd.f32 %v4001_v42, %v7666_v36  ;;  %v4073_v12 = vadd.f32 %v4072_v55, %v4042_v13  ;;  %v4048_v36 = vmul.f32 %v3906_v25, %v3906_v25 }
 0x409   : > { %v4003_v31 = vadd.f32 %v4002_v8, %v7673_v9  ;;  %v4074_v39 = vadd.f32 %v4073_v12, %v4043_v18 }
 0x40b   : > { %v4004_v62 = vadd.f32 %v4003_v31, %v3899_v20  ;;  %v4075_v57 = vadd.f32 %v4074_v39, %v4044_v43 }
 0x40d   : > { %v4076_v3 = vadd.f32 %v4075_v57, %v4045_v7  ;;  %v4005_v56 = vadd.f32 %v4004_v62, %v3901_v38 }
 0x40f   : > { %v4077_v14 = vadd.f32 %v4076_v3, %v4046_v23  ;;  %v4006_v5 = vadd.f32 %v4005_v56, %v3904_v11 }
 0x411   : > { %v3909_v2 = vpop.f32.mrf.mxu3  ;;  %v4078_v10 = vadd.f32 %v4077_v14, %v4047_v4  ;;  %v4007_v40 = vadd.f32 %v4006_v5, %v3906_v25 }
 0x412   : > { %v4049_v26 = vmul.f32 %v3909_v2, %v3909_v2 }
 0x413   : > { %v4079_v33 = vadd.f32 %v4078_v10, %v4048_v36  ;;  %v4008_v53 = vadd.f32 %v4007_v40, %v3909_v2 }
 0x415   : > { %v4080_v9 = vadd.f32 %v4079_v33, %v4049_v26 }
 0x419   : > { %v3911_v0 = vpop.f32.mrf.mxu3 }
 0x41a   : > { %v4293_v32 = vpack.c.bf16 %v3911_v0, %v3909_v2  ;;  %v4009_v45 = vadd.f32 %v4008_v53, %v3911_v0  ;;  %v4050_v20 = vmul.f32 %v3911_v0, %v3911_v0 }
 0x41c   : > { %4309 = vst [vmem:[%s4430_s25 + $0x78] sm:$0xff] %v4293_v32   ;;  %v4010_v46 = vrot.slane %v4009_v45, 4  ;;  %v4081_v60 = vadd.f32 %v4080_v9, %v4050_v20 }
 0x41e   : > { %v4011_v38 = vadd.f32 %v4010_v46, %v4009_v45  ;;  %v4082_v49 = vrot.slane %v4081_v60, 4 }
 0x420   : > { %v4012_v44 = vrot.slane %v4011_v38, 2  ;;  %v4083_v41 = vadd.f32 %v4082_v49, %v4081_v60 }
 0x422   : > { %v4013_v50 = vadd.f32 %v4012_v44, %v4011_v38  ;;  %v4084_v21 = vrot.slane %v4083_v41, 2 }
 0x424   : > { %v4014_v48 = vrot.slane %v4013_v50, 1  ;;  %v4085_v47 = vadd.f32 %v4084_v21, %v4083_v41 }
 0x426   : > { %v4015_v17 = vadd.f32 %v4014_v48, %v4013_v50  ;;  %v4086_v34 = vrot.slane %v4085_v47, 1 }
 0x428   : > { %v4016_v63 = vadd.f32 %v4015_v17, %v3978_v27  ;;  %v4087_v6 = vadd.f32 %v4086_v34, %v4085_v47 }
 0x42a   : > { %4017 = vst [vmem:[%s7739_s3] sm:$0x1] %v4016_v63  ;;  %v4088_v54 = vadd.f32 %v4087_v6, %v4018_v16 }
 0x42c   : > { %4089 = vst [vmem:[%s7740_s4] sm:$0x1] %v4088_v54 }
 0x42d PF: > { %s15_s15 = sadd.s32 1, %s4361_s15  }
 0x42e   : > { %p12_p5 = scmp.ge.s32.totalorder %s15_s15, 4  }
 0x430   :  { %14 = sbr.rel (!%p12_p5) target bundleno = 1 (0x1), region = 78 }

</bundles_post_ra>
